<compile_context>
chip_gen: v6e
topology: v6e:2x2x1
jax: 0.10.0
libtpu: 0.0.40
codegen_flags: <defaults>
</compile_context>

<pallas_src>
import jax
import jax.numpy as jnp
import numpy as np
from jax.experimental import pallas as pl
from jax.experimental.pallas import tpu as pltpu

C1_OUT = 3   # conv_1 out_channels
C2_OUT = 3   # conv_2 out_channels
K = 3        # kernel size (3, 3)
_ROW_CHUNK = 8   # one sublane tile of output rows per accumulation chunk


def block_kernel(x_ref, selr_ref, selc_ref, w1_ref, b1_ref, w2_ref, b2_ref,
                 out_ref, h1_ref, h2_ref):
    """Conv(1->3,3x3,valid)+ReLU -> Conv(3->3,3x3,valid)+ReLU -> MaxPool(2x2,stride 2).

    x_ref    : (H, PW)          f32 VMEM — P images packed along lanes (PW = P*W)
    selr_ref : (Hp, H2-1)       f32 VMEM — even-row 0/1 selection
    selc_ref : (PW-5, P*Wp)     f32 VMEM — even-col + valid-col + compaction 0/1 selection
    w*/b*    : flattened conv params in SMEM (scalar reads)
    out_ref  : (C2, Hp, P*Wp)   f32 VMEM lane-packed pooled output
    h1_ref   : (C1, H-2, PW-2)  f32 VMEM scratch (conv_1 activations)
    h2_ref   : (C2, H-4, PW-4)  f32 VMEM scratch (conv_2 activations)
    """
    H, PW = x_ref.shape
    H1, W1 = H - (K - 1), PW - (K - 1)     # after conv_1 (valid, packed width)
    H2, W2 = H1 - (K - 1), W1 - (K - 1)    # after conv_2 (valid, packed width)

    # ---- conv_1 (1->3) + ReLU: 8-row chunks, taps outer / channels inner,      ----
    # ---- accumulators stay in vregs, one store per chunk per channel.          ----
    for r0 in range(0, H1, _ROW_CHUNK):
        ch = min(_ROW_CHUNK, H1 - r0)
        acc = [None] * C1_OUT
        for ki in range(K):
            for kj in range(K):
                tap = x_ref[r0 + ki:r0 + ki + ch, kj:kj + W1]        # (ch, W1)
                for co in range(C1_OUT):
                    w = w1_ref[co * K * K + ki * K + kj]
                    if acc[co] is None:
                        acc[co] = tap * w + b1_ref[co]               # bias folded in
                    else:
                        acc[co] = acc[co] + tap * w
        for co in range(C1_OUT):
            h1_ref[co, r0:r0 + ch, :] = jnp.maximum(acc[co], 0.0)

    # ---- conv_2 (3->3) + ReLU: same chunked register-resident accumulation ----
    for r0 in range(0, H2, _ROW_CHUNK):
        ch = min(_ROW_CHUNK, H2 - r0)
        acc = [None] * C2_OUT
        for ci in range(C1_OUT):
            for ki in range(K):
                for kj in range(K):
                    tap = h1_ref[ci, r0 + ki:r0 + ki + ch, kj:kj + W2]   # (ch, W2)
                    for co in range(C2_OUT):
                        w = w2_ref[((co * C1_OUT + ci) * K + ki) * K + kj]
                        if acc[co] is None:
                            acc[co] = tap * w + b2_ref[co]
                        else:
                            acc[co] = acc[co] + tap * w
        for co in range(C2_OUT):
            h2_ref[co, r0:r0 + ch, :] = jnp.maximum(acc[co], 0.0)

    # ---- pool_3: 2x2/stride-2 max pool via pair maxes + two 2-D selection matmuls ----
    # Row subsample first (halves the rows through the column matmul), then the column
    # selection matmul (even columns + drop cross-image garbage + compact lanes).
    sel_r = selr_ref[...]                                    # (Hp, H2-1)
    sel_c = selc_ref[...]                                    # (W2-1, P*Wp)
    Wc = W2 - 1
    for co in range(C2_OUT):
        left = h2_ref[co, :, :Wc]                            # (H2, Wc)
        right = h2_ref[co, :, 1:W2]                          # (H2, Wc)
        hm = jnp.maximum(left, right)                        # horizontal pair max
        rm = jnp.maximum(hm[:H2 - 1, :], hm[1:H2, :])        # 2x2 window max, anchor (r, c)
        pr = jnp.dot(sel_r, rm,
                     precision=jax.lax.Precision.HIGHEST,
                     preferred_element_type=jnp.float32)     # even rows  -> (Hp, Wc)
        out_ref[co] = jnp.dot(pr, sel_c,
                              precision=jax.lax.Precision.HIGHEST,
                              preferred_element_type=jnp.float32)   # (Hp, P*Wp)


def _vmem_capacity_bytes():
    try:
        return int(pltpu.get_tpu_info().vmem_capacity_bytes)
    except Exception:
        return 64 * 1024 * 1024   # conservative fallback: v7x per-TensorCore VMEM


def _plan(B, H, W):
    """Pick images-per-pack P and the Mosaic VMEM limit from the real chip generation."""
    H1, W1 = H - 2, W - 2
    H2, W2 = H1 - 2, W1 - 2
    Hp, Wp = H2 // 2, W2 // 2
    vmem_cap = _vmem_capacity_bytes()
    budget = int(0.35 * vmem_cap)

    def footprint(p):
        pw = p * W
        return 4 * (2 * H * pw                               # double-buffered input block
                    + C1_OUT * H1 * (pw - 2)                 # h1 scratch
                    + C2_OUT * H2 * (pw - 4)                 # h2 scratch
                    + 2 * C2_OUT * Hp * p * Wp               # double-buffered output block
                    + 2 * ((pw - 5) * p * Wp + Hp * (H2 - 1))  # selection matrices
                    + 4 * H2 * pw)                           # pooling temps / spill headroom

    p_lane = max(1, 512 // W)          # target ~512 useful lanes per vreg row
    p_grid = max(1, B // 2)            # keep >= 2 grid steps (v7x: 2 TensorCores + pipelining)
    P = max(1, min(p_lane, p_grid))
    while P > 1 and footprint(P) > budget:
        P -= 1
    vmem_limit = max(footprint(P) + (8 << 20), 32 << 20)
    vmem_limit = int(min(vmem_limit, int(0.9 * vmem_cap)))
    return P, vmem_limit


def block_forward(x_nchw, w1, b1, w2, b2):
    B, cin, H, W = x_nchw.shape
    assert cin == 1, "Block expects in_channels == 1"
    assert H >= 6 and W >= 6, "need H, W >= 6 for conv->conv->pool"
    H1, W1 = H - 2, W - 2
    H2, W2 = H1 - 2, W1 - 2
    Hp, Wp = H2 // 2, W2 // 2

    P, vmem_limit = _plan(B, H, W)
    G = -(-B // P)                     # number of image packs (= grid steps)
    PW = P * W                         # packed lane width fed to the kernel
    PWc = PW - 5                       # width of the horizontal pair-max rows
    OUTL = P * Wp                      # lane-packed pooled width per channel
    R = H2 - 1

    # ---- pack P images along the lane axis (layout plumbing, plain XLA, done once) ----
    x = x_nchw[:, 0, :, :].astype(jnp.float32)               # (B, H, W)
    if G * P != B:
        x = jnp.pad(x, ((0, G * P - B), (0, 0), (0, 0)))     # zero-pad batch to whole packs
    xp = x.reshape(G, P, H, W).transpose(0, 2, 1, 3).reshape(G, H, PW)

    # ---- 0/1 selection matrices (exact; built once outside the kernel, resident in VMEM) ----
    # sel_r picks even rows of the overlapping row-pair max.
    sel_r = (jax.lax.broadcasted_iota(jnp.int32, (Hp, R), 1)
             == 2 * jax.lax.broadcasted_iota(jnp.int32, (Hp, R), 0)).astype(jnp.float32)
    # sel_c picks, for image p / pooled column k, packed column p*W + 2k
    # (even-column subsample + drop cross-image garbage + compaction to a dense slab).
    src = jax.lax.broadcasted_iota(jnp.int32, (PWc, OUTL), 0)
    dst = jax.lax.broadcasted_iota(jnp.int32, (PWc, OUTL), 1)
    sel_c = (src == (dst // Wp) * W + 2 * (dst % Wp)).astype(jnp.float32)

    w1f = w1.reshape(-1).astype(jnp.float32)          # (27,)
    w2f = w2.reshape(-1).astype(jnp.float32)          # (81,)
    b1f = b1.astype(jnp.float32)                      # (3,)
    b2f = b2.astype(jnp.float32)                      # (3,)

    flops = (2 * B * (K * K * C1_OUT * H1 * W1 + K * K * C1_OUT * C2_OUT * H2 * W2)
             + 2 * G * C2_OUT * (Hp * R * PWc + Hp * PWc * OUTL))
    bytes_accessed = 4 * (G * H * PW + G * C2_OUT * Hp * OUTL
                          + Hp * R + PWc * OUTL
                          + w1f.size + w2f.size + b1f.size + b2f.size)

    out_packed = pl.pallas_call(
        block_kernel,
        out_shape=jax.ShapeDtypeStruct((G, C2_OUT, Hp, OUTL), jnp.float32),
        grid=(G,),
        in_specs=[
            pl.BlockSpec((None, H, PW), lambda g: (g, 0, 0)),       # image pack (VMEM)
            pl.BlockSpec((Hp, R), lambda g: (0, 0)),                # sel_r (fetched once)
            pl.BlockSpec((PWc, OUTL), lambda g: (0, 0)),            # sel_c (fetched once)
            pl.BlockSpec(memory_space=pltpu.MemorySpace.SMEM),      # w1 (flat)
            pl.BlockSpec(memory_space=pltpu.MemorySpace.SMEM),      # b1
            pl.BlockSpec(memory_space=pltpu.MemorySpace.SMEM),      # w2 (flat)
            pl.BlockSpec(memory_space=pltpu.MemorySpace.SMEM),      # b2
        ],
        out_specs=pl.BlockSpec((None, C2_OUT, Hp, OUTL), lambda g: (g, 0, 0, 0)),
        scratch_shapes=[
            pltpu.VMEM((C1_OUT, H1 if True else 0, PW - 2), jnp.float32)
            if False else pltpu.VMEM((C1_OUT, H - 2, PW - 2), jnp.float32),  # h1 activations
            pltpu.VMEM((C2_OUT, H - 4, PW - 4), jnp.float32),                # h2 activations
        ],
        compiler_params=pltpu.CompilerParams(
            dimension_semantics=("parallel",),        # packs are independent
            vmem_limit_bytes=vmem_limit,
        ),
        cost_estimate=pl.CostEstimate(
            flops=flops, transcendentals=0, bytes_accessed=bytes_accessed),
    )(xp, sel_r, sel_c, w1f, b1f, w2f, b2f)

    # (G, C, Hp, P*Wp) lane-packed slab -> NCHW (B, C, Hp, Wp): layout plumbing only.
    out = out_packed.reshape(G, C2_OUT, Hp, P, Wp).transpose(0, 3, 1, 2, 4)
    return out.reshape(G * P, C2_OUT, Hp, Wp)[:B]


def reference_forward(x_nchw, w1, b1, w2, b2):
    """Plain-JAX reference mirroring the PyTorch module (full-precision convs)."""
    dn = ("NCHW", "OIHW", "NCHW")
    hp = jax.lax.Precision.HIGHEST
    y = jax.lax.conv_general_dilated(x_nchw, w1, (1, 1), "VALID",
                                     dimension_numbers=dn, precision=hp)
    y = jax.nn.relu(y + b1[None, :, None, None])
    y = jax.lax.conv_general_dilated(y, w2, (1, 1), "VALID",
                                     dimension_numbers=dn, precision=hp)
    y = jax.nn.relu(y + b2[None, :, None, None])
    y = jax.lax.reduce_window(y, -jnp.inf, jax.lax.max,
                              (1, 1, 2, 2), (1, 1, 2, 2), "VALID")
    return y


if __name__ == "__main__":
    key = jax.random.PRNGKey(0)
    kx, k1, k2, k3, k4 = jax.random.split(key, 5)

    # Small deterministic example consistent with the module: NCHW, 1 input channel.
    B, H, W = 2, 16, 16
    x = jax.random.normal(kx, (B, 1, H, W), jnp.float32)

    # Deterministic synthetic parameters (shapes from nn.Conv2d in __init__).
    w1 = jax.random.normal(k1, (3, 1, 3, 3), jnp.float32) * 0.3
    b1 = jax.random.normal(k2, (3,), jnp.float32) * 0.1
    w2 = jax.random.normal(k3, (3, 3, 3, 3), jnp.float32) * 0.2
    b2 = jax.random.normal(k4, (3,), jnp.float32) * 0.1

    out = jax.block_until_ready(block_forward(x, w1, b1, w2, b2))
    ref = jax.block_until_ready(reference_forward(x, w1, b1, w2, b2))

    assert out.shape == (B, 3, (H - 4) // 2, (W - 4) // 2), out.shape
    np.testing.assert_allclose(np.asarray(out), np.asarray(ref), rtol=1e-4, atol=1e-4)

    print("KERNEL_OK")
</pallas_src>

<mosaic_0001>
module attributes {stable_mosaic.version = 11 : i64} {
  func.func @block_kernel(%arg0: i32, %arg1: memref<1x16x16xf32, #tpu.memory_space<vmem>>, %arg2: memref<6x11xf32, #tpu.memory_space<vmem>>, %arg3: memref<11x6xf32, #tpu.memory_space<vmem>>, %arg4: memref<27xf32, #tpu.memory_space<smem>>, %arg5: memref<3xf32, #tpu.memory_space<smem>>, %arg6: memref<81xf32, #tpu.memory_space<smem>>, %arg7: memref<3xf32, #tpu.memory_space<smem>>, %arg8: memref<1x3x6x6xf32, #tpu.memory_space<vmem>>, %arg9: memref<3x14x14xf32, #tpu.memory_space<vmem>>, %arg10: memref<3x12x12xf32, #tpu.memory_space<vmem>>) attributes {dimension_semantics = [#tpu.dimension_semantics<parallel>], iteration_bounds = array<i64: 2>, scalar_prefetch = 0 : i64, scratch_operands = 2 : i64, tpu.core_type = #tpu.core_type<tc>, window_params = [{transform_indices = @transform_0, window_bounds = array<i64: 1, 16, 16>}, {pipeline_mode = #tpu.pipeline_mode<synchronous>, transform_indices = @transform_1, window_bounds = array<i64: 6, 11>}, {pipeline_mode = #tpu.pipeline_mode<synchronous>, transform_indices = @transform_2, window_bounds = array<i64: 11, 6>}, {transform_indices = @transform_3, window_bounds = array<i64: 27>}, {transform_indices = @transform_4, window_bounds = array<i64: 3>}, {transform_indices = @transform_5, window_bounds = array<i64: 81>}, {transform_indices = @transform_6, window_bounds = array<i64: 3>}, {transform_indices = @transform_7, window_bounds = array<i64: 1, 3, 6, 6>}]} {
    %c0 = arith.constant 0 : index
    %c0_0 = arith.constant 0 : index
    %c0_1 = arith.constant 0 : index
    %0 = vector.load %arg1[%c0, %c0_0, %c0_1] : memref<1x16x16xf32, #tpu.memory_space<vmem>>, vector<1x8x14xf32>
    %1 = vector.shape_cast %0 : vector<1x8x14xf32> to vector<8x14xf32>
    %c0_2 = arith.constant 0 : index
    %2 = memref.load %arg4[%c0_2] : memref<27xf32, #tpu.memory_space<smem>>
    %3 = vector.broadcast %2 : f32 to vector<8x14xf32>
    %4 = arith.mulf %1, %3 : vector<8x14xf32>
    %c0_3 = arith.constant 0 : index
    %5 = memref.load %arg5[%c0_3] : memref<3xf32, #tpu.memory_space<smem>>
    %6 = vector.broadcast %5 : f32 to vector<8x14xf32>
    %7 = arith.addf %4, %6 : vector<8x14xf32>
    %c9 = arith.constant 9 : index
    %8 = memref.load %arg4[%c9] : memref<27xf32, #tpu.memory_space<smem>>
    %9 = vector.broadcast %8 : f32 to vector<8x14xf32>
    %10 = arith.mulf %1, %9 : vector<8x14xf32>
    %c1 = arith.constant 1 : index
    %11 = memref.load %arg5[%c1] : memref<3xf32, #tpu.memory_space<smem>>
    %12 = vector.broadcast %11 : f32 to vector<8x14xf32>
    %13 = arith.addf %10, %12 : vector<8x14xf32>
    %c18 = arith.constant 18 : index
    %14 = memref.load %arg4[%c18] : memref<27xf32, #tpu.memory_space<smem>>
    %15 = vector.broadcast %14 : f32 to vector<8x14xf32>
    %16 = arith.mulf %1, %15 : vector<8x14xf32>
    %c2 = arith.constant 2 : index
    %17 = memref.load %arg5[%c2] : memref<3xf32, #tpu.memory_space<smem>>
    %18 = vector.broadcast %17 : f32 to vector<8x14xf32>
    %19 = arith.addf %16, %18 : vector<8x14xf32>
    %c0_4 = arith.constant 0 : index
    %c0_5 = arith.constant 0 : index
    %c1_6 = arith.constant 1 : index
    %20 = vector.load %arg1[%c0_4, %c0_5, %c1_6] : memref<1x16x16xf32, #tpu.memory_space<vmem>>, vector<1x8x14xf32>
    %21 = vector.shape_cast %20 : vector<1x8x14xf32> to vector<8x14xf32>
    %c1_7 = arith.constant 1 : index
    %22 = memref.load %arg4[%c1_7] : memref<27xf32, #tpu.memory_space<smem>>
    %23 = vector.broadcast %22 : f32 to vector<8x14xf32>
    %24 = arith.mulf %21, %23 : vector<8x14xf32>
    %25 = arith.addf %7, %24 : vector<8x14xf32>
    %c10 = arith.constant 10 : index
    %26 = memref.load %arg4[%c10] : memref<27xf32, #tpu.memory_space<smem>>
    %27 = vector.broadcast %26 : f32 to vector<8x14xf32>
    %28 = arith.mulf %21, %27 : vector<8x14xf32>
    %29 = arith.addf %13, %28 : vector<8x14xf32>
    %c19 = arith.constant 19 : index
    %30 = memref.load %arg4[%c19] : memref<27xf32, #tpu.memory_space<smem>>
    %31 = vector.broadcast %30 : f32 to vector<8x14xf32>
    %32 = arith.mulf %21, %31 : vector<8x14xf32>
    %33 = arith.addf %19, %32 : vector<8x14xf32>
    %c0_8 = arith.constant 0 : index
    %c0_9 = arith.constant 0 : index
    %c2_10 = arith.constant 2 : index
    %34 = vector.load %arg1[%c0_8, %c0_9, %c2_10] : memref<1x16x16xf32, #tpu.memory_space<vmem>>, vector<1x8x14xf32>
    %35 = vector.shape_cast %34 : vector<1x8x14xf32> to vector<8x14xf32>
    %c2_11 = arith.constant 2 : index
    %36 = memref.load %arg4[%c2_11] : memref<27xf32, #tpu.memory_space<smem>>
    %37 = vector.broadcast %36 : f32 to vector<8x14xf32>
    %38 = arith.mulf %35, %37 : vector<8x14xf32>
    %39 = arith.addf %25, %38 : vector<8x14xf32>
    %c11 = arith.constant 11 : index
    %40 = memref.load %arg4[%c11] : memref<27xf32, #tpu.memory_space<smem>>
    %41 = vector.broadcast %40 : f32 to vector<8x14xf32>
    %42 = arith.mulf %35, %41 : vector<8x14xf32>
    %43 = arith.addf %29, %42 : vector<8x14xf32>
    %c20 = arith.constant 20 : index
    %44 = memref.load %arg4[%c20] : memref<27xf32, #tpu.memory_space<smem>>
    %45 = vector.broadcast %44 : f32 to vector<8x14xf32>
    %46 = arith.mulf %35, %45 : vector<8x14xf32>
    %47 = arith.addf %33, %46 : vector<8x14xf32>
    %c0_12 = arith.constant 0 : index
    %c1_13 = arith.constant 1 : index
    %c0_14 = arith.constant 0 : index
    %48 = vector.load %arg1[%c0_12, %c1_13, %c0_14] : memref<1x16x16xf32, #tpu.memory_space<vmem>>, vector<1x8x14xf32>
    %49 = vector.shape_cast %48 : vector<1x8x14xf32> to vector<8x14xf32>
    %c3 = arith.constant 3 : index
    %50 = memref.load %arg4[%c3] : memref<27xf32, #tpu.memory_space<smem>>
    %51 = vector.broadcast %50 : f32 to vector<8x14xf32>
    %52 = arith.mulf %49, %51 : vector<8x14xf32>
    %53 = arith.addf %39, %52 : vector<8x14xf32>
    %c12 = arith.constant 12 : index
    %54 = memref.load %arg4[%c12] : memref<27xf32, #tpu.memory_space<smem>>
    %55 = vector.broadcast %54 : f32 to vector<8x14xf32>
    %56 = arith.mulf %49, %55 : vector<8x14xf32>
    %57 = arith.addf %43, %56 : vector<8x14xf32>
    %c21 = arith.constant 21 : index
    %58 = memref.load %arg4[%c21] : memref<27xf32, #tpu.memory_space<smem>>
    %59 = vector.broadcast %58 : f32 to vector<8x14xf32>
    %60 = arith.mulf %49, %59 : vector<8x14xf32>
    %61 = arith.addf %47, %60 : vector<8x14xf32>
    %c0_15 = arith.constant 0 : index
    %c1_16 = arith.constant 1 : index
    %c1_17 = arith.constant 1 : index
    %62 = vector.load %arg1[%c0_15, %c1_16, %c1_17] : memref<1x16x16xf32, #tpu.memory_space<vmem>>, vector<1x8x14xf32>
    %63 = vector.shape_cast %62 : vector<1x8x14xf32> to vector<8x14xf32>
    %c4 = arith.constant 4 : index
    %64 = memref.load %arg4[%c4] : memref<27xf32, #tpu.memory_space<smem>>
    %65 = vector.broadcast %64 : f32 to vector<8x14xf32>
    %66 = arith.mulf %63, %65 : vector<8x14xf32>
    %67 = arith.addf %53, %66 : vector<8x14xf32>
    %c13 = arith.constant 13 : index
    %68 = memref.load %arg4[%c13] : memref<27xf32, #tpu.memory_space<smem>>
    %69 = vector.broadcast %68 : f32 to vector<8x14xf32>
    %70 = arith.mulf %63, %69 : vector<8x14xf32>
    %71 = arith.addf %57, %70 : vector<8x14xf32>
    %c22 = arith.constant 22 : index
    %72 = memref.load %arg4[%c22] : memref<27xf32, #tpu.memory_space<smem>>
    %73 = vector.broadcast %72 : f32 to vector<8x14xf32>
    %74 = arith.mulf %63, %73 : vector<8x14xf32>
    %75 = arith.addf %61, %74 : vector<8x14xf32>
    %c0_18 = arith.constant 0 : index
    %c1_19 = arith.constant 1 : index
    %c2_20 = arith.constant 2 : index
    %76 = vector.load %arg1[%c0_18, %c1_19, %c2_20] : memref<1x16x16xf32, #tpu.memory_space<vmem>>, vector<1x8x14xf32>
    %77 = vector.shape_cast %76 : vector<1x8x14xf32> to vector<8x14xf32>
    %c5 = arith.constant 5 : index
    %78 = memref.load %arg4[%c5] : memref<27xf32, #tpu.memory_space<smem>>
    %79 = vector.broadcast %78 : f32 to vector<8x14xf32>
    %80 = arith.mulf %77, %79 : vector<8x14xf32>
    %81 = arith.addf %67, %80 : vector<8x14xf32>
    %c14 = arith.constant 14 : index
    %82 = memref.load %arg4[%c14] : memref<27xf32, #tpu.memory_space<smem>>
    %83 = vector.broadcast %82 : f32 to vector<8x14xf32>
    %84 = arith.mulf %77, %83 : vector<8x14xf32>
    %85 = arith.addf %71, %84 : vector<8x14xf32>
    %c23 = arith.constant 23 : index
    %86 = memref.load %arg4[%c23] : memref<27xf32, #tpu.memory_space<smem>>
    %87 = vector.broadcast %86 : f32 to vector<8x14xf32>
    %88 = arith.mulf %77, %87 : vector<8x14xf32>
    %89 = arith.addf %75, %88 : vector<8x14xf32>
    %c0_21 = arith.constant 0 : index
    %c2_22 = arith.constant 2 : index
    %c0_23 = arith.constant 0 : index
    %90 = vector.load %arg1[%c0_21, %c2_22, %c0_23] : memref<1x16x16xf32, #tpu.memory_space<vmem>>, vector<1x8x14xf32>
    %91 = vector.shape_cast %90 : vector<1x8x14xf32> to vector<8x14xf32>
    %c6 = arith.constant 6 : index
    %92 = memref.load %arg4[%c6] : memref<27xf32, #tpu.memory_space<smem>>
    %93 = vector.broadcast %92 : f32 to vector<8x14xf32>
    %94 = arith.mulf %91, %93 : vector<8x14xf32>
    %95 = arith.addf %81, %94 : vector<8x14xf32>
    %c15 = arith.constant 15 : index
    %96 = memref.load %arg4[%c15] : memref<27xf32, #tpu.memory_space<smem>>
    %97 = vector.broadcast %96 : f32 to vector<8x14xf32>
    %98 = arith.mulf %91, %97 : vector<8x14xf32>
    %99 = arith.addf %85, %98 : vector<8x14xf32>
    %c24 = arith.constant 24 : index
    %100 = memref.load %arg4[%c24] : memref<27xf32, #tpu.memory_space<smem>>
    %101 = vector.broadcast %100 : f32 to vector<8x14xf32>
    %102 = arith.mulf %91, %101 : vector<8x14xf32>
    %103 = arith.addf %89, %102 : vector<8x14xf32>
    %c0_24 = arith.constant 0 : index
    %c2_25 = arith.constant 2 : index
    %c1_26 = arith.constant 1 : index
    %104 = vector.load %arg1[%c0_24, %c2_25, %c1_26] : memref<1x16x16xf32, #tpu.memory_space<vmem>>, vector<1x8x14xf32>
    %105 = vector.shape_cast %104 : vector<1x8x14xf32> to vector<8x14xf32>
    %c7 = arith.constant 7 : index
    %106 = memref.load %arg4[%c7] : memref<27xf32, #tpu.memory_space<smem>>
    %107 = vector.broadcast %106 : f32 to vector<8x14xf32>
    %108 = arith.mulf %105, %107 : vector<8x14xf32>
    %109 = arith.addf %95, %108 : vector<8x14xf32>
    %c16 = arith.constant 16 : index
    %110 = memref.load %arg4[%c16] : memref<27xf32, #tpu.memory_space<smem>>
    %111 = vector.broadcast %110 : f32 to vector<8x14xf32>
    %112 = arith.mulf %105, %111 : vector<8x14xf32>
    %113 = arith.addf %99, %112 : vector<8x14xf32>
    %c25 = arith.constant 25 : index
    %114 = memref.load %arg4[%c25] : memref<27xf32, #tpu.memory_space<smem>>
    %115 = vector.broadcast %114 : f32 to vector<8x14xf32>
    %116 = arith.mulf %105, %115 : vector<8x14xf32>
    %117 = arith.addf %103, %116 : vector<8x14xf32>
    %c0_27 = arith.constant 0 : index
    %c2_28 = arith.constant 2 : index
    %c2_29 = arith.constant 2 : index
    %118 = vector.load %arg1[%c0_27, %c2_28, %c2_29] : memref<1x16x16xf32, #tpu.memory_space<vmem>>, vector<1x8x14xf32>
    %119 = vector.shape_cast %118 : vector<1x8x14xf32> to vector<8x14xf32>
    %c8 = arith.constant 8 : index
    %120 = memref.load %arg4[%c8] : memref<27xf32, #tpu.memory_space<smem>>
    %121 = vector.broadcast %120 : f32 to vector<8x14xf32>
    %122 = arith.mulf %119, %121 : vector<8x14xf32>
    %123 = arith.addf %109, %122 : vector<8x14xf32>
    %c17 = arith.constant 17 : index
    %124 = memref.load %arg4[%c17] : memref<27xf32, #tpu.memory_space<smem>>
    %125 = vector.broadcast %124 : f32 to vector<8x14xf32>
    %126 = arith.mulf %119, %125 : vector<8x14xf32>
    %127 = arith.addf %113, %126 : vector<8x14xf32>
    %c26 = arith.constant 26 : index
    %128 = memref.load %arg4[%c26] : memref<27xf32, #tpu.memory_space<smem>>
    %129 = vector.broadcast %128 : f32 to vector<8x14xf32>
    %130 = arith.mulf %119, %129 : vector<8x14xf32>
    %131 = arith.addf %117, %130 : vector<8x14xf32>
    %cst = arith.constant 0.000000e+00 : f32
    %132 = vector.broadcast %cst : f32 to vector<8x14xf32>
    %133 = arith.maximumf %123, %132 : vector<8x14xf32>
    %c0_30 = arith.constant 0 : index
    %c0_31 = arith.constant 0 : index
    %c0_32 = arith.constant 0 : index
    %134 = vector.load %arg9[%c0_30, %c0_31, %c0_32] : memref<3x14x14xf32, #tpu.memory_space<vmem>>, vector<1x8x14xf32>
    %135 = vector.shape_cast %134 : vector<1x8x14xf32> to vector<8x14xf32>
    %136 = vector.shape_cast %133 : vector<8x14xf32> to vector<1x8x14xf32>
    tpu.vector_store %arg9[%c0_30, %c0_31, %c0_32], %136 {strides = array<i32>} : memref<3x14x14xf32, #tpu.memory_space<vmem>>, vector<1x8x14xf32>,
    %cst_33 = arith.constant 0.000000e+00 : f32
    %137 = vector.broadcast %cst_33 : f32 to vector<8x14xf32>
    %138 = arith.maximumf %127, %137 : vector<8x14xf32>
    %c1_34 = arith.constant 1 : index
    %c0_35 = arith.constant 0 : index
    %c0_36 = arith.constant 0 : index
    %139 = vector.load %arg9[%c1_34, %c0_35, %c0_36] : memref<3x14x14xf32, #tpu.memory_space<vmem>>, vector<1x8x14xf32>
    %140 = vector.shape_cast %139 : vector<1x8x14xf32> to vector<8x14xf32>
    %141 = vector.shape_cast %138 : vector<8x14xf32> to vector<1x8x14xf32>
    tpu.vector_store %arg9[%c1_34, %c0_35, %c0_36], %141 {strides = array<i32>} : memref<3x14x14xf32, #tpu.memory_space<vmem>>, vector<1x8x14xf32>,
    %cst_37 = arith.constant 0.000000e+00 : f32
    %142 = vector.broadcast %cst_37 : f32 to vector<8x14xf32>
    %143 = arith.maximumf %131, %142 : vector<8x14xf32>
    %c2_38 = arith.constant 2 : index
    %c0_39 = arith.constant 0 : index
    %c0_40 = arith.constant 0 : index
    %144 = vector.load %arg9[%c2_38, %c0_39, %c0_40] : memref<3x14x14xf32, #tpu.memory_space<vmem>>, vector<1x8x14xf32>
    %145 = vector.shape_cast %144 : vector<1x8x14xf32> to vector<8x14xf32>
    %146 = vector.shape_cast %143 : vector<8x14xf32> to vector<1x8x14xf32>
    tpu.vector_store %arg9[%c2_38, %c0_39, %c0_40], %146 {strides = array<i32>} : memref<3x14x14xf32, #tpu.memory_space<vmem>>, vector<1x8x14xf32>,
    %c0_41 = arith.constant 0 : index
    %c8_42 = arith.constant 8 : index
    %c0_43 = arith.constant 0 : index
    %147 = vector.load %arg1[%c0_41, %c8_42, %c0_43] : memref<1x16x16xf32, #tpu.memory_space<vmem>>, vector<1x6x14xf32>
    %148 = vector.shape_cast %147 : vector<1x6x14xf32> to vector<6x14xf32>
    %c0_44 = arith.constant 0 : index
    %149 = memref.load %arg4[%c0_44] : memref<27xf32, #tpu.memory_space<smem>>
    %150 = vector.broadcast %149 : f32 to vector<6x14xf32>
    %151 = arith.mulf %148, %150 : vector<6x14xf32>
    %c0_45 = arith.constant 0 : index
    %152 = memref.load %arg5[%c0_45] : memref<3xf32, #tpu.memory_space<smem>>
    %153 = vector.broadcast %152 : f32 to vector<6x14xf32>
    %154 = arith.addf %151, %153 : vector<6x14xf32>
    %c9_46 = arith.constant 9 : index
    %155 = memref.load %arg4[%c9_46] : memref<27xf32, #tpu.memory_space<smem>>
    %156 = vector.broadcast %155 : f32 to vector<6x14xf32>
    %157 = arith.mulf %148, %156 : vector<6x14xf32>
    %c1_47 = arith.constant 1 : index
    %158 = memref.load %arg5[%c1_47] : memref<3xf32, #tpu.memory_space<smem>>
    %159 = vector.broadcast %158 : f32 to vector<6x14xf32>
    %160 = arith.addf %157, %159 : vector<6x14xf32>
    %c18_48 = arith.constant 18 : index
    %161 = memref.load %arg4[%c18_48] : memref<27xf32, #tpu.memory_space<smem>>
    %162 = vector.broadcast %161 : f32 to vector<6x14xf32>
    %163 = arith.mulf %148, %162 : vector<6x14xf32>
    %c2_49 = arith.constant 2 : index
    %164 = memref.load %arg5[%c2_49] : memref<3xf32, #tpu.memory_space<smem>>
    %165 = vector.broadcast %164 : f32 to vector<6x14xf32>
    %166 = arith.addf %163, %165 : vector<6x14xf32>
    %c0_50 = arith.constant 0 : index
    %c8_51 = arith.constant 8 : index
    %c1_52 = arith.constant 1 : index
    %167 = vector.load %arg1[%c0_50, %c8_51, %c1_52] : memref<1x16x16xf32, #tpu.memory_space<vmem>>, vector<1x6x14xf32>
    %168 = vector.shape_cast %167 : vector<1x6x14xf32> to vector<6x14xf32>
    %c1_53 = arith.constant 1 : index
    %169 = memref.load %arg4[%c1_53] : memref<27xf32, #tpu.memory_space<smem>>
    %170 = vector.broadcast %169 : f32 to vector<6x14xf32>
    %171 = arith.mulf %168, %170 : vector<6x14xf32>
    %172 = arith.addf %154, %171 : vector<6x14xf32>
    %c10_54 = arith.constant 10 : index
    %173 = memref.load %arg4[%c10_54] : memref<27xf32, #tpu.memory_space<smem>>
    %174 = vector.broadcast %173 : f32 to vector<6x14xf32>
    %175 = arith.mulf %168, %174 : vector<6x14xf32>
    %176 = arith.addf %160, %175 : vector<6x14xf32>
    %c19_55 = arith.constant 19 : index
    %177 = memref.load %arg4[%c19_55] : memref<27xf32, #tpu.memory_space<smem>>
    %178 = vector.broadcast %177 : f32 to vector<6x14xf32>
    %179 = arith.mulf %168, %178 : vector<6x14xf32>
    %180 = arith.addf %166, %179 : vector<6x14xf32>
    %c0_56 = arith.constant 0 : index
    %c8_57 = arith.constant 8 : index
    %c2_58 = arith.constant 2 : index
    %181 = vector.load %arg1[%c0_56, %c8_57, %c2_58] : memref<1x16x16xf32, #tpu.memory_space<vmem>>, vector<1x6x14xf32>
    %182 = vector.shape_cast %181 : vector<1x6x14xf32> to vector<6x14xf32>
    %c2_59 = arith.constant 2 : index
    %183 = memref.load %arg4[%c2_59] : memref<27xf32, #tpu.memory_space<smem>>
    %184 = vector.broadcast %183 : f32 to vector<6x14xf32>
    %185 = arith.mulf %182, %184 : vector<6x14xf32>
    %186 = arith.addf %172, %185 : vector<6x14xf32>
    %c11_60 = arith.constant 11 : index
    %187 = memref.load %arg4[%c11_60] : memref<27xf32, #tpu.memory_space<smem>>
    %188 = vector.broadcast %187 : f32 to vector<6x14xf32>
    %189 = arith.mulf %182, %188 : vector<6x14xf32>
    %190 = arith.addf %176, %189 : vector<6x14xf32>
    %c20_61 = arith.constant 20 : index
    %191 = memref.load %arg4[%c20_61] : memref<27xf32, #tpu.memory_space<smem>>
    %192 = vector.broadcast %191 : f32 to vector<6x14xf32>
    %193 = arith.mulf %182, %192 : vector<6x14xf32>
    %194 = arith.addf %180, %193 : vector<6x14xf32>
    %c0_62 = arith.constant 0 : index
    %c9_63 = arith.constant 9 : index
    %c0_64 = arith.constant 0 : index
    %195 = vector.load %arg1[%c0_62, %c9_63, %c0_64] : memref<1x16x16xf32, #tpu.memory_space<vmem>>, vector<1x6x14xf32>
    %196 = vector.shape_cast %195 : vector<1x6x14xf32> to vector<6x14xf32>
    %c3_65 = arith.constant 3 : index
    %197 = memref.load %arg4[%c3_65] : memref<27xf32, #tpu.memory_space<smem>>
    %198 = vector.broadcast %197 : f32 to vector<6x14xf32>
    %199 = arith.mulf %196, %198 : vector<6x14xf32>
    %200 = arith.addf %186, %199 : vector<6x14xf32>
    %c12_66 = arith.constant 12 : index
    %201 = memref.load %arg4[%c12_66] : memref<27xf32, #tpu.memory_space<smem>>
    %202 = vector.broadcast %201 : f32 to vector<6x14xf32>
    %203 = arith.mulf %196, %202 : vector<6x14xf32>
    %204 = arith.addf %190, %203 : vector<6x14xf32>
    %c21_67 = arith.constant 21 : index
    %205 = memref.load %arg4[%c21_67] : memref<27xf32, #tpu.memory_space<smem>>
    %206 = vector.broadcast %205 : f32 to vector<6x14xf32>
    %207 = arith.mulf %196, %206 : vector<6x14xf32>
    %208 = arith.addf %194, %207 : vector<6x14xf32>
    %c0_68 = arith.constant 0 : index
    %c9_69 = arith.constant 9 : index
    %c1_70 = arith.constant 1 : index
    %209 = vector.load %arg1[%c0_68, %c9_69, %c1_70] : memref<1x16x16xf32, #tpu.memory_space<vmem>>, vector<1x6x14xf32>
    %210 = vector.shape_cast %209 : vector<1x6x14xf32> to vector<6x14xf32>
    %c4_71 = arith.constant 4 : index
    %211 = memref.load %arg4[%c4_71] : memref<27xf32, #tpu.memory_space<smem>>
    %212 = vector.broadcast %211 : f32 to vector<6x14xf32>
    %213 = arith.mulf %210, %212 : vector<6x14xf32>
    %214 = arith.addf %200, %213 : vector<6x14xf32>
    %c13_72 = arith.constant 13 : index
    %215 = memref.load %arg4[%c13_72] : memref<27xf32, #tpu.memory_space<smem>>
    %216 = vector.broadcast %215 : f32 to vector<6x14xf32>
    %217 = arith.mulf %210, %216 : vector<6x14xf32>
    %218 = arith.addf %204, %217 : vector<6x14xf32>
    %c22_73 = arith.constant 22 : index
    %219 = memref.load %arg4[%c22_73] : memref<27xf32, #tpu.memory_space<smem>>
    %220 = vector.broadcast %219 : f32 to vector<6x14xf32>
    %221 = arith.mulf %210, %220 : vector<6x14xf32>
    %222 = arith.addf %208, %221 : vector<6x14xf32>
    %c0_74 = arith.constant 0 : index
    %c9_75 = arith.constant 9 : index
    %c2_76 = arith.constant 2 : index
    %223 = vector.load %arg1[%c0_74, %c9_75, %c2_76] : memref<1x16x16xf32, #tpu.memory_space<vmem>>, vector<1x6x14xf32>
    %224 = vector.shape_cast %223 : vector<1x6x14xf32> to vector<6x14xf32>
    %c5_77 = arith.constant 5 : index
    %225 = memref.load %arg4[%c5_77] : memref<27xf32, #tpu.memory_space<smem>>
    %226 = vector.broadcast %225 : f32 to vector<6x14xf32>
    %227 = arith.mulf %224, %226 : vector<6x14xf32>
    %228 = arith.addf %214, %227 : vector<6x14xf32>
    %c14_78 = arith.constant 14 : index
    %229 = memref.load %arg4[%c14_78] : memref<27xf32, #tpu.memory_space<smem>>
    %230 = vector.broadcast %229 : f32 to vector<6x14xf32>
    %231 = arith.mulf %224, %230 : vector<6x14xf32>
    %232 = arith.addf %218, %231 : vector<6x14xf32>
    %c23_79 = arith.constant 23 : index
    %233 = memref.load %arg4[%c23_79] : memref<27xf32, #tpu.memory_space<smem>>
    %234 = vector.broadcast %233 : f32 to vector<6x14xf32>
    %235 = arith.mulf %224, %234 : vector<6x14xf32>
    %236 = arith.addf %222, %235 : vector<6x14xf32>
    %c0_80 = arith.constant 0 : index
    %c10_81 = arith.constant 10 : index
    %c0_82 = arith.constant 0 : index
    %237 = vector.load %arg1[%c0_80, %c10_81, %c0_82] : memref<1x16x16xf32, #tpu.memory_space<vmem>>, vector<1x6x14xf32>
    %238 = vector.shape_cast %237 : vector<1x6x14xf32> to vector<6x14xf32>
    %c6_83 = arith.constant 6 : index
    %239 = memref.load %arg4[%c6_83] : memref<27xf32, #tpu.memory_space<smem>>
    %240 = vector.broadcast %239 : f32 to vector<6x14xf32>
    %241 = arith.mulf %238, %240 : vector<6x14xf32>
    %242 = arith.addf %228, %241 : vector<6x14xf32>
    %c15_84 = arith.constant 15 : index
    %243 = memref.load %arg4[%c15_84] : memref<27xf32, #tpu.memory_space<smem>>
    %244 = vector.broadcast %243 : f32 to vector<6x14xf32>
    %245 = arith.mulf %238, %244 : vector<6x14xf32>
    %246 = arith.addf %232, %245 : vector<6x14xf32>
    %c24_85 = arith.constant 24 : index
    %247 = memref.load %arg4[%c24_85] : memref<27xf32, #tpu.memory_space<smem>>
    %248 = vector.broadcast %247 : f32 to vector<6x14xf32>
    %249 = arith.mulf %238, %248 : vector<6x14xf32>
    %250 = arith.addf %236, %249 : vector<6x14xf32>
    %c0_86 = arith.constant 0 : index
    %c10_87 = arith.constant 10 : index
    %c1_88 = arith.constant 1 : index
    %251 = vector.load %arg1[%c0_86, %c10_87, %c1_88] : memref<1x16x16xf32, #tpu.memory_space<vmem>>, vector<1x6x14xf32>
    %252 = vector.shape_cast %251 : vector<1x6x14xf32> to vector<6x14xf32>
    %c7_89 = arith.constant 7 : index
    %253 = memref.load %arg4[%c7_89] : memref<27xf32, #tpu.memory_space<smem>>
    %254 = vector.broadcast %253 : f32 to vector<6x14xf32>
    %255 = arith.mulf %252, %254 : vector<6x14xf32>
    %256 = arith.addf %242, %255 : vector<6x14xf32>
    %c16_90 = arith.constant 16 : index
    %257 = memref.load %arg4[%c16_90] : memref<27xf32, #tpu.memory_space<smem>>
    %258 = vector.broadcast %257 : f32 to vector<6x14xf32>
    %259 = arith.mulf %252, %258 : vector<6x14xf32>
    %260 = arith.addf %246, %259 : vector<6x14xf32>
    %c25_91 = arith.constant 25 : index
    %261 = memref.load %arg4[%c25_91] : memref<27xf32, #tpu.memory_space<smem>>
    %262 = vector.broadcast %261 : f32 to vector<6x14xf32>
    %263 = arith.mulf %252, %262 : vector<6x14xf32>
    %264 = arith.addf %250, %263 : vector<6x14xf32>
    %c0_92 = arith.constant 0 : index
    %c10_93 = arith.constant 10 : index
    %c2_94 = arith.constant 2 : index
    %265 = vector.load %arg1[%c0_92, %c10_93, %c2_94] : memref<1x16x16xf32, #tpu.memory_space<vmem>>, vector<1x6x14xf32>
    %266 = vector.shape_cast %265 : vector<1x6x14xf32> to vector<6x14xf32>
    %c8_95 = arith.constant 8 : index
    %267 = memref.load %arg4[%c8_95] : memref<27xf32, #tpu.memory_space<smem>>
    %268 = vector.broadcast %267 : f32 to vector<6x14xf32>
    %269 = arith.mulf %266, %268 : vector<6x14xf32>
    %270 = arith.addf %256, %269 : vector<6x14xf32>
    %c17_96 = arith.constant 17 : index
    %271 = memref.load %arg4[%c17_96] : memref<27xf32, #tpu.memory_space<smem>>
    %272 = vector.broadcast %271 : f32 to vector<6x14xf32>
    %273 = arith.mulf %266, %272 : vector<6x14xf32>
    %274 = arith.addf %260, %273 : vector<6x14xf32>
    %c26_97 = arith.constant 26 : index
    %275 = memref.load %arg4[%c26_97] : memref<27xf32, #tpu.memory_space<smem>>
    %276 = vector.broadcast %275 : f32 to vector<6x14xf32>
    %277 = arith.mulf %266, %276 : vector<6x14xf32>
    %278 = arith.addf %264, %277 : vector<6x14xf32>
    %cst_98 = arith.constant 0.000000e+00 : f32
    %279 = vector.broadcast %cst_98 : f32 to vector<6x14xf32>
    %280 = arith.maximumf %270, %279 : vector<6x14xf32>
    %c0_99 = arith.constant 0 : index
    %c8_100 = arith.constant 8 : index
    %c0_101 = arith.constant 0 : index
    %281 = vector.load %arg9[%c0_99, %c8_100, %c0_101] : memref<3x14x14xf32, #tpu.memory_space<vmem>>, vector<1x6x14xf32>
    %282 = vector.shape_cast %281 : vector<1x6x14xf32> to vector<6x14xf32>
    %283 = vector.shape_cast %280 : vector<6x14xf32> to vector<1x6x14xf32>
    tpu.vector_store %arg9[%c0_99, %c8_100, %c0_101], %283 {strides = array<i32>} : memref<3x14x14xf32, #tpu.memory_space<vmem>>, vector<1x6x14xf32>,
    %cst_102 = arith.constant 0.000000e+00 : f32
    %284 = vector.broadcast %cst_102 : f32 to vector<6x14xf32>
    %285 = arith.maximumf %274, %284 : vector<6x14xf32>
    %c1_103 = arith.constant 1 : index
    %c8_104 = arith.constant 8 : index
    %c0_105 = arith.constant 0 : index
    %286 = vector.load %arg9[%c1_103, %c8_104, %c0_105] : memref<3x14x14xf32, #tpu.memory_space<vmem>>, vector<1x6x14xf32>
    %287 = vector.shape_cast %286 : vector<1x6x14xf32> to vector<6x14xf32>
    %288 = vector.shape_cast %285 : vector<6x14xf32> to vector<1x6x14xf32>
    tpu.vector_store %arg9[%c1_103, %c8_104, %c0_105], %288 {strides = array<i32>} : memref<3x14x14xf32, #tpu.memory_space<vmem>>, vector<1x6x14xf32>,
    %cst_106 = arith.constant 0.000000e+00 : f32
    %289 = vector.broadcast %cst_106 : f32 to vector<6x14xf32>
    %290 = arith.maximumf %278, %289 : vector<6x14xf32>
    %c2_107 = arith.constant 2 : index
    %c8_108 = arith.constant 8 : index
    %c0_109 = arith.constant 0 : index
    %291 = vector.load %arg9[%c2_107, %c8_108, %c0_109] : memref<3x14x14xf32, #tpu.memory_space<vmem>>, vector<1x6x14xf32>
    %292 = vector.shape_cast %291 : vector<1x6x14xf32> to vector<6x14xf32>
    %293 = vector.shape_cast %290 : vector<6x14xf32> to vector<1x6x14xf32>
    tpu.vector_store %arg9[%c2_107, %c8_108, %c0_109], %293 {strides = array<i32>} : memref<3x14x14xf32, #tpu.memory_space<vmem>>, vector<1x6x14xf32>,
    %c0_110 = arith.constant 0 : index
    %c0_111 = arith.constant 0 : index
    %c0_112 = arith.constant 0 : index
    %294 = vector.load %arg9[%c0_110, %c0_111, %c0_112] : memref<3x14x14xf32, #tpu.memory_space<vmem>>, vector<1x8x12xf32>
    %295 = vector.shape_cast %294 : vector<1x8x12xf32> to vector<8x12xf32>
    %c0_113 = arith.constant 0 : index
    %296 = memref.load %arg6[%c0_113] : memref<81xf32, #tpu.memory_space<smem>>
    %297 = vector.broadcast %296 : f32 to vector<8x12xf32>
    %298 = arith.mulf %295, %297 : vector<8x12xf32>
    %c0_114 = arith.constant 0 : index
    %299 = memref.load %arg7[%c0_114] : memref<3xf32, #tpu.memory_space<smem>>
    %300 = vector.broadcast %299 : f32 to vector<8x12xf32>
    %301 = arith.addf %298, %300 : vector<8x12xf32>
    %c27 = arith.constant 27 : index
    %302 = memref.load %arg6[%c27] : memref<81xf32, #tpu.memory_space<smem>>
    %303 = vector.broadcast %302 : f32 to vector<8x12xf32>
    %304 = arith.mulf %295, %303 : vector<8x12xf32>
    %c1_115 = arith.constant 1 : index
    %305 = memref.load %arg7[%c1_115] : memref<3xf32, #tpu.memory_space<smem>>
    %306 = vector.broadcast %305 : f32 to vector<8x12xf32>
    %307 = arith.addf %304, %306 : vector<8x12xf32>
    %c54 = arith.constant 54 : index
    %308 = memref.load %arg6[%c54] : memref<81xf32, #tpu.memory_space<smem>>
    %309 = vector.broadcast %308 : f32 to vector<8x12xf32>
    %310 = arith.mulf %295, %309 : vector<8x12xf32>
    %c2_116 = arith.constant 2 : index
    %311 = memref.load %arg7[%c2_116] : memref<3xf32, #tpu.memory_space<smem>>
    %312 = vector.broadcast %311 : f32 to vector<8x12xf32>
    %313 = arith.addf %310, %312 : vector<8x12xf32>
    %c0_117 = arith.constant 0 : index
    %c0_118 = arith.constant 0 : index
    %c1_119 = arith.constant 1 : index
    %314 = vector.load %arg9[%c0_117, %c0_118, %c1_119] : memref<3x14x14xf32, #tpu.memory_space<vmem>>, vector<1x8x12xf32>
    %315 = vector.shape_cast %314 : vector<1x8x12xf32> to vector<8x12xf32>
    %c1_120 = arith.constant 1 : index
    %316 = memref.load %arg6[%c1_120] : memref<81xf32, #tpu.memory_space<smem>>
    %317 = vector.broadcast %316 : f32 to vector<8x12xf32>
    %318 = arith.mulf %315, %317 : vector<8x12xf32>
    %319 = arith.addf %301, %318 : vector<8x12xf32>
    %c28 = arith.constant 28 : index
    %320 = memref.load %arg6[%c28] : memref<81xf32, #tpu.memory_space<smem>>
    %321 = vector.broadcast %320 : f32 to vector<8x12xf32>
    %322 = arith.mulf %315, %321 : vector<8x12xf32>
    %323 = arith.addf %307, %322 : vector<8x12xf32>
    %c55 = arith.constant 55 : index
    %324 = memref.load %arg6[%c55] : memref<81xf32, #tpu.memory_space<smem>>
    %325 = vector.broadcast %324 : f32 to vector<8x12xf32>
    %326 = arith.mulf %315, %325 : vector<8x12xf32>
    %327 = arith.addf %313, %326 : vector<8x12xf32>
    %c0_121 = arith.constant 0 : index
    %c0_122 = arith.constant 0 : index
    %c2_123 = arith.constant 2 : index
    %328 = vector.load %arg9[%c0_121, %c0_122, %c2_123] : memref<3x14x14xf32, #tpu.memory_space<vmem>>, vector<1x8x12xf32>
    %329 = vector.shape_cast %328 : vector<1x8x12xf32> to vector<8x12xf32>
    %c2_124 = arith.constant 2 : index
    %330 = memref.load %arg6[%c2_124] : memref<81xf32, #tpu.memory_space<smem>>
    %331 = vector.broadcast %330 : f32 to vector<8x12xf32>
    %332 = arith.mulf %329, %331 : vector<8x12xf32>
    %333 = arith.addf %319, %332 : vector<8x12xf32>
    %c29 = arith.constant 29 : index
    %334 = memref.load %arg6[%c29] : memref<81xf32, #tpu.memory_space<smem>>
    %335 = vector.broadcast %334 : f32 to vector<8x12xf32>
    %336 = arith.mulf %329, %335 : vector<8x12xf32>
    %337 = arith.addf %323, %336 : vector<8x12xf32>
    %c56 = arith.constant 56 : index
    %338 = memref.load %arg6[%c56] : memref<81xf32, #tpu.memory_space<smem>>
    %339 = vector.broadcast %338 : f32 to vector<8x12xf32>
    %340 = arith.mulf %329, %339 : vector<8x12xf32>
    %341 = arith.addf %327, %340 : vector<8x12xf32>
    %c0_125 = arith.constant 0 : index
    %c1_126 = arith.constant 1 : index
    %c0_127 = arith.constant 0 : index
    %342 = vector.load %arg9[%c0_125, %c1_126, %c0_127] : memref<3x14x14xf32, #tpu.memory_space<vmem>>, vector<1x8x12xf32>
    %343 = vector.shape_cast %342 : vector<1x8x12xf32> to vector<8x12xf32>
    %c3_128 = arith.constant 3 : index
    %344 = memref.load %arg6[%c3_128] : memref<81xf32, #tpu.memory_space<smem>>
    %345 = vector.broadcast %344 : f32 to vector<8x12xf32>
    %346 = arith.mulf %343, %345 : vector<8x12xf32>
    %347 = arith.addf %333, %346 : vector<8x12xf32>
    %c30 = arith.constant 30 : index
    %348 = memref.load %arg6[%c30] : memref<81xf32, #tpu.memory_space<smem>>
    %349 = vector.broadcast %348 : f32 to vector<8x12xf32>
    %350 = arith.mulf %343, %349 : vector<8x12xf32>
    %351 = arith.addf %337, %350 : vector<8x12xf32>
    %c57 = arith.constant 57 : index
    %352 = memref.load %arg6[%c57] : memref<81xf32, #tpu.memory_space<smem>>
    %353 = vector.broadcast %352 : f32 to vector<8x12xf32>
    %354 = arith.mulf %343, %353 : vector<8x12xf32>
    %355 = arith.addf %341, %354 : vector<8x12xf32>
    %c0_129 = arith.constant 0 : index
    %c1_130 = arith.constant 1 : index
    %c1_131 = arith.constant 1 : index
    %356 = vector.load %arg9[%c0_129, %c1_130, %c1_131] : memref<3x14x14xf32, #tpu.memory_space<vmem>>, vector<1x8x12xf32>
    %357 = vector.shape_cast %356 : vector<1x8x12xf32> to vector<8x12xf32>
    %c4_132 = arith.constant 4 : index
    %358 = memref.load %arg6[%c4_132] : memref<81xf32, #tpu.memory_space<smem>>
    %359 = vector.broadcast %358 : f32 to vector<8x12xf32>
    %360 = arith.mulf %357, %359 : vector<8x12xf32>
    %361 = arith.addf %347, %360 : vector<8x12xf32>
    %c31 = arith.constant 31 : index
    %362 = memref.load %arg6[%c31] : memref<81xf32, #tpu.memory_space<smem>>
    %363 = vector.broadcast %362 : f32 to vector<8x12xf32>
    %364 = arith.mulf %357, %363 : vector<8x12xf32>
    %365 = arith.addf %351, %364 : vector<8x12xf32>
    %c58 = arith.constant 58 : index
    %366 = memref.load %arg6[%c58] : memref<81xf32, #tpu.memory_space<smem>>
    %367 = vector.broadcast %366 : f32 to vector<8x12xf32>
    %368 = arith.mulf %357, %367 : vector<8x12xf32>
    %369 = arith.addf %355, %368 : vector<8x12xf32>
    %c0_133 = arith.constant 0 : index
    %c1_134 = arith.constant 1 : index
    %c2_135 = arith.constant 2 : index
    %370 = vector.load %arg9[%c0_133, %c1_134, %c2_135] : memref<3x14x14xf32, #tpu.memory_space<vmem>>, vector<1x8x12xf32>
    %371 = vector.shape_cast %370 : vector<1x8x12xf32> to vector<8x12xf32>
    %c5_136 = arith.constant 5 : index
    %372 = memref.load %arg6[%c5_136] : memref<81xf32, #tpu.memory_space<smem>>
    %373 = vector.broadcast %372 : f32 to vector<8x12xf32>
    %374 = arith.mulf %371, %373 : vector<8x12xf32>
    %375 = arith.addf %361, %374 : vector<8x12xf32>
    %c32 = arith.constant 32 : index
    %376 = memref.load %arg6[%c32] : memref<81xf32, #tpu.memory_space<smem>>
    %377 = vector.broadcast %376 : f32 to vector<8x12xf32>
    %378 = arith.mulf %371, %377 : vector<8x12xf32>
    %379 = arith.addf %365, %378 : vector<8x12xf32>
    %c59 = arith.constant 59 : index
    %380 = memref.load %arg6[%c59] : memref<81xf32, #tpu.memory_space<smem>>
    %381 = vector.broadcast %380 : f32 to vector<8x12xf32>
    %382 = arith.mulf %371, %381 : vector<8x12xf32>
    %383 = arith.addf %369, %382 : vector<8x12xf32>
    %c0_137 = arith.constant 0 : index
    %c2_138 = arith.constant 2 : index
    %c0_139 = arith.constant 0 : index
    %384 = vector.load %arg9[%c0_137, %c2_138, %c0_139] : memref<3x14x14xf32, #tpu.memory_space<vmem>>, vector<1x8x12xf32>
    %385 = vector.shape_cast %384 : vector<1x8x12xf32> to vector<8x12xf32>
    %c6_140 = arith.constant 6 : index
    %386 = memref.load %arg6[%c6_140] : memref<81xf32, #tpu.memory_space<smem>>
    %387 = vector.broadcast %386 : f32 to vector<8x12xf32>
    %388 = arith.mulf %385, %387 : vector<8x12xf32>
    %389 = arith.addf %375, %388 : vector<8x12xf32>
    %c33 = arith.constant 33 : index
    %390 = memref.load %arg6[%c33] : memref<81xf32, #tpu.memory_space<smem>>
    %391 = vector.broadcast %390 : f32 to vector<8x12xf32>
    %392 = arith.mulf %385, %391 : vector<8x12xf32>
    %393 = arith.addf %379, %392 : vector<8x12xf32>
    %c60 = arith.constant 60 : index
    %394 = memref.load %arg6[%c60] : memref<81xf32, #tpu.memory_space<smem>>
    %395 = vector.broadcast %394 : f32 to vector<8x12xf32>
    %396 = arith.mulf %385, %395 : vector<8x12xf32>
    %397 = arith.addf %383, %396 : vector<8x12xf32>
    %c0_141 = arith.constant 0 : index
    %c2_142 = arith.constant 2 : index
    %c1_143 = arith.constant 1 : index
    %398 = vector.load %arg9[%c0_141, %c2_142, %c1_143] : memref<3x14x14xf32, #tpu.memory_space<vmem>>, vector<1x8x12xf32>
    %399 = vector.shape_cast %398 : vector<1x8x12xf32> to vector<8x12xf32>
    %c7_144 = arith.constant 7 : index
    %400 = memref.load %arg6[%c7_144] : memref<81xf32, #tpu.memory_space<smem>>
    %401 = vector.broadcast %400 : f32 to vector<8x12xf32>
    %402 = arith.mulf %399, %401 : vector<8x12xf32>
    %403 = arith.addf %389, %402 : vector<8x12xf32>
    %c34 = arith.constant 34 : index
    %404 = memref.load %arg6[%c34] : memref<81xf32, #tpu.memory_space<smem>>
    %405 = vector.broadcast %404 : f32 to vector<8x12xf32>
    %406 = arith.mulf %399, %405 : vector<8x12xf32>
    %407 = arith.addf %393, %406 : vector<8x12xf32>
    %c61 = arith.constant 61 : index
    %408 = memref.load %arg6[%c61] : memref<81xf32, #tpu.memory_space<smem>>
    %409 = vector.broadcast %408 : f32 to vector<8x12xf32>
    %410 = arith.mulf %399, %409 : vector<8x12xf32>
    %411 = arith.addf %397, %410 : vector<8x12xf32>
    %c0_145 = arith.constant 0 : index
    %c2_146 = arith.constant 2 : index
    %c2_147 = arith.constant 2 : index
    %412 = vector.load %arg9[%c0_145, %c2_146, %c2_147] : memref<3x14x14xf32, #tpu.memory_space<vmem>>, vector<1x8x12xf32>
    %413 = vector.shape_cast %412 : vector<1x8x12xf32> to vector<8x12xf32>
    %c8_148 = arith.constant 8 : index
    %414 = memref.load %arg6[%c8_148] : memref<81xf32, #tpu.memory_space<smem>>
    %415 = vector.broadcast %414 : f32 to vector<8x12xf32>
    %416 = arith.mulf %413, %415 : vector<8x12xf32>
    %417 = arith.addf %403, %416 : vector<8x12xf32>
    %c35 = arith.constant 35 : index
    %418 = memref.load %arg6[%c35] : memref<81xf32, #tpu.memory_space<smem>>
    %419 = vector.broadcast %418 : f32 to vector<8x12xf32>
    %420 = arith.mulf %413, %419 : vector<8x12xf32>
    %421 = arith.addf %407, %420 : vector<8x12xf32>
    %c62 = arith.constant 62 : index
    %422 = memref.load %arg6[%c62] : memref<81xf32, #tpu.memory_space<smem>>
    %423 = vector.broadcast %422 : f32 to vector<8x12xf32>
    %424 = arith.mulf %413, %423 : vector<8x12xf32>
    %425 = arith.addf %411, %424 : vector<8x12xf32>
    %c1_149 = arith.constant 1 : index
    %c0_150 = arith.constant 0 : index
    %c0_151 = arith.constant 0 : index
    %426 = vector.load %arg9[%c1_149, %c0_150, %c0_151] : memref<3x14x14xf32, #tpu.memory_space<vmem>>, vector<1x8x12xf32>
    %427 = vector.shape_cast %426 : vector<1x8x12xf32> to vector<8x12xf32>
    %c9_152 = arith.constant 9 : index
    %428 = memref.load %arg6[%c9_152] : memref<81xf32, #tpu.memory_space<smem>>
    %429 = vector.broadcast %428 : f32 to vector<8x12xf32>
    %430 = arith.mulf %427, %429 : vector<8x12xf32>
    %431 = arith.addf %417, %430 : vector<8x12xf32>
    %c36 = arith.constant 36 : index
    %432 = memref.load %arg6[%c36] : memref<81xf32, #tpu.memory_space<smem>>
    %433 = vector.broadcast %432 : f32 to vector<8x12xf32>
    %434 = arith.mulf %427, %433 : vector<8x12xf32>
    %435 = arith.addf %421, %434 : vector<8x12xf32>
    %c63 = arith.constant 63 : index
    %436 = memref.load %arg6[%c63] : memref<81xf32, #tpu.memory_space<smem>>
    %437 = vector.broadcast %436 : f32 to vector<8x12xf32>
    %438 = arith.mulf %427, %437 : vector<8x12xf32>
    %439 = arith.addf %425, %438 : vector<8x12xf32>
    %c1_153 = arith.constant 1 : index
    %c0_154 = arith.constant 0 : index
    %c1_155 = arith.constant 1 : index
    %440 = vector.load %arg9[%c1_153, %c0_154, %c1_155] : memref<3x14x14xf32, #tpu.memory_space<vmem>>, vector<1x8x12xf32>
    %441 = vector.shape_cast %440 : vector<1x8x12xf32> to vector<8x12xf32>
    %c10_156 = arith.constant 10 : index
    %442 = memref.load %arg6[%c10_156] : memref<81xf32, #tpu.memory_space<smem>>
    %443 = vector.broadcast %442 : f32 to vector<8x12xf32>
    %444 = arith.mulf %441, %443 : vector<8x12xf32>
    %445 = arith.addf %431, %444 : vector<8x12xf32>
    %c37 = arith.constant 37 : index
    %446 = memref.load %arg6[%c37] : memref<81xf32, #tpu.memory_space<smem>>
    %447 = vector.broadcast %446 : f32 to vector<8x12xf32>
    %448 = arith.mulf %441, %447 : vector<8x12xf32>
    %449 = arith.addf %435, %448 : vector<8x12xf32>
    %c64 = arith.constant 64 : index
    %450 = memref.load %arg6[%c64] : memref<81xf32, #tpu.memory_space<smem>>
    %451 = vector.broadcast %450 : f32 to vector<8x12xf32>
    %452 = arith.mulf %441, %451 : vector<8x12xf32>
    %453 = arith.addf %439, %452 : vector<8x12xf32>
    %c1_157 = arith.constant 1 : index
    %c0_158 = arith.constant 0 : index
    %c2_159 = arith.constant 2 : index
    %454 = vector.load %arg9[%c1_157, %c0_158, %c2_159] : memref<3x14x14xf32, #tpu.memory_space<vmem>>, vector<1x8x12xf32>
    %455 = vector.shape_cast %454 : vector<1x8x12xf32> to vector<8x12xf32>
    %c11_160 = arith.constant 11 : index
    %456 = memref.load %arg6[%c11_160] : memref<81xf32, #tpu.memory_space<smem>>
    %457 = vector.broadcast %456 : f32 to vector<8x12xf32>
    %458 = arith.mulf %455, %457 : vector<8x12xf32>
    %459 = arith.addf %445, %458 : vector<8x12xf32>
    %c38 = arith.constant 38 : index
    %460 = memref.load %arg6[%c38] : memref<81xf32, #tpu.memory_space<smem>>
    %461 = vector.broadcast %460 : f32 to vector<8x12xf32>
    %462 = arith.mulf %455, %461 : vector<8x12xf32>
    %463 = arith.addf %449, %462 : vector<8x12xf32>
    %c65 = arith.constant 65 : index
    %464 = memref.load %arg6[%c65] : memref<81xf32, #tpu.memory_space<smem>>
    %465 = vector.broadcast %464 : f32 to vector<8x12xf32>
    %466 = arith.mulf %455, %465 : vector<8x12xf32>
    %467 = arith.addf %453, %466 : vector<8x12xf32>
    %c1_161 = arith.constant 1 : index
    %c1_162 = arith.constant 1 : index
    %c0_163 = arith.constant 0 : index
    %468 = vector.load %arg9[%c1_161, %c1_162, %c0_163] : memref<3x14x14xf32, #tpu.memory_space<vmem>>, vector<1x8x12xf32>
    %469 = vector.shape_cast %468 : vector<1x8x12xf32> to vector<8x12xf32>
    %c12_164 = arith.constant 12 : index
    %470 = memref.load %arg6[%c12_164] : memref<81xf32, #tpu.memory_space<smem>>
    %471 = vector.broadcast %470 : f32 to vector<8x12xf32>
    %472 = arith.mulf %469, %471 : vector<8x12xf32>
    %473 = arith.addf %459, %472 : vector<8x12xf32>
    %c39 = arith.constant 39 : index
    %474 = memref.load %arg6[%c39] : memref<81xf32, #tpu.memory_space<smem>>
    %475 = vector.broadcast %474 : f32 to vector<8x12xf32>
    %476 = arith.mulf %469, %475 : vector<8x12xf32>
    %477 = arith.addf %463, %476 : vector<8x12xf32>
    %c66 = arith.constant 66 : index
    %478 = memref.load %arg6[%c66] : memref<81xf32, #tpu.memory_space<smem>>
    %479 = vector.broadcast %478 : f32 to vector<8x12xf32>
    %480 = arith.mulf %469, %479 : vector<8x12xf32>
    %481 = arith.addf %467, %480 : vector<8x12xf32>
    %c1_165 = arith.constant 1 : index
    %c1_166 = arith.constant 1 : index
    %c1_167 = arith.constant 1 : index
    %482 = vector.load %arg9[%c1_165, %c1_166, %c1_167] : memref<3x14x14xf32, #tpu.memory_space<vmem>>, vector<1x8x12xf32>
    %483 = vector.shape_cast %482 : vector<1x8x12xf32> to vector<8x12xf32>
    %c13_168 = arith.constant 13 : index
    %484 = memref.load %arg6[%c13_168] : memref<81xf32, #tpu.memory_space<smem>>
    %485 = vector.broadcast %484 : f32 to vector<8x12xf32>
    %486 = arith.mulf %483, %485 : vector<8x12xf32>
    %487 = arith.addf %473, %486 : vector<8x12xf32>
    %c40 = arith.constant 40 : index
    %488 = memref.load %arg6[%c40] : memref<81xf32, #tpu.memory_space<smem>>
    %489 = vector.broadcast %488 : f32 to vector<8x12xf32>
    %490 = arith.mulf %483, %489 : vector<8x12xf32>
    %491 = arith.addf %477, %490 : vector<8x12xf32>
    %c67 = arith.constant 67 : index
    %492 = memref.load %arg6[%c67] : memref<81xf32, #tpu.memory_space<smem>>
    %493 = vector.broadcast %492 : f32 to vector<8x12xf32>
    %494 = arith.mulf %483, %493 : vector<8x12xf32>
    %495 = arith.addf %481, %494 : vector<8x12xf32>
    %c1_169 = arith.constant 1 : index
    %c1_170 = arith.constant 1 : index
    %c2_171 = arith.constant 2 : index
    %496 = vector.load %arg9[%c1_169, %c1_170, %c2_171] : memref<3x14x14xf32, #tpu.memory_space<vmem>>, vector<1x8x12xf32>
    %497 = vector.shape_cast %496 : vector<1x8x12xf32> to vector<8x12xf32>
    %c14_172 = arith.constant 14 : index
    %498 = memref.load %arg6[%c14_172] : memref<81xf32, #tpu.memory_space<smem>>
    %499 = vector.broadcast %498 : f32 to vector<8x12xf32>
    %500 = arith.mulf %497, %499 : vector<8x12xf32>
    %501 = arith.addf %487, %500 : vector<8x12xf32>
    %c41 = arith.constant 41 : index
    %502 = memref.load %arg6[%c41] : memref<81xf32, #tpu.memory_space<smem>>
    %503 = vector.broadcast %502 : f32 to vector<8x12xf32>
    %504 = arith.mulf %497, %503 : vector<8x12xf32>
    %505 = arith.addf %491, %504 : vector<8x12xf32>
    %c68 = arith.constant 68 : index
    %506 = memref.load %arg6[%c68] : memref<81xf32, #tpu.memory_space<smem>>
    %507 = vector.broadcast %506 : f32 to vector<8x12xf32>
    %508 = arith.mulf %497, %507 : vector<8x12xf32>
    %509 = arith.addf %495, %508 : vector<8x12xf32>
    %c1_173 = arith.constant 1 : index
    %c2_174 = arith.constant 2 : index
    %c0_175 = arith.constant 0 : index
    %510 = vector.load %arg9[%c1_173, %c2_174, %c0_175] : memref<3x14x14xf32, #tpu.memory_space<vmem>>, vector<1x8x12xf32>
    %511 = vector.shape_cast %510 : vector<1x8x12xf32> to vector<8x12xf32>
    %c15_176 = arith.constant 15 : index
    %512 = memref.load %arg6[%c15_176] : memref<81xf32, #tpu.memory_space<smem>>
    %513 = vector.broadcast %512 : f32 to vector<8x12xf32>
    %514 = arith.mulf %511, %513 : vector<8x12xf32>
    %515 = arith.addf %501, %514 : vector<8x12xf32>
    %c42 = arith.constant 42 : index
    %516 = memref.load %arg6[%c42] : memref<81xf32, #tpu.memory_space<smem>>
    %517 = vector.broadcast %516 : f32 to vector<8x12xf32>
    %518 = arith.mulf %511, %517 : vector<8x12xf32>
    %519 = arith.addf %505, %518 : vector<8x12xf32>
    %c69 = arith.constant 69 : index
    %520 = memref.load %arg6[%c69] : memref<81xf32, #tpu.memory_space<smem>>
    %521 = vector.broadcast %520 : f32 to vector<8x12xf32>
    %522 = arith.mulf %511, %521 : vector<8x12xf32>
    %523 = arith.addf %509, %522 : vector<8x12xf32>
    %c1_177 = arith.constant 1 : index
    %c2_178 = arith.constant 2 : index
    %c1_179 = arith.constant 1 : index
    %524 = vector.load %arg9[%c1_177, %c2_178, %c1_179] : memref<3x14x14xf32, #tpu.memory_space<vmem>>, vector<1x8x12xf32>
    %525 = vector.shape_cast %524 : vector<1x8x12xf32> to vector<8x12xf32>
    %c16_180 = arith.constant 16 : index
    %526 = memref.load %arg6[%c16_180] : memref<81xf32, #tpu.memory_space<smem>>
    %527 = vector.broadcast %526 : f32 to vector<8x12xf32>
    %528 = arith.mulf %525, %527 : vector<8x12xf32>
    %529 = arith.addf %515, %528 : vector<8x12xf32>
    %c43 = arith.constant 43 : index
    %530 = memref.load %arg6[%c43] : memref<81xf32, #tpu.memory_space<smem>>
    %531 = vector.broadcast %530 : f32 to vector<8x12xf32>
    %532 = arith.mulf %525, %531 : vector<8x12xf32>
    %533 = arith.addf %519, %532 : vector<8x12xf32>
    %c70 = arith.constant 70 : index
    %534 = memref.load %arg6[%c70] : memref<81xf32, #tpu.memory_space<smem>>
    %535 = vector.broadcast %534 : f32 to vector<8x12xf32>
    %536 = arith.mulf %525, %535 : vector<8x12xf32>
    %537 = arith.addf %523, %536 : vector<8x12xf32>
    %c1_181 = arith.constant 1 : index
    %c2_182 = arith.constant 2 : index
    %c2_183 = arith.constant 2 : index
    %538 = vector.load %arg9[%c1_181, %c2_182, %c2_183] : memref<3x14x14xf32, #tpu.memory_space<vmem>>, vector<1x8x12xf32>
    %539 = vector.shape_cast %538 : vector<1x8x12xf32> to vector<8x12xf32>
    %c17_184 = arith.constant 17 : index
    %540 = memref.load %arg6[%c17_184] : memref<81xf32, #tpu.memory_space<smem>>
    %541 = vector.broadcast %540 : f32 to vector<8x12xf32>
    %542 = arith.mulf %539, %541 : vector<8x12xf32>
    %543 = arith.addf %529, %542 : vector<8x12xf32>
    %c44 = arith.constant 44 : index
    %544 = memref.load %arg6[%c44] : memref<81xf32, #tpu.memory_space<smem>>
    %545 = vector.broadcast %544 : f32 to vector<8x12xf32>
    %546 = arith.mulf %539, %545 : vector<8x12xf32>
    %547 = arith.addf %533, %546 : vector<8x12xf32>
    %c71 = arith.constant 71 : index
    %548 = memref.load %arg6[%c71] : memref<81xf32, #tpu.memory_space<smem>>
    %549 = vector.broadcast %548 : f32 to vector<8x12xf32>
    %550 = arith.mulf %539, %549 : vector<8x12xf32>
    %551 = arith.addf %537, %550 : vector<8x12xf32>
    %c2_185 = arith.constant 2 : index
    %c0_186 = arith.constant 0 : index
    %c0_187 = arith.constant 0 : index
    %552 = vector.load %arg9[%c2_185, %c0_186, %c0_187] : memref<3x14x14xf32, #tpu.memory_space<vmem>>, vector<1x8x12xf32>
    %553 = vector.shape_cast %552 : vector<1x8x12xf32> to vector<8x12xf32>
    %c18_188 = arith.constant 18 : index
    %554 = memref.load %arg6[%c18_188] : memref<81xf32, #tpu.memory_space<smem>>
    %555 = vector.broadcast %554 : f32 to vector<8x12xf32>
    %556 = arith.mulf %553, %555 : vector<8x12xf32>
    %557 = arith.addf %543, %556 : vector<8x12xf32>
    %c45 = arith.constant 45 : index
    %558 = memref.load %arg6[%c45] : memref<81xf32, #tpu.memory_space<smem>>
    %559 = vector.broadcast %558 : f32 to vector<8x12xf32>
    %560 = arith.mulf %553, %559 : vector<8x12xf32>
    %561 = arith.addf %547, %560 : vector<8x12xf32>
    %c72 = arith.constant 72 : index
    %562 = memref.load %arg6[%c72] : memref<81xf32, #tpu.memory_space<smem>>
    %563 = vector.broadcast %562 : f32 to vector<8x12xf32>
    %564 = arith.mulf %553, %563 : vector<8x12xf32>
    %565 = arith.addf %551, %564 : vector<8x12xf32>
    %c2_189 = arith.constant 2 : index
    %c0_190 = arith.constant 0 : index
    %c1_191 = arith.constant 1 : index
    %566 = vector.load %arg9[%c2_189, %c0_190, %c1_191] : memref<3x14x14xf32, #tpu.memory_space<vmem>>, vector<1x8x12xf32>
    %567 = vector.shape_cast %566 : vector<1x8x12xf32> to vector<8x12xf32>
    %c19_192 = arith.constant 19 : index
    %568 = memref.load %arg6[%c19_192] : memref<81xf32, #tpu.memory_space<smem>>
    %569 = vector.broadcast %568 : f32 to vector<8x12xf32>
    %570 = arith.mulf %567, %569 : vector<8x12xf32>
    %571 = arith.addf %557, %570 : vector<8x12xf32>
    %c46 = arith.constant 46 : index
    %572 = memref.load %arg6[%c46] : memref<81xf32, #tpu.memory_space<smem>>
    %573 = vector.broadcast %572 : f32 to vector<8x12xf32>
    %574 = arith.mulf %567, %573 : vector<8x12xf32>
    %575 = arith.addf %561, %574 : vector<8x12xf32>
    %c73 = arith.constant 73 : index
    %576 = memref.load %arg6[%c73] : memref<81xf32, #tpu.memory_space<smem>>
    %577 = vector.broadcast %576 : f32 to vector<8x12xf32>
    %578 = arith.mulf %567, %577 : vector<8x12xf32>
    %579 = arith.addf %565, %578 : vector<8x12xf32>
    %c2_193 = arith.constant 2 : index
    %c0_194 = arith.constant 0 : index
    %c2_195 = arith.constant 2 : index
    %580 = vector.load %arg9[%c2_193, %c0_194, %c2_195] : memref<3x14x14xf32, #tpu.memory_space<vmem>>, vector<1x8x12xf32>
    %581 = vector.shape_cast %580 : vector<1x8x12xf32> to vector<8x12xf32>
    %c20_196 = arith.constant 20 : index
    %582 = memref.load %arg6[%c20_196] : memref<81xf32, #tpu.memory_space<smem>>
    %583 = vector.broadcast %582 : f32 to vector<8x12xf32>
    %584 = arith.mulf %581, %583 : vector<8x12xf32>
    %585 = arith.addf %571, %584 : vector<8x12xf32>
    %c47 = arith.constant 47 : index
    %586 = memref.load %arg6[%c47] : memref<81xf32, #tpu.memory_space<smem>>
    %587 = vector.broadcast %586 : f32 to vector<8x12xf32>
    %588 = arith.mulf %581, %587 : vector<8x12xf32>
    %589 = arith.addf %575, %588 : vector<8x12xf32>
    %c74 = arith.constant 74 : index
    %590 = memref.load %arg6[%c74] : memref<81xf32, #tpu.memory_space<smem>>
    %591 = vector.broadcast %590 : f32 to vector<8x12xf32>
    %592 = arith.mulf %581, %591 : vector<8x12xf32>
    %593 = arith.addf %579, %592 : vector<8x12xf32>
    %c2_197 = arith.constant 2 : index
    %c1_198 = arith.constant 1 : index
    %c0_199 = arith.constant 0 : index
    %594 = vector.load %arg9[%c2_197, %c1_198, %c0_199] : memref<3x14x14xf32, #tpu.memory_space<vmem>>, vector<1x8x12xf32>
    %595 = vector.shape_cast %594 : vector<1x8x12xf32> to vector<8x12xf32>
    %c21_200 = arith.constant 21 : index
    %596 = memref.load %arg6[%c21_200] : memref<81xf32, #tpu.memory_space<smem>>
    %597 = vector.broadcast %596 : f32 to vector<8x12xf32>
    %598 = arith.mulf %595, %597 : vector<8x12xf32>
    %599 = arith.addf %585, %598 : vector<8x12xf32>
    %c48 = arith.constant 48 : index
    %600 = memref.load %arg6[%c48] : memref<81xf32, #tpu.memory_space<smem>>
    %601 = vector.broadcast %600 : f32 to vector<8x12xf32>
    %602 = arith.mulf %595, %601 : vector<8x12xf32>
    %603 = arith.addf %589, %602 : vector<8x12xf32>
    %c75 = arith.constant 75 : index
    %604 = memref.load %arg6[%c75] : memref<81xf32, #tpu.memory_space<smem>>
    %605 = vector.broadcast %604 : f32 to vector<8x12xf32>
    %606 = arith.mulf %595, %605 : vector<8x12xf32>
    %607 = arith.addf %593, %606 : vector<8x12xf32>
    %c2_201 = arith.constant 2 : index
    %c1_202 = arith.constant 1 : index
    %c1_203 = arith.constant 1 : index
    %608 = vector.load %arg9[%c2_201, %c1_202, %c1_203] : memref<3x14x14xf32, #tpu.memory_space<vmem>>, vector<1x8x12xf32>
    %609 = vector.shape_cast %608 : vector<1x8x12xf32> to vector<8x12xf32>
    %c22_204 = arith.constant 22 : index
    %610 = memref.load %arg6[%c22_204] : memref<81xf32, #tpu.memory_space<smem>>
    %611 = vector.broadcast %610 : f32 to vector<8x12xf32>
    %612 = arith.mulf %609, %611 : vector<8x12xf32>
    %613 = arith.addf %599, %612 : vector<8x12xf32>
    %c49 = arith.constant 49 : index
    %614 = memref.load %arg6[%c49] : memref<81xf32, #tpu.memory_space<smem>>
    %615 = vector.broadcast %614 : f32 to vector<8x12xf32>
    %616 = arith.mulf %609, %615 : vector<8x12xf32>
    %617 = arith.addf %603, %616 : vector<8x12xf32>
    %c76 = arith.constant 76 : index
    %618 = memref.load %arg6[%c76] : memref<81xf32, #tpu.memory_space<smem>>
    %619 = vector.broadcast %618 : f32 to vector<8x12xf32>
    %620 = arith.mulf %609, %619 : vector<8x12xf32>
    %621 = arith.addf %607, %620 : vector<8x12xf32>
    %c2_205 = arith.constant 2 : index
    %c1_206 = arith.constant 1 : index
    %c2_207 = arith.constant 2 : index
    %622 = vector.load %arg9[%c2_205, %c1_206, %c2_207] : memref<3x14x14xf32, #tpu.memory_space<vmem>>, vector<1x8x12xf32>
    %623 = vector.shape_cast %622 : vector<1x8x12xf32> to vector<8x12xf32>
    %c23_208 = arith.constant 23 : index
    %624 = memref.load %arg6[%c23_208] : memref<81xf32, #tpu.memory_space<smem>>
    %625 = vector.broadcast %624 : f32 to vector<8x12xf32>
    %626 = arith.mulf %623, %625 : vector<8x12xf32>
    %627 = arith.addf %613, %626 : vector<8x12xf32>
    %c50 = arith.constant 50 : index
    %628 = memref.load %arg6[%c50] : memref<81xf32, #tpu.memory_space<smem>>
    %629 = vector.broadcast %628 : f32 to vector<8x12xf32>
    %630 = arith.mulf %623, %629 : vector<8x12xf32>
    %631 = arith.addf %617, %630 : vector<8x12xf32>
    %c77 = arith.constant 77 : index
    %632 = memref.load %arg6[%c77] : memref<81xf32, #tpu.memory_space<smem>>
    %633 = vector.broadcast %632 : f32 to vector<8x12xf32>
    %634 = arith.mulf %623, %633 : vector<8x12xf32>
    %635 = arith.addf %621, %634 : vector<8x12xf32>
    %c2_209 = arith.constant 2 : index
    %c2_210 = arith.constant 2 : index
    %c0_211 = arith.constant 0 : index
    %636 = vector.load %arg9[%c2_209, %c2_210, %c0_211] : memref<3x14x14xf32, #tpu.memory_space<vmem>>, vector<1x8x12xf32>
    %637 = vector.shape_cast %636 : vector<1x8x12xf32> to vector<8x12xf32>
    %c24_212 = arith.constant 24 : index
    %638 = memref.load %arg6[%c24_212] : memref<81xf32, #tpu.memory_space<smem>>
    %639 = vector.broadcast %638 : f32 to vector<8x12xf32>
    %640 = arith.mulf %637, %639 : vector<8x12xf32>
    %641 = arith.addf %627, %640 : vector<8x12xf32>
    %c51 = arith.constant 51 : index
    %642 = memref.load %arg6[%c51] : memref<81xf32, #tpu.memory_space<smem>>
    %643 = vector.broadcast %642 : f32 to vector<8x12xf32>
    %644 = arith.mulf %637, %643 : vector<8x12xf32>
    %645 = arith.addf %631, %644 : vector<8x12xf32>
    %c78 = arith.constant 78 : index
    %646 = memref.load %arg6[%c78] : memref<81xf32, #tpu.memory_space<smem>>
    %647 = vector.broadcast %646 : f32 to vector<8x12xf32>
    %648 = arith.mulf %637, %647 : vector<8x12xf32>
    %649 = arith.addf %635, %648 : vector<8x12xf32>
    %c2_213 = arith.constant 2 : index
    %c2_214 = arith.constant 2 : index
    %c1_215 = arith.constant 1 : index
    %650 = vector.load %arg9[%c2_213, %c2_214, %c1_215] : memref<3x14x14xf32, #tpu.memory_space<vmem>>, vector<1x8x12xf32>
    %651 = vector.shape_cast %650 : vector<1x8x12xf32> to vector<8x12xf32>
    %c25_216 = arith.constant 25 : index
    %652 = memref.load %arg6[%c25_216] : memref<81xf32, #tpu.memory_space<smem>>
    %653 = vector.broadcast %652 : f32 to vector<8x12xf32>
    %654 = arith.mulf %651, %653 : vector<8x12xf32>
    %655 = arith.addf %641, %654 : vector<8x12xf32>
    %c52 = arith.constant 52 : index
    %656 = memref.load %arg6[%c52] : memref<81xf32, #tpu.memory_space<smem>>
    %657 = vector.broadcast %656 : f32 to vector<8x12xf32>
    %658 = arith.mulf %651, %657 : vector<8x12xf32>
    %659 = arith.addf %645, %658 : vector<8x12xf32>
    %c79 = arith.constant 79 : index
    %660 = memref.load %arg6[%c79] : memref<81xf32, #tpu.memory_space<smem>>
    %661 = vector.broadcast %660 : f32 to vector<8x12xf32>
    %662 = arith.mulf %651, %661 : vector<8x12xf32>
    %663 = arith.addf %649, %662 : vector<8x12xf32>
    %c2_217 = arith.constant 2 : index
    %c2_218 = arith.constant 2 : index
    %c2_219 = arith.constant 2 : index
    %664 = vector.load %arg9[%c2_217, %c2_218, %c2_219] : memref<3x14x14xf32, #tpu.memory_space<vmem>>, vector<1x8x12xf32>
    %665 = vector.shape_cast %664 : vector<1x8x12xf32> to vector<8x12xf32>
    %c26_220 = arith.constant 26 : index
    %666 = memref.load %arg6[%c26_220] : memref<81xf32, #tpu.memory_space<smem>>
    %667 = vector.broadcast %666 : f32 to vector<8x12xf32>
    %668 = arith.mulf %665, %667 : vector<8x12xf32>
    %669 = arith.addf %655, %668 : vector<8x12xf32>
    %c53 = arith.constant 53 : index
    %670 = memref.load %arg6[%c53] : memref<81xf32, #tpu.memory_space<smem>>
    %671 = vector.broadcast %670 : f32 to vector<8x12xf32>
    %672 = arith.mulf %665, %671 : vector<8x12xf32>
    %673 = arith.addf %659, %672 : vector<8x12xf32>
    %c80 = arith.constant 80 : index
    %674 = memref.load %arg6[%c80] : memref<81xf32, #tpu.memory_space<smem>>
    %675 = vector.broadcast %674 : f32 to vector<8x12xf32>
    %676 = arith.mulf %665, %675 : vector<8x12xf32>
    %677 = arith.addf %663, %676 : vector<8x12xf32>
    %cst_221 = arith.constant 0.000000e+00 : f32
    %678 = vector.broadcast %cst_221 : f32 to vector<8x12xf32>
    %679 = arith.maximumf %669, %678 : vector<8x12xf32>
    %c0_222 = arith.constant 0 : index
    %c0_223 = arith.constant 0 : index
    %c0_224 = arith.constant 0 : index
    %680 = vector.load %arg10[%c0_222, %c0_223, %c0_224] : memref<3x12x12xf32, #tpu.memory_space<vmem>>, vector<1x8x12xf32>
    %681 = vector.shape_cast %680 : vector<1x8x12xf32> to vector<8x12xf32>
    %682 = vector.shape_cast %679 : vector<8x12xf32> to vector<1x8x12xf32>
    tpu.vector_store %arg10[%c0_222, %c0_223, %c0_224], %682 {strides = array<i32>} : memref<3x12x12xf32, #tpu.memory_space<vmem>>, vector<1x8x12xf32>,
    %cst_225 = arith.constant 0.000000e+00 : f32
    %683 = vector.broadcast %cst_225 : f32 to vector<8x12xf32>
    %684 = arith.maximumf %673, %683 : vector<8x12xf32>
    %c1_226 = arith.constant 1 : index
    %c0_227 = arith.constant 0 : index
    %c0_228 = arith.constant 0 : index
    %685 = vector.load %arg10[%c1_226, %c0_227, %c0_228] : memref<3x12x12xf32, #tpu.memory_space<vmem>>, vector<1x8x12xf32>
    %686 = vector.shape_cast %685 : vector<1x8x12xf32> to vector<8x12xf32>
    %687 = vector.shape_cast %684 : vector<8x12xf32> to vector<1x8x12xf32>
    tpu.vector_store %arg10[%c1_226, %c0_227, %c0_228], %687 {strides = array<i32>} : memref<3x12x12xf32, #tpu.memory_space<vmem>>, vector<1x8x12xf32>,
    %cst_229 = arith.constant 0.000000e+00 : f32
    %688 = vector.broadcast %cst_229 : f32 to vector<8x12xf32>
    %689 = arith.maximumf %677, %688 : vector<8x12xf32>
    %c2_230 = arith.constant 2 : index
    %c0_231 = arith.constant 0 : index
    %c0_232 = arith.constant 0 : index
    %690 = vector.load %arg10[%c2_230, %c0_231, %c0_232] : memref<3x12x12xf32, #tpu.memory_space<vmem>>, vector<1x8x12xf32>
    %691 = vector.shape_cast %690 : vector<1x8x12xf32> to vector<8x12xf32>
    %692 = vector.shape_cast %689 : vector<8x12xf32> to vector<1x8x12xf32>
    tpu.vector_store %arg10[%c2_230, %c0_231, %c0_232], %692 {strides = array<i32>} : memref<3x12x12xf32, #tpu.memory_space<vmem>>, vector<1x8x12xf32>,
    %c0_233 = arith.constant 0 : index
    %c8_234 = arith.constant 8 : index
    %c0_235 = arith.constant 0 : index
    %693 = vector.load %arg9[%c0_233, %c8_234, %c0_235] : memref<3x14x14xf32, #tpu.memory_space<vmem>>, vector<1x4x12xf32>
    %694 = vector.shape_cast %693 : vector<1x4x12xf32> to vector<4x12xf32>
    %c0_236 = arith.constant 0 : index
    %695 = memref.load %arg6[%c0_236] : memref<81xf32, #tpu.memory_space<smem>>
    %696 = vector.broadcast %695 : f32 to vector<4x12xf32>
    %697 = arith.mulf %694, %696 : vector<4x12xf32>
    %c0_237 = arith.constant 0 : index
    %698 = memref.load %arg7[%c0_237] : memref<3xf32, #tpu.memory_space<smem>>
    %699 = vector.broadcast %698 : f32 to vector<4x12xf32>
    %700 = arith.addf %697, %699 : vector<4x12xf32>
    %c27_238 = arith.constant 27 : index
    %701 = memref.load %arg6[%c27_238] : memref<81xf32, #tpu.memory_space<smem>>
    %702 = vector.broadcast %701 : f32 to vector<4x12xf32>
    %703 = arith.mulf %694, %702 : vector<4x12xf32>
    %c1_239 = arith.constant 1 : index
    %704 = memref.load %arg7[%c1_239] : memref<3xf32, #tpu.memory_space<smem>>
    %705 = vector.broadcast %704 : f32 to vector<4x12xf32>
    %706 = arith.addf %703, %705 : vector<4x12xf32>
    %c54_240 = arith.constant 54 : index
    %707 = memref.load %arg6[%c54_240] : memref<81xf32, #tpu.memory_space<smem>>
    %708 = vector.broadcast %707 : f32 to vector<4x12xf32>
    %709 = arith.mulf %694, %708 : vector<4x12xf32>
    %c2_241 = arith.constant 2 : index
    %710 = memref.load %arg7[%c2_241] : memref<3xf32, #tpu.memory_space<smem>>
    %711 = vector.broadcast %710 : f32 to vector<4x12xf32>
    %712 = arith.addf %709, %711 : vector<4x12xf32>
    %c0_242 = arith.constant 0 : index
    %c8_243 = arith.constant 8 : index
    %c1_244 = arith.constant 1 : index
    %713 = vector.load %arg9[%c0_242, %c8_243, %c1_244] : memref<3x14x14xf32, #tpu.memory_space<vmem>>, vector<1x4x12xf32>
    %714 = vector.shape_cast %713 : vector<1x4x12xf32> to vector<4x12xf32>
    %c1_245 = arith.constant 1 : index
    %715 = memref.load %arg6[%c1_245] : memref<81xf32, #tpu.memory_space<smem>>
    %716 = vector.broadcast %715 : f32 to vector<4x12xf32>
    %717 = arith.mulf %714, %716 : vector<4x12xf32>
    %718 = arith.addf %700, %717 : vector<4x12xf32>
    %c28_246 = arith.constant 28 : index
    %719 = memref.load %arg6[%c28_246] : memref<81xf32, #tpu.memory_space<smem>>
    %720 = vector.broadcast %719 : f32 to vector<4x12xf32>
    %721 = arith.mulf %714, %720 : vector<4x12xf32>
    %722 = arith.addf %706, %721 : vector<4x12xf32>
    %c55_247 = arith.constant 55 : index
    %723 = memref.load %arg6[%c55_247] : memref<81xf32, #tpu.memory_space<smem>>
    %724 = vector.broadcast %723 : f32 to vector<4x12xf32>
    %725 = arith.mulf %714, %724 : vector<4x12xf32>
    %726 = arith.addf %712, %725 : vector<4x12xf32>
    %c0_248 = arith.constant 0 : index
    %c8_249 = arith.constant 8 : index
    %c2_250 = arith.constant 2 : index
    %727 = vector.load %arg9[%c0_248, %c8_249, %c2_250] : memref<3x14x14xf32, #tpu.memory_space<vmem>>, vector<1x4x12xf32>
    %728 = vector.shape_cast %727 : vector<1x4x12xf32> to vector<4x12xf32>
    %c2_251 = arith.constant 2 : index
    %729 = memref.load %arg6[%c2_251] : memref<81xf32, #tpu.memory_space<smem>>
    %730 = vector.broadcast %729 : f32 to vector<4x12xf32>
    %731 = arith.mulf %728, %730 : vector<4x12xf32>
    %732 = arith.addf %718, %731 : vector<4x12xf32>
    %c29_252 = arith.constant 29 : index
    %733 = memref.load %arg6[%c29_252] : memref<81xf32, #tpu.memory_space<smem>>
    %734 = vector.broadcast %733 : f32 to vector<4x12xf32>
    %735 = arith.mulf %728, %734 : vector<4x12xf32>
    %736 = arith.addf %722, %735 : vector<4x12xf32>
    %c56_253 = arith.constant 56 : index
    %737 = memref.load %arg6[%c56_253] : memref<81xf32, #tpu.memory_space<smem>>
    %738 = vector.broadcast %737 : f32 to vector<4x12xf32>
    %739 = arith.mulf %728, %738 : vector<4x12xf32>
    %740 = arith.addf %726, %739 : vector<4x12xf32>
    %c0_254 = arith.constant 0 : index
    %c9_255 = arith.constant 9 : index
    %c0_256 = arith.constant 0 : index
    %741 = vector.load %arg9[%c0_254, %c9_255, %c0_256] : memref<3x14x14xf32, #tpu.memory_space<vmem>>, vector<1x4x12xf32>
    %742 = vector.shape_cast %741 : vector<1x4x12xf32> to vector<4x12xf32>
    %c3_257 = arith.constant 3 : index
    %743 = memref.load %arg6[%c3_257] : memref<81xf32, #tpu.memory_space<smem>>
    %744 = vector.broadcast %743 : f32 to vector<4x12xf32>
    %745 = arith.mulf %742, %744 : vector<4x12xf32>
    %746 = arith.addf %732, %745 : vector<4x12xf32>
    %c30_258 = arith.constant 30 : index
    %747 = memref.load %arg6[%c30_258] : memref<81xf32, #tpu.memory_space<smem>>
    %748 = vector.broadcast %747 : f32 to vector<4x12xf32>
    %749 = arith.mulf %742, %748 : vector<4x12xf32>
    %750 = arith.addf %736, %749 : vector<4x12xf32>
    %c57_259 = arith.constant 57 : index
    %751 = memref.load %arg6[%c57_259] : memref<81xf32, #tpu.memory_space<smem>>
    %752 = vector.broadcast %751 : f32 to vector<4x12xf32>
    %753 = arith.mulf %742, %752 : vector<4x12xf32>
    %754 = arith.addf %740, %753 : vector<4x12xf32>
    %c0_260 = arith.constant 0 : index
    %c9_261 = arith.constant 9 : index
    %c1_262 = arith.constant 1 : index
    %755 = vector.load %arg9[%c0_260, %c9_261, %c1_262] : memref<3x14x14xf32, #tpu.memory_space<vmem>>, vector<1x4x12xf32>
    %756 = vector.shape_cast %755 : vector<1x4x12xf32> to vector<4x12xf32>
    %c4_263 = arith.constant 4 : index
    %757 = memref.load %arg6[%c4_263] : memref<81xf32, #tpu.memory_space<smem>>
    %758 = vector.broadcast %757 : f32 to vector<4x12xf32>
    %759 = arith.mulf %756, %758 : vector<4x12xf32>
    %760 = arith.addf %746, %759 : vector<4x12xf32>
    %c31_264 = arith.constant 31 : index
    %761 = memref.load %arg6[%c31_264] : memref<81xf32, #tpu.memory_space<smem>>
    %762 = vector.broadcast %761 : f32 to vector<4x12xf32>
    %763 = arith.mulf %756, %762 : vector<4x12xf32>
    %764 = arith.addf %750, %763 : vector<4x12xf32>
    %c58_265 = arith.constant 58 : index
    %765 = memref.load %arg6[%c58_265] : memref<81xf32, #tpu.memory_space<smem>>
    %766 = vector.broadcast %765 : f32 to vector<4x12xf32>
    %767 = arith.mulf %756, %766 : vector<4x12xf32>
    %768 = arith.addf %754, %767 : vector<4x12xf32>
    %c0_266 = arith.constant 0 : index
    %c9_267 = arith.constant 9 : index
    %c2_268 = arith.constant 2 : index
    %769 = vector.load %arg9[%c0_266, %c9_267, %c2_268] : memref<3x14x14xf32, #tpu.memory_space<vmem>>, vector<1x4x12xf32>
    %770 = vector.shape_cast %769 : vector<1x4x12xf32> to vector<4x12xf32>
    %c5_269 = arith.constant 5 : index
    %771 = memref.load %arg6[%c5_269] : memref<81xf32, #tpu.memory_space<smem>>
    %772 = vector.broadcast %771 : f32 to vector<4x12xf32>
    %773 = arith.mulf %770, %772 : vector<4x12xf32>
    %774 = arith.addf %760, %773 : vector<4x12xf32>
    %c32_270 = arith.constant 32 : index
    %775 = memref.load %arg6[%c32_270] : memref<81xf32, #tpu.memory_space<smem>>
    %776 = vector.broadcast %775 : f32 to vector<4x12xf32>
    %777 = arith.mulf %770, %776 : vector<4x12xf32>
    %778 = arith.addf %764, %777 : vector<4x12xf32>
    %c59_271 = arith.constant 59 : index
    %779 = memref.load %arg6[%c59_271] : memref<81xf32, #tpu.memory_space<smem>>
    %780 = vector.broadcast %779 : f32 to vector<4x12xf32>
    %781 = arith.mulf %770, %780 : vector<4x12xf32>
    %782 = arith.addf %768, %781 : vector<4x12xf32>
    %c0_272 = arith.constant 0 : index
    %c10_273 = arith.constant 10 : index
    %c0_274 = arith.constant 0 : index
    %783 = vector.load %arg9[%c0_272, %c10_273, %c0_274] : memref<3x14x14xf32, #tpu.memory_space<vmem>>, vector<1x4x12xf32>
    %784 = vector.shape_cast %783 : vector<1x4x12xf32> to vector<4x12xf32>
    %c6_275 = arith.constant 6 : index
    %785 = memref.load %arg6[%c6_275] : memref<81xf32, #tpu.memory_space<smem>>
    %786 = vector.broadcast %785 : f32 to vector<4x12xf32>
    %787 = arith.mulf %784, %786 : vector<4x12xf32>
    %788 = arith.addf %774, %787 : vector<4x12xf32>
    %c33_276 = arith.constant 33 : index
    %789 = memref.load %arg6[%c33_276] : memref<81xf32, #tpu.memory_space<smem>>
    %790 = vector.broadcast %789 : f32 to vector<4x12xf32>
    %791 = arith.mulf %784, %790 : vector<4x12xf32>
    %792 = arith.addf %778, %791 : vector<4x12xf32>
    %c60_277 = arith.constant 60 : index
    %793 = memref.load %arg6[%c60_277] : memref<81xf32, #tpu.memory_space<smem>>
    %794 = vector.broadcast %793 : f32 to vector<4x12xf32>
    %795 = arith.mulf %784, %794 : vector<4x12xf32>
    %796 = arith.addf %782, %795 : vector<4x12xf32>
    %c0_278 = arith.constant 0 : index
    %c10_279 = arith.constant 10 : index
    %c1_280 = arith.constant 1 : index
    %797 = vector.load %arg9[%c0_278, %c10_279, %c1_280] : memref<3x14x14xf32, #tpu.memory_space<vmem>>, vector<1x4x12xf32>
    %798 = vector.shape_cast %797 : vector<1x4x12xf32> to vector<4x12xf32>
    %c7_281 = arith.constant 7 : index
    %799 = memref.load %arg6[%c7_281] : memref<81xf32, #tpu.memory_space<smem>>
    %800 = vector.broadcast %799 : f32 to vector<4x12xf32>
    %801 = arith.mulf %798, %800 : vector<4x12xf32>
    %802 = arith.addf %788, %801 : vector<4x12xf32>
    %c34_282 = arith.constant 34 : index
    %803 = memref.load %arg6[%c34_282] : memref<81xf32, #tpu.memory_space<smem>>
    %804 = vector.broadcast %803 : f32 to vector<4x12xf32>
    %805 = arith.mulf %798, %804 : vector<4x12xf32>
    %806 = arith.addf %792, %805 : vector<4x12xf32>
    %c61_283 = arith.constant 61 : index
    %807 = memref.load %arg6[%c61_283] : memref<81xf32, #tpu.memory_space<smem>>
    %808 = vector.broadcast %807 : f32 to vector<4x12xf32>
    %809 = arith.mulf %798, %808 : vector<4x12xf32>
    %810 = arith.addf %796, %809 : vector<4x12xf32>
    %c0_284 = arith.constant 0 : index
    %c10_285 = arith.constant 10 : index
    %c2_286 = arith.constant 2 : index
    %811 = vector.load %arg9[%c0_284, %c10_285, %c2_286] : memref<3x14x14xf32, #tpu.memory_space<vmem>>, vector<1x4x12xf32>
    %812 = vector.shape_cast %811 : vector<1x4x12xf32> to vector<4x12xf32>
    %c8_287 = arith.constant 8 : index
    %813 = memref.load %arg6[%c8_287] : memref<81xf32, #tpu.memory_space<smem>>
    %814 = vector.broadcast %813 : f32 to vector<4x12xf32>
    %815 = arith.mulf %812, %814 : vector<4x12xf32>
    %816 = arith.addf %802, %815 : vector<4x12xf32>
    %c35_288 = arith.constant 35 : index
    %817 = memref.load %arg6[%c35_288] : memref<81xf32, #tpu.memory_space<smem>>
    %818 = vector.broadcast %817 : f32 to vector<4x12xf32>
    %819 = arith.mulf %812, %818 : vector<4x12xf32>
    %820 = arith.addf %806, %819 : vector<4x12xf32>
    %c62_289 = arith.constant 62 : index
    %821 = memref.load %arg6[%c62_289] : memref<81xf32, #tpu.memory_space<smem>>
    %822 = vector.broadcast %821 : f32 to vector<4x12xf32>
    %823 = arith.mulf %812, %822 : vector<4x12xf32>
    %824 = arith.addf %810, %823 : vector<4x12xf32>
    %c1_290 = arith.constant 1 : index
    %c8_291 = arith.constant 8 : index
    %c0_292 = arith.constant 0 : index
    %825 = vector.load %arg9[%c1_290, %c8_291, %c0_292] : memref<3x14x14xf32, #tpu.memory_space<vmem>>, vector<1x4x12xf32>
    %826 = vector.shape_cast %825 : vector<1x4x12xf32> to vector<4x12xf32>
    %c9_293 = arith.constant 9 : index
    %827 = memref.load %arg6[%c9_293] : memref<81xf32, #tpu.memory_space<smem>>
    %828 = vector.broadcast %827 : f32 to vector<4x12xf32>
    %829 = arith.mulf %826, %828 : vector<4x12xf32>
    %830 = arith.addf %816, %829 : vector<4x12xf32>
    %c36_294 = arith.constant 36 : index
    %831 = memref.load %arg6[%c36_294] : memref<81xf32, #tpu.memory_space<smem>>
    %832 = vector.broadcast %831 : f32 to vector<4x12xf32>
    %833 = arith.mulf %826, %832 : vector<4x12xf32>
    %834 = arith.addf %820, %833 : vector<4x12xf32>
    %c63_295 = arith.constant 63 : index
    %835 = memref.load %arg6[%c63_295] : memref<81xf32, #tpu.memory_space<smem>>
    %836 = vector.broadcast %835 : f32 to vector<4x12xf32>
    %837 = arith.mulf %826, %836 : vector<4x12xf32>
    %838 = arith.addf %824, %837 : vector<4x12xf32>
    %c1_296 = arith.constant 1 : index
    %c8_297 = arith.constant 8 : index
    %c1_298 = arith.constant 1 : index
    %839 = vector.load %arg9[%c1_296, %c8_297, %c1_298] : memref<3x14x14xf32, #tpu.memory_space<vmem>>, vector<1x4x12xf32>
    %840 = vector.shape_cast %839 : vector<1x4x12xf32> to vector<4x12xf32>
    %c10_299 = arith.constant 10 : index
    %841 = memref.load %arg6[%c10_299] : memref<81xf32, #tpu.memory_space<smem>>
    %842 = vector.broadcast %841 : f32 to vector<4x12xf32>
    %843 = arith.mulf %840, %842 : vector<4x12xf32>
    %844 = arith.addf %830, %843 : vector<4x12xf32>
    %c37_300 = arith.constant 37 : index
    %845 = memref.load %arg6[%c37_300] : memref<81xf32, #tpu.memory_space<smem>>
    %846 = vector.broadcast %845 : f32 to vector<4x12xf32>
    %847 = arith.mulf %840, %846 : vector<4x12xf32>
    %848 = arith.addf %834, %847 : vector<4x12xf32>
    %c64_301 = arith.constant 64 : index
    %849 = memref.load %arg6[%c64_301] : memref<81xf32, #tpu.memory_space<smem>>
    %850 = vector.broadcast %849 : f32 to vector<4x12xf32>
    %851 = arith.mulf %840, %850 : vector<4x12xf32>
    %852 = arith.addf %838, %851 : vector<4x12xf32>
    %c1_302 = arith.constant 1 : index
    %c8_303 = arith.constant 8 : index
    %c2_304 = arith.constant 2 : index
    %853 = vector.load %arg9[%c1_302, %c8_303, %c2_304] : memref<3x14x14xf32, #tpu.memory_space<vmem>>, vector<1x4x12xf32>
    %854 = vector.shape_cast %853 : vector<1x4x12xf32> to vector<4x12xf32>
    %c11_305 = arith.constant 11 : index
    %855 = memref.load %arg6[%c11_305] : memref<81xf32, #tpu.memory_space<smem>>
    %856 = vector.broadcast %855 : f32 to vector<4x12xf32>
    %857 = arith.mulf %854, %856 : vector<4x12xf32>
    %858 = arith.addf %844, %857 : vector<4x12xf32>
    %c38_306 = arith.constant 38 : index
    %859 = memref.load %arg6[%c38_306] : memref<81xf32, #tpu.memory_space<smem>>
    %860 = vector.broadcast %859 : f32 to vector<4x12xf32>
    %861 = arith.mulf %854, %860 : vector<4x12xf32>
    %862 = arith.addf %848, %861 : vector<4x12xf32>
    %c65_307 = arith.constant 65 : index
    %863 = memref.load %arg6[%c65_307] : memref<81xf32, #tpu.memory_space<smem>>
    %864 = vector.broadcast %863 : f32 to vector<4x12xf32>
    %865 = arith.mulf %854, %864 : vector<4x12xf32>
    %866 = arith.addf %852, %865 : vector<4x12xf32>
    %c1_308 = arith.constant 1 : index
    %c9_309 = arith.constant 9 : index
    %c0_310 = arith.constant 0 : index
    %867 = vector.load %arg9[%c1_308, %c9_309, %c0_310] : memref<3x14x14xf32, #tpu.memory_space<vmem>>, vector<1x4x12xf32>
    %868 = vector.shape_cast %867 : vector<1x4x12xf32> to vector<4x12xf32>
    %c12_311 = arith.constant 12 : index
    %869 = memref.load %arg6[%c12_311] : memref<81xf32, #tpu.memory_space<smem>>
    %870 = vector.broadcast %869 : f32 to vector<4x12xf32>
    %871 = arith.mulf %868, %870 : vector<4x12xf32>
    %872 = arith.addf %858, %871 : vector<4x12xf32>
    %c39_312 = arith.constant 39 : index
    %873 = memref.load %arg6[%c39_312] : memref<81xf32, #tpu.memory_space<smem>>
    %874 = vector.broadcast %873 : f32 to vector<4x12xf32>
    %875 = arith.mulf %868, %874 : vector<4x12xf32>
    %876 = arith.addf %862, %875 : vector<4x12xf32>
    %c66_313 = arith.constant 66 : index
    %877 = memref.load %arg6[%c66_313] : memref<81xf32, #tpu.memory_space<smem>>
    %878 = vector.broadcast %877 : f32 to vector<4x12xf32>
    %879 = arith.mulf %868, %878 : vector<4x12xf32>
    %880 = arith.addf %866, %879 : vector<4x12xf32>
    %c1_314 = arith.constant 1 : index
    %c9_315 = arith.constant 9 : index
    %c1_316 = arith.constant 1 : index
    %881 = vector.load %arg9[%c1_314, %c9_315, %c1_316] : memref<3x14x14xf32, #tpu.memory_space<vmem>>, vector<1x4x12xf32>
    %882 = vector.shape_cast %881 : vector<1x4x12xf32> to vector<4x12xf32>
    %c13_317 = arith.constant 13 : index
    %883 = memref.load %arg6[%c13_317] : memref<81xf32, #tpu.memory_space<smem>>
    %884 = vector.broadcast %883 : f32 to vector<4x12xf32>
    %885 = arith.mulf %882, %884 : vector<4x12xf32>
    %886 = arith.addf %872, %885 : vector<4x12xf32>
    %c40_318 = arith.constant 40 : index
    %887 = memref.load %arg6[%c40_318] : memref<81xf32, #tpu.memory_space<smem>>
    %888 = vector.broadcast %887 : f32 to vector<4x12xf32>
    %889 = arith.mulf %882, %888 : vector<4x12xf32>
    %890 = arith.addf %876, %889 : vector<4x12xf32>
    %c67_319 = arith.constant 67 : index
    %891 = memref.load %arg6[%c67_319] : memref<81xf32, #tpu.memory_space<smem>>
    %892 = vector.broadcast %891 : f32 to vector<4x12xf32>
    %893 = arith.mulf %882, %892 : vector<4x12xf32>
    %894 = arith.addf %880, %893 : vector<4x12xf32>
    %c1_320 = arith.constant 1 : index
    %c9_321 = arith.constant 9 : index
    %c2_322 = arith.constant 2 : index
    %895 = vector.load %arg9[%c1_320, %c9_321, %c2_322] : memref<3x14x14xf32, #tpu.memory_space<vmem>>, vector<1x4x12xf32>
    %896 = vector.shape_cast %895 : vector<1x4x12xf32> to vector<4x12xf32>
    %c14_323 = arith.constant 14 : index
    %897 = memref.load %arg6[%c14_323] : memref<81xf32, #tpu.memory_space<smem>>
    %898 = vector.broadcast %897 : f32 to vector<4x12xf32>
    %899 = arith.mulf %896, %898 : vector<4x12xf32>
    %900 = arith.addf %886, %899 : vector<4x12xf32>
    %c41_324 = arith.constant 41 : index
    %901 = memref.load %arg6[%c41_324] : memref<81xf32, #tpu.memory_space<smem>>
    %902 = vector.broadcast %901 : f32 to vector<4x12xf32>
    %903 = arith.mulf %896, %902 : vector<4x12xf32>
    %904 = arith.addf %890, %903 : vector<4x12xf32>
    %c68_325 = arith.constant 68 : index
    %905 = memref.load %arg6[%c68_325] : memref<81xf32, #tpu.memory_space<smem>>
    %906 = vector.broadcast %905 : f32 to vector<4x12xf32>
    %907 = arith.mulf %896, %906 : vector<4x12xf32>
    %908 = arith.addf %894, %907 : vector<4x12xf32>
    %c1_326 = arith.constant 1 : index
    %c10_327 = arith.constant 10 : index
    %c0_328 = arith.constant 0 : index
    %909 = vector.load %arg9[%c1_326, %c10_327, %c0_328] : memref<3x14x14xf32, #tpu.memory_space<vmem>>, vector<1x4x12xf32>
    %910 = vector.shape_cast %909 : vector<1x4x12xf32> to vector<4x12xf32>
    %c15_329 = arith.constant 15 : index
    %911 = memref.load %arg6[%c15_329] : memref<81xf32, #tpu.memory_space<smem>>
    %912 = vector.broadcast %911 : f32 to vector<4x12xf32>
    %913 = arith.mulf %910, %912 : vector<4x12xf32>
    %914 = arith.addf %900, %913 : vector<4x12xf32>
    %c42_330 = arith.constant 42 : index
    %915 = memref.load %arg6[%c42_330] : memref<81xf32, #tpu.memory_space<smem>>
    %916 = vector.broadcast %915 : f32 to vector<4x12xf32>
    %917 = arith.mulf %910, %916 : vector<4x12xf32>
    %918 = arith.addf %904, %917 : vector<4x12xf32>
    %c69_331 = arith.constant 69 : index
    %919 = memref.load %arg6[%c69_331] : memref<81xf32, #tpu.memory_space<smem>>
    %920 = vector.broadcast %919 : f32 to vector<4x12xf32>
    %921 = arith.mulf %910, %920 : vector<4x12xf32>
    %922 = arith.addf %908, %921 : vector<4x12xf32>
    %c1_332 = arith.constant 1 : index
    %c10_333 = arith.constant 10 : index
    %c1_334 = arith.constant 1 : index
    %923 = vector.load %arg9[%c1_332, %c10_333, %c1_334] : memref<3x14x14xf32, #tpu.memory_space<vmem>>, vector<1x4x12xf32>
    %924 = vector.shape_cast %923 : vector<1x4x12xf32> to vector<4x12xf32>
    %c16_335 = arith.constant 16 : index
    %925 = memref.load %arg6[%c16_335] : memref<81xf32, #tpu.memory_space<smem>>
    %926 = vector.broadcast %925 : f32 to vector<4x12xf32>
    %927 = arith.mulf %924, %926 : vector<4x12xf32>
    %928 = arith.addf %914, %927 : vector<4x12xf32>
    %c43_336 = arith.constant 43 : index
    %929 = memref.load %arg6[%c43_336] : memref<81xf32, #tpu.memory_space<smem>>
    %930 = vector.broadcast %929 : f32 to vector<4x12xf32>
    %931 = arith.mulf %924, %930 : vector<4x12xf32>
    %932 = arith.addf %918, %931 : vector<4x12xf32>
    %c70_337 = arith.constant 70 : index
    %933 = memref.load %arg6[%c70_337] : memref<81xf32, #tpu.memory_space<smem>>
    %934 = vector.broadcast %933 : f32 to vector<4x12xf32>
    %935 = arith.mulf %924, %934 : vector<4x12xf32>
    %936 = arith.addf %922, %935 : vector<4x12xf32>
    %c1_338 = arith.constant 1 : index
    %c10_339 = arith.constant 10 : index
    %c2_340 = arith.constant 2 : index
    %937 = vector.load %arg9[%c1_338, %c10_339, %c2_340] : memref<3x14x14xf32, #tpu.memory_space<vmem>>, vector<1x4x12xf32>
    %938 = vector.shape_cast %937 : vector<1x4x12xf32> to vector<4x12xf32>
    %c17_341 = arith.constant 17 : index
    %939 = memref.load %arg6[%c17_341] : memref<81xf32, #tpu.memory_space<smem>>
    %940 = vector.broadcast %939 : f32 to vector<4x12xf32>
    %941 = arith.mulf %938, %940 : vector<4x12xf32>
    %942 = arith.addf %928, %941 : vector<4x12xf32>
    %c44_342 = arith.constant 44 : index
    %943 = memref.load %arg6[%c44_342] : memref<81xf32, #tpu.memory_space<smem>>
    %944 = vector.broadcast %943 : f32 to vector<4x12xf32>
    %945 = arith.mulf %938, %944 : vector<4x12xf32>
    %946 = arith.addf %932, %945 : vector<4x12xf32>
    %c71_343 = arith.constant 71 : index
    %947 = memref.load %arg6[%c71_343] : memref<81xf32, #tpu.memory_space<smem>>
    %948 = vector.broadcast %947 : f32 to vector<4x12xf32>
    %949 = arith.mulf %938, %948 : vector<4x12xf32>
    %950 = arith.addf %936, %949 : vector<4x12xf32>
    %c2_344 = arith.constant 2 : index
    %c8_345 = arith.constant 8 : index
    %c0_346 = arith.constant 0 : index
    %951 = vector.load %arg9[%c2_344, %c8_345, %c0_346] : memref<3x14x14xf32, #tpu.memory_space<vmem>>, vector<1x4x12xf32>
    %952 = vector.shape_cast %951 : vector<1x4x12xf32> to vector<4x12xf32>
    %c18_347 = arith.constant 18 : index
    %953 = memref.load %arg6[%c18_347] : memref<81xf32, #tpu.memory_space<smem>>
    %954 = vector.broadcast %953 : f32 to vector<4x12xf32>
    %955 = arith.mulf %952, %954 : vector<4x12xf32>
    %956 = arith.addf %942, %955 : vector<4x12xf32>
    %c45_348 = arith.constant 45 : index
    %957 = memref.load %arg6[%c45_348] : memref<81xf32, #tpu.memory_space<smem>>
    %958 = vector.broadcast %957 : f32 to vector<4x12xf32>
    %959 = arith.mulf %952, %958 : vector<4x12xf32>
    %960 = arith.addf %946, %959 : vector<4x12xf32>
    %c72_349 = arith.constant 72 : index
    %961 = memref.load %arg6[%c72_349] : memref<81xf32, #tpu.memory_space<smem>>
    %962 = vector.broadcast %961 : f32 to vector<4x12xf32>
    %963 = arith.mulf %952, %962 : vector<4x12xf32>
    %964 = arith.addf %950, %963 : vector<4x12xf32>
    %c2_350 = arith.constant 2 : index
    %c8_351 = arith.constant 8 : index
    %c1_352 = arith.constant 1 : index
    %965 = vector.load %arg9[%c2_350, %c8_351, %c1_352] : memref<3x14x14xf32, #tpu.memory_space<vmem>>, vector<1x4x12xf32>
    %966 = vector.shape_cast %965 : vector<1x4x12xf32> to vector<4x12xf32>
    %c19_353 = arith.constant 19 : index
    %967 = memref.load %arg6[%c19_353] : memref<81xf32, #tpu.memory_space<smem>>
    %968 = vector.broadcast %967 : f32 to vector<4x12xf32>
    %969 = arith.mulf %966, %968 : vector<4x12xf32>
    %970 = arith.addf %956, %969 : vector<4x12xf32>
    %c46_354 = arith.constant 46 : index
    %971 = memref.load %arg6[%c46_354] : memref<81xf32, #tpu.memory_space<smem>>
    %972 = vector.broadcast %971 : f32 to vector<4x12xf32>
    %973 = arith.mulf %966, %972 : vector<4x12xf32>
    %974 = arith.addf %960, %973 : vector<4x12xf32>
    %c73_355 = arith.constant 73 : index
    %975 = memref.load %arg6[%c73_355] : memref<81xf32, #tpu.memory_space<smem>>
    %976 = vector.broadcast %975 : f32 to vector<4x12xf32>
    %977 = arith.mulf %966, %976 : vector<4x12xf32>
    %978 = arith.addf %964, %977 : vector<4x12xf32>
    %c2_356 = arith.constant 2 : index
    %c8_357 = arith.constant 8 : index
    %c2_358 = arith.constant 2 : index
    %979 = vector.load %arg9[%c2_356, %c8_357, %c2_358] : memref<3x14x14xf32, #tpu.memory_space<vmem>>, vector<1x4x12xf32>
    %980 = vector.shape_cast %979 : vector<1x4x12xf32> to vector<4x12xf32>
    %c20_359 = arith.constant 20 : index
    %981 = memref.load %arg6[%c20_359] : memref<81xf32, #tpu.memory_space<smem>>
    %982 = vector.broadcast %981 : f32 to vector<4x12xf32>
    %983 = arith.mulf %980, %982 : vector<4x12xf32>
    %984 = arith.addf %970, %983 : vector<4x12xf32>
    %c47_360 = arith.constant 47 : index
    %985 = memref.load %arg6[%c47_360] : memref<81xf32, #tpu.memory_space<smem>>
    %986 = vector.broadcast %985 : f32 to vector<4x12xf32>
    %987 = arith.mulf %980, %986 : vector<4x12xf32>
    %988 = arith.addf %974, %987 : vector<4x12xf32>
    %c74_361 = arith.constant 74 : index
    %989 = memref.load %arg6[%c74_361] : memref<81xf32, #tpu.memory_space<smem>>
    %990 = vector.broadcast %989 : f32 to vector<4x12xf32>
    %991 = arith.mulf %980, %990 : vector<4x12xf32>
    %992 = arith.addf %978, %991 : vector<4x12xf32>
    %c2_362 = arith.constant 2 : index
    %c9_363 = arith.constant 9 : index
    %c0_364 = arith.constant 0 : index
    %993 = vector.load %arg9[%c2_362, %c9_363, %c0_364] : memref<3x14x14xf32, #tpu.memory_space<vmem>>, vector<1x4x12xf32>
    %994 = vector.shape_cast %993 : vector<1x4x12xf32> to vector<4x12xf32>
    %c21_365 = arith.constant 21 : index
    %995 = memref.load %arg6[%c21_365] : memref<81xf32, #tpu.memory_space<smem>>
    %996 = vector.broadcast %995 : f32 to vector<4x12xf32>
    %997 = arith.mulf %994, %996 : vector<4x12xf32>
    %998 = arith.addf %984, %997 : vector<4x12xf32>
    %c48_366 = arith.constant 48 : index
    %999 = memref.load %arg6[%c48_366] : memref<81xf32, #tpu.memory_space<smem>>
    %1000 = vector.broadcast %999 : f32 to vector<4x12xf32>
    %1001 = arith.mulf %994, %1000 : vector<4x12xf32>
    %1002 = arith.addf %988, %1001 : vector<4x12xf32>
    %c75_367 = arith.constant 75 : index
    %1003 = memref.load %arg6[%c75_367] : memref<81xf32, #tpu.memory_space<smem>>
    %1004 = vector.broadcast %1003 : f32 to vector<4x12xf32>
    %1005 = arith.mulf %994, %1004 : vector<4x12xf32>
    %1006 = arith.addf %992, %1005 : vector<4x12xf32>
    %c2_368 = arith.constant 2 : index
    %c9_369 = arith.constant 9 : index
    %c1_370 = arith.constant 1 : index
    %1007 = vector.load %arg9[%c2_368, %c9_369, %c1_370] : memref<3x14x14xf32, #tpu.memory_space<vmem>>, vector<1x4x12xf32>
    %1008 = vector.shape_cast %1007 : vector<1x4x12xf32> to vector<4x12xf32>
    %c22_371 = arith.constant 22 : index
    %1009 = memref.load %arg6[%c22_371] : memref<81xf32, #tpu.memory_space<smem>>
    %1010 = vector.broadcast %1009 : f32 to vector<4x12xf32>
    %1011 = arith.mulf %1008, %1010 : vector<4x12xf32>
    %1012 = arith.addf %998, %1011 : vector<4x12xf32>
    %c49_372 = arith.constant 49 : index
    %1013 = memref.load %arg6[%c49_372] : memref<81xf32, #tpu.memory_space<smem>>
    %1014 = vector.broadcast %1013 : f32 to vector<4x12xf32>
    %1015 = arith.mulf %1008, %1014 : vector<4x12xf32>
    %1016 = arith.addf %1002, %1015 : vector<4x12xf32>
    %c76_373 = arith.constant 76 : index
    %1017 = memref.load %arg6[%c76_373] : memref<81xf32, #tpu.memory_space<smem>>
    %1018 = vector.broadcast %1017 : f32 to vector<4x12xf32>
    %1019 = arith.mulf %1008, %1018 : vector<4x12xf32>
    %1020 = arith.addf %1006, %1019 : vector<4x12xf32>
    %c2_374 = arith.constant 2 : index
    %c9_375 = arith.constant 9 : index
    %c2_376 = arith.constant 2 : index
    %1021 = vector.load %arg9[%c2_374, %c9_375, %c2_376] : memref<3x14x14xf32, #tpu.memory_space<vmem>>, vector<1x4x12xf32>
    %1022 = vector.shape_cast %1021 : vector<1x4x12xf32> to vector<4x12xf32>
    %c23_377 = arith.constant 23 : index
    %1023 = memref.load %arg6[%c23_377] : memref<81xf32, #tpu.memory_space<smem>>
    %1024 = vector.broadcast %1023 : f32 to vector<4x12xf32>
    %1025 = arith.mulf %1022, %1024 : vector<4x12xf32>
    %1026 = arith.addf %1012, %1025 : vector<4x12xf32>
    %c50_378 = arith.constant 50 : index
    %1027 = memref.load %arg6[%c50_378] : memref<81xf32, #tpu.memory_space<smem>>
    %1028 = vector.broadcast %1027 : f32 to vector<4x12xf32>
    %1029 = arith.mulf %1022, %1028 : vector<4x12xf32>
    %1030 = arith.addf %1016, %1029 : vector<4x12xf32>
    %c77_379 = arith.constant 77 : index
    %1031 = memref.load %arg6[%c77_379] : memref<81xf32, #tpu.memory_space<smem>>
    %1032 = vector.broadcast %1031 : f32 to vector<4x12xf32>
    %1033 = arith.mulf %1022, %1032 : vector<4x12xf32>
    %1034 = arith.addf %1020, %1033 : vector<4x12xf32>
    %c2_380 = arith.constant 2 : index
    %c10_381 = arith.constant 10 : index
    %c0_382 = arith.constant 0 : index
    %1035 = vector.load %arg9[%c2_380, %c10_381, %c0_382] : memref<3x14x14xf32, #tpu.memory_space<vmem>>, vector<1x4x12xf32>
    %1036 = vector.shape_cast %1035 : vector<1x4x12xf32> to vector<4x12xf32>
    %c24_383 = arith.constant 24 : index
    %1037 = memref.load %arg6[%c24_383] : memref<81xf32, #tpu.memory_space<smem>>
    %1038 = vector.broadcast %1037 : f32 to vector<4x12xf32>
    %1039 = arith.mulf %1036, %1038 : vector<4x12xf32>
    %1040 = arith.addf %1026, %1039 : vector<4x12xf32>
    %c51_384 = arith.constant 51 : index
    %1041 = memref.load %arg6[%c51_384] : memref<81xf32, #tpu.memory_space<smem>>
    %1042 = vector.broadcast %1041 : f32 to vector<4x12xf32>
    %1043 = arith.mulf %1036, %1042 : vector<4x12xf32>
    %1044 = arith.addf %1030, %1043 : vector<4x12xf32>
    %c78_385 = arith.constant 78 : index
    %1045 = memref.load %arg6[%c78_385] : memref<81xf32, #tpu.memory_space<smem>>
    %1046 = vector.broadcast %1045 : f32 to vector<4x12xf32>
    %1047 = arith.mulf %1036, %1046 : vector<4x12xf32>
    %1048 = arith.addf %1034, %1047 : vector<4x12xf32>
    %c2_386 = arith.constant 2 : index
    %c10_387 = arith.constant 10 : index
    %c1_388 = arith.constant 1 : index
    %1049 = vector.load %arg9[%c2_386, %c10_387, %c1_388] : memref<3x14x14xf32, #tpu.memory_space<vmem>>, vector<1x4x12xf32>
    %1050 = vector.shape_cast %1049 : vector<1x4x12xf32> to vector<4x12xf32>
    %c25_389 = arith.constant 25 : index
    %1051 = memref.load %arg6[%c25_389] : memref<81xf32, #tpu.memory_space<smem>>
    %1052 = vector.broadcast %1051 : f32 to vector<4x12xf32>
    %1053 = arith.mulf %1050, %1052 : vector<4x12xf32>
    %1054 = arith.addf %1040, %1053 : vector<4x12xf32>
    %c52_390 = arith.constant 52 : index
    %1055 = memref.load %arg6[%c52_390] : memref<81xf32, #tpu.memory_space<smem>>
    %1056 = vector.broadcast %1055 : f32 to vector<4x12xf32>
    %1057 = arith.mulf %1050, %1056 : vector<4x12xf32>
    %1058 = arith.addf %1044, %1057 : vector<4x12xf32>
    %c79_391 = arith.constant 79 : index
    %1059 = memref.load %arg6[%c79_391] : memref<81xf32, #tpu.memory_space<smem>>
    %1060 = vector.broadcast %1059 : f32 to vector<4x12xf32>
    %1061 = arith.mulf %1050, %1060 : vector<4x12xf32>
    %1062 = arith.addf %1048, %1061 : vector<4x12xf32>
    %c2_392 = arith.constant 2 : index
    %c10_393 = arith.constant 10 : index
    %c2_394 = arith.constant 2 : index
    %1063 = vector.load %arg9[%c2_392, %c10_393, %c2_394] : memref<3x14x14xf32, #tpu.memory_space<vmem>>, vector<1x4x12xf32>
    %1064 = vector.shape_cast %1063 : vector<1x4x12xf32> to vector<4x12xf32>
    %c26_395 = arith.constant 26 : index
    %1065 = memref.load %arg6[%c26_395] : memref<81xf32, #tpu.memory_space<smem>>
    %1066 = vector.broadcast %1065 : f32 to vector<4x12xf32>
    %1067 = arith.mulf %1064, %1066 : vector<4x12xf32>
    %1068 = arith.addf %1054, %1067 : vector<4x12xf32>
    %c53_396 = arith.constant 53 : index
    %1069 = memref.load %arg6[%c53_396] : memref<81xf32, #tpu.memory_space<smem>>
    %1070 = vector.broadcast %1069 : f32 to vector<4x12xf32>
    %1071 = arith.mulf %1064, %1070 : vector<4x12xf32>
    %1072 = arith.addf %1058, %1071 : vector<4x12xf32>
    %c80_397 = arith.constant 80 : index
    %1073 = memref.load %arg6[%c80_397] : memref<81xf32, #tpu.memory_space<smem>>
    %1074 = vector.broadcast %1073 : f32 to vector<4x12xf32>
    %1075 = arith.mulf %1064, %1074 : vector<4x12xf32>
    %1076 = arith.addf %1062, %1075 : vector<4x12xf32>
    %cst_398 = arith.constant 0.000000e+00 : f32
    %1077 = vector.broadcast %cst_398 : f32 to vector<4x12xf32>
    %1078 = arith.maximumf %1068, %1077 : vector<4x12xf32>
    %c0_399 = arith.constant 0 : index
    %c8_400 = arith.constant 8 : index
    %c0_401 = arith.constant 0 : index
    %1079 = vector.load %arg10[%c0_399, %c8_400, %c0_401] : memref<3x12x12xf32, #tpu.memory_space<vmem>>, vector<1x4x12xf32>
    %1080 = vector.shape_cast %1079 : vector<1x4x12xf32> to vector<4x12xf32>
    %1081 = vector.shape_cast %1078 : vector<4x12xf32> to vector<1x4x12xf32>
    tpu.vector_store %arg10[%c0_399, %c8_400, %c0_401], %1081 {strides = array<i32>} : memref<3x12x12xf32, #tpu.memory_space<vmem>>, vector<1x4x12xf32>,
    %cst_402 = arith.constant 0.000000e+00 : f32
    %1082 = vector.broadcast %cst_402 : f32 to vector<4x12xf32>
    %1083 = arith.maximumf %1072, %1082 : vector<4x12xf32>
    %c1_403 = arith.constant 1 : index
    %c8_404 = arith.constant 8 : index
    %c0_405 = arith.constant 0 : index
    %1084 = vector.load %arg10[%c1_403, %c8_404, %c0_405] : memref<3x12x12xf32, #tpu.memory_space<vmem>>, vector<1x4x12xf32>
    %1085 = vector.shape_cast %1084 : vector<1x4x12xf32> to vector<4x12xf32>
    %1086 = vector.shape_cast %1083 : vector<4x12xf32> to vector<1x4x12xf32>
    tpu.vector_store %arg10[%c1_403, %c8_404, %c0_405], %1086 {strides = array<i32>} : memref<3x12x12xf32, #tpu.memory_space<vmem>>, vector<1x4x12xf32>,
    %cst_406 = arith.constant 0.000000e+00 : f32
    %1087 = vector.broadcast %cst_406 : f32 to vector<4x12xf32>
    %1088 = arith.maximumf %1076, %1087 : vector<4x12xf32>
    %c2_407 = arith.constant 2 : index
    %c8_408 = arith.constant 8 : index
    %c0_409 = arith.constant 0 : index
    %1089 = vector.load %arg10[%c2_407, %c8_408, %c0_409] : memref<3x12x12xf32, #tpu.memory_space<vmem>>, vector<1x4x12xf32>
    %1090 = vector.shape_cast %1089 : vector<1x4x12xf32> to vector<4x12xf32>
    %1091 = vector.shape_cast %1088 : vector<4x12xf32> to vector<1x4x12xf32>
    tpu.vector_store %arg10[%c2_407, %c8_408, %c0_409], %1091 {strides = array<i32>} : memref<3x12x12xf32, #tpu.memory_space<vmem>>, vector<1x4x12xf32>,
    %c0_410 = arith.constant 0 : index
    %c0_411 = arith.constant 0 : index
    %1092 = vector.load %arg2[%c0_410, %c0_411] : memref<6x11xf32, #tpu.memory_space<vmem>>, vector<6x11xf32>
    %c0_412 = arith.constant 0 : index
    %c0_413 = arith.constant 0 : index
    %1093 = vector.load %arg3[%c0_412, %c0_413] : memref<11x6xf32, #tpu.memory_space<vmem>>, vector<11x6xf32>
    %c0_414 = arith.constant 0 : index
    %c0_415 = arith.constant 0 : index
    %c0_416 = arith.constant 0 : index
    %1094 = vector.load %arg10[%c0_414, %c0_415, %c0_416] : memref<3x12x12xf32, #tpu.memory_space<vmem>>, vector<1x12x11xf32>
    %1095 = vector.shape_cast %1094 : vector<1x12x11xf32> to vector<12x11xf32>
    %c0_417 = arith.constant 0 : index
    %c0_418 = arith.constant 0 : index
    %c1_419 = arith.constant 1 : index
    %1096 = vector.load %arg10[%c0_417, %c0_418, %c1_419] : memref<3x12x12xf32, #tpu.memory_space<vmem>>, vector<1x12x11xf32>
    %1097 = vector.shape_cast %1096 : vector<1x12x11xf32> to vector<12x11xf32>
    %1098 = arith.maximumf %1095, %1097 : vector<12x11xf32>
    %1099 = vector.extract_strided_slice %1098 {offsets = [0, 0], sizes = [11, 11], strides = [1, 1]} : vector<12x11xf32> to vector<11x11xf32>
    %1100 = vector.extract_strided_slice %1098 {offsets = [1, 0], sizes = [11, 11], strides = [1, 1]} : vector<12x11xf32> to vector<11x11xf32>
    %1101 = arith.maximumf %1099, %1100 : vector<11x11xf32>
    %cst_420 = arith.constant dense<0.000000e+00> : vector<6x11xf32>
    %1102 = tpu.matmul %1092, %1101, %cst_420 {dimension_numbers = #tpu.dot_dimension_numbers<[1], [0], [0], [1], [0, 0, 1, 1], [], []>, precision = #tpu.contract_precision<fp32>} : vector<6x11xf32>, vector<11x11xf32>, vector<6x11xf32> -> vector<6x11xf32>
    %cst_421 = arith.constant dense<0.000000e+00> : vector<6x6xf32>
    %1103 = tpu.matmul %1102, %1093, %cst_421 {dimension_numbers = #tpu.dot_dimension_numbers<[1], [0], [0], [1], [0, 0, 1, 1], [], []>, precision = #tpu.contract_precision<fp32>} : vector<6x11xf32>, vector<11x6xf32>, vector<6x6xf32> -> vector<6x6xf32>
    %c0_422 = arith.constant 0 : index
    %c0_423 = arith.constant 0 : index
    %c0_424 = arith.constant 0 : index
    %c0_425 = arith.constant 0 : index
    %1104 = vector.load %arg8[%c0_422, %c0_423, %c0_424, %c0_425] : memref<1x3x6x6xf32, #tpu.memory_space<vmem>>, vector<1x1x6x6xf32>
    %1105 = vector.shape_cast %1104 : vector<1x1x6x6xf32> to vector<6x6xf32>
    %1106 = vector.shape_cast %1103 : vector<6x6xf32> to vector<1x1x6x6xf32>
    tpu.vector_store %arg8[%c0_422, %c0_423, %c0_424, %c0_425], %1106 {strides = array<i32>} : memref<1x3x6x6xf32, #tpu.memory_space<vmem>>, vector<1x1x6x6xf32>,
    %c1_426 = arith.constant 1 : index
    %c0_427 = arith.constant 0 : index
    %c0_428 = arith.constant 0 : index
    %1107 = vector.load %arg10[%c1_426, %c0_427, %c0_428] : memref<3x12x12xf32, #tpu.memory_space<vmem>>, vector<1x12x11xf32>
    %1108 = vector.shape_cast %1107 : vector<1x12x11xf32> to vector<12x11xf32>
    %c1_429 = arith.constant 1 : index
    %c0_430 = arith.constant 0 : index
    %c1_431 = arith.constant 1 : index
    %1109 = vector.load %arg10[%c1_429, %c0_430, %c1_431] : memref<3x12x12xf32, #tpu.memory_space<vmem>>, vector<1x12x11xf32>
    %1110 = vector.shape_cast %1109 : vector<1x12x11xf32> to vector<12x11xf32>
    %1111 = arith.maximumf %1108, %1110 : vector<12x11xf32>
    %1112 = vector.extract_strided_slice %1111 {offsets = [0, 0], sizes = [11, 11], strides = [1, 1]} : vector<12x11xf32> to vector<11x11xf32>
    %1113 = vector.extract_strided_slice %1111 {offsets = [1, 0], sizes = [11, 11], strides = [1, 1]} : vector<12x11xf32> to vector<11x11xf32>
    %1114 = arith.maximumf %1112, %1113 : vector<11x11xf32>
    %cst_432 = arith.constant dense<0.000000e+00> : vector<6x11xf32>
    %1115 = tpu.matmul %1092, %1114, %cst_432 {dimension_numbers = #tpu.dot_dimension_numbers<[1], [0], [0], [1], [0, 0, 1, 1], [], []>, precision = #tpu.contract_precision<fp32>} : vector<6x11xf32>, vector<11x11xf32>, vector<6x11xf32> -> vector<6x11xf32>
    %cst_433 = arith.constant dense<0.000000e+00> : vector<6x6xf32>
    %1116 = tpu.matmul %1115, %1093, %cst_433 {dimension_numbers = #tpu.dot_dimension_numbers<[1], [0], [0], [1], [0, 0, 1, 1], [], []>, precision = #tpu.contract_precision<fp32>} : vector<6x11xf32>, vector<11x6xf32>, vector<6x6xf32> -> vector<6x6xf32>
    %c0_434 = arith.constant 0 : index
    %c1_435 = arith.constant 1 : index
    %c0_436 = arith.constant 0 : index
    %c0_437 = arith.constant 0 : index
    %1117 = vector.load %arg8[%c0_434, %c1_435, %c0_436, %c0_437] : memref<1x3x6x6xf32, #tpu.memory_space<vmem>>, vector<1x1x6x6xf32>
    %1118 = vector.shape_cast %1117 : vector<1x1x6x6xf32> to vector<6x6xf32>
    %1119 = vector.shape_cast %1116 : vector<6x6xf32> to vector<1x1x6x6xf32>
    tpu.vector_store %arg8[%c0_434, %c1_435, %c0_436, %c0_437], %1119 {strides = array<i32>} : memref<1x3x6x6xf32, #tpu.memory_space<vmem>>, vector<1x1x6x6xf32>,
    %c2_438 = arith.constant 2 : index
    %c0_439 = arith.constant 0 : index
    %c0_440 = arith.constant 0 : index
    %1120 = vector.load %arg10[%c2_438, %c0_439, %c0_440] : memref<3x12x12xf32, #tpu.memory_space<vmem>>, vector<1x12x11xf32>
    %1121 = vector.shape_cast %1120 : vector<1x12x11xf32> to vector<12x11xf32>
    %c2_441 = arith.constant 2 : index
    %c0_442 = arith.constant 0 : index
    %c1_443 = arith.constant 1 : index
    %1122 = vector.load %arg10[%c2_441, %c0_442, %c1_443] : memref<3x12x12xf32, #tpu.memory_space<vmem>>, vector<1x12x11xf32>
    %1123 = vector.shape_cast %1122 : vector<1x12x11xf32> to vector<12x11xf32>
    %1124 = arith.maximumf %1121, %1123 : vector<12x11xf32>
    %1125 = vector.extract_strided_slice %1124 {offsets = [0, 0], sizes = [11, 11], strides = [1, 1]} : vector<12x11xf32> to vector<11x11xf32>
    %1126 = vector.extract_strided_slice %1124 {offsets = [1, 0], sizes = [11, 11], strides = [1, 1]} : vector<12x11xf32> to vector<11x11xf32>
    %1127 = arith.maximumf %1125, %1126 : vector<11x11xf32>
    %cst_444 = arith.constant dense<0.000000e+00> : vector<6x11xf32>
    %1128 = tpu.matmul %1092, %1127, %cst_444 {dimension_numbers = #tpu.dot_dimension_numbers<[1], [0], [0], [1], [0, 0, 1, 1], [], []>, precision = #tpu.contract_precision<fp32>} : vector<6x11xf32>, vector<11x11xf32>, vector<6x11xf32> -> vector<6x11xf32>
    %cst_445 = arith.constant dense<0.000000e+00> : vector<6x6xf32>
    %1129 = tpu.matmul %1128, %1093, %cst_445 {dimension_numbers = #tpu.dot_dimension_numbers<[1], [0], [0], [1], [0, 0, 1, 1], [], []>, precision = #tpu.contract_precision<fp32>} : vector<6x11xf32>, vector<11x6xf32>, vector<6x6xf32> -> vector<6x6xf32>
    %c0_446 = arith.constant 0 : index
    %c2_447 = arith.constant 2 : index
    %c0_448 = arith.constant 0 : index
    %c0_449 = arith.constant 0 : index
    %1130 = vector.load %arg8[%c0_446, %c2_447, %c0_448, %c0_449] : memref<1x3x6x6xf32, #tpu.memory_space<vmem>>, vector<1x1x6x6xf32>
    %1131 = vector.shape_cast %1130 : vector<1x1x6x6xf32> to vector<6x6xf32>
    %1132 = vector.shape_cast %1129 : vector<6x6xf32> to vector<1x1x6x6xf32>
    tpu.vector_store %arg8[%c0_446, %c2_447, %c0_448, %c0_449], %1132 {strides = array<i32>} : memref<1x3x6x6xf32, #tpu.memory_space<vmem>>, vector<1x1x6x6xf32>,
    return
  }
  func.func @transform_0(%arg0: i32) -> (i32, i32, i32) {
    %c0_i32 = arith.constant 0 : i32
    %c0_i32_0 = arith.constant 0 : i32
    %c0_i32_1 = arith.constant 0 : i32
    return %arg0, %c0_i32, %c0_i32_0 : i32, i32, i32
  }
  func.func @transform_1(%arg0: i32) -> (i32, i32) {
    %c0_i32 = arith.constant 0 : i32
    %c0_i32_0 = arith.constant 0 : i32
    %c0_i32_1 = arith.constant 0 : i32
    return %c0_i32, %c0_i32_0 : i32, i32
  }
  func.func @transform_2(%arg0: i32) -> (i32, i32) {
    %c0_i32 = arith.constant 0 : i32
    %c0_i32_0 = arith.constant 0 : i32
    %c0_i32_1 = arith.constant 0 : i32
    return %c0_i32, %c0_i32_0 : i32, i32
  }
  func.func @transform_3(%arg0: i32) -> i32 {
    %c0_i32 = arith.constant 0 : i32
    %c0_i32_0 = arith.constant 0 : i32
    return %c0_i32 : i32
  }
  func.func @transform_4(%arg0: i32) -> i32 {
    %c0_i32 = arith.constant 0 : i32
    %c0_i32_0 = arith.constant 0 : i32
    return %c0_i32 : i32
  }
  func.func @transform_5(%arg0: i32) -> i32 {
    %c0_i32 = arith.constant 0 : i32
    %c0_i32_0 = arith.constant 0 : i32
    return %c0_i32 : i32
  }
  func.func @transform_6(%arg0: i32) -> i32 {
    %c0_i32 = arith.constant 0 : i32
    %c0_i32_0 = arith.constant 0 : i32
    return %c0_i32 : i32
  }
  func.func @transform_7(%arg0: i32) -> (i32, i32, i32, i32) {
    %c0_i32 = arith.constant 0 : i32
    %c0_i32_0 = arith.constant 0 : i32
    %c0_i32_1 = arith.constant 0 : i32
    %c0_i32_2 = arith.constant 0 : i32
    return %arg0, %c0_i32, %c0_i32_0, %c0_i32_1 : i32, i32, i32, i32
  }
}

</mosaic_0001>

<bundles_post_ra>
// kernel: tpu_custom_call.1
= control target key start
LH: loop header
LB: loop body
LE: loop exit
PB: predicated region body
PF: predicated region fallthrough
CT: control target
= control target key end

     0   :  { %12 = vsyncpa [#allocation5], 0  ;;  %s6796_s0 = inlined_call_operand.hbm [shape: f32[2,16,16], index: 0, kind: input, shape index: {}]   ;;  %s6797_s1 = inlined_call_operand.vmem [shape: f32[6,11], index: 1, kind: input, shape index: {}]   ;;  %s6798_s2 = inlined_call_operand.vmem [shape: f32[11,6], index: 2, kind: input, shape index: {}]   ;;  %s6799_s3 = inlined_call_operand.vmem [shape: f32[27], index: 3, kind: input, shape index: {}]   ;;  %s6800_s4 = inlined_call_operand.vmem [shape: f32[3], index: 4, kind: input, shape index: {}]   ;;  %s6801_s5 = inlined_call_operand.vmem [shape: f32[81], index: 5, kind: input, shape index: {}]   ;;  %s6802_s6 = inlined_call_operand.vmem [shape: f32[3], index: 6, kind: input, shape index: {}]   ;;  %s6803_s7 = inlined_call_operand.vmem [shape: f32[2,3,6,6], index: 7, kind: output, shape index: {}]  }
   0x1   :  { %14 = vsyncpa [#allocation5 + $0x1], 0 }
   0x2   :  { %15 = vsyncpa [#allocation6], 0 }
   0x3   :  { %16 = vsyncpa [#allocation9], 0 }
   0x4   :  { %17 = vsyncpa [#allocation12], 0  ;;  %s5726_s24 = smov 0   ;;  %s5728_s25 = smov 0  }
   0x5   :  { %s5730_s26 = smov 0   ;;  %s5732_s27 = smov 0  }
   0x6 LB: > { %s5745_s28 = sadd.s32 4294967295, %s5673_s27   ;;  %p43_p0 = scmp.ne.s32.totalorder %s5665_s25, %s5661_s24  ;;  %s5673_s27 = sphi %s5732_s27, %s6822_s27   ;;  %s5669_s26 = sphi %s5730_s26, %s6821_s26   ;;  %s5665_s25 = sphi %s5728_s25, %s6820_s25   ;;  %s5661_s24 = sphi %s5726_s24, %s6819_s24  }
   0x7   : > { %p6804_p1 = scmp.eq.s32.totalorder %s5745_s28, 0  ;;  %p4833_p2 = scmp.ge.s32.totalorder %s5673_s27, 1 }
   0x8   : > { %p206_p3 = scmp.lt.s32.totalorder %s5673_s27, 3  ;;  %s236_s9 = sshll.u32 %s6800_s4, 4  ;;  %s237_s9 = int_to_ptr.vmem [resolvable:$true] %s236_s9 }
   0x9   : > { %p5753_p4 = por %p6804_p1, %p43_p0  ;;  %s225_s13 = sshll.u32 %s6799_s3, 4  ;;  %s226_s13 = int_to_ptr.vmem [resolvable:$true] %s225_s13 }
   0xa   : > { %p5760_p5 = pnand %p4833_p2, %p206_p3  ;;  %s247_s17 = sshll.u32 %s6801_s5, 4  ;;  %s5778_s17 = int_to_ptr.vmem [resolvable:$true] %s247_s17 }
   0xb   : > { %s6807_s29 = scalar_select %p5753_p4, 1, 0 }
   0xc   : > { %s6808_s10 = scalar_select %p5760_p5, 1, 0 }
   0xd   : > { %p5453_p6 = pneg %p5760_p5  ;;  %s258_s20 = sshll.u32 %s6802_s6, 4  ;;  %s259_s20 = int_to_ptr.vmem [resolvable:$true] %s258_s20 }
   0xe   : > { %s5539_s21 = scalar_lea.vmem %s237_s9, 16  ;;  %p5547_p12 = scmp.lt.s32.totalorder %s237_s9, %s237_s9 }
   0xf   : > { %p5771_p7 = pnand %p5453_p6, %p6804_p1  ;;  %p5540_p8 = scmp.ne.s32.totalorder %s237_s9, %s5539_s21 }
  0x10   : > { %p5548_p13 = scmp.lt.s32.totalorder %s5539_s21, %s5539_s21 }
  0x11   : > { %p5541_p9 = pneg %p5771_p7 }
  0x12   : > { %p5549_p0 = por %p5548_p13, %p5547_p12 }
  0x13   : > { %p5542_p10 = pnand %p5541_p9, %p5540_p8 }
  0x15   : > { %p5543_p11 = pneg %p5542_p10 }
  0x17   : > { %p5550_p2 = pnand %p5549_p0, %p5543_p11 }
  0x19   : > { %5553 = shalt.err (!%p5550_p2)
}
  0x1a   : > { %s5675_s22 = smov [#allocation8]   ;;  %s5554_s23 = scalar_lea.vmem %s226_s13, 16 }
  0x1b   : > { %5459 = dma.vmem_to_smem (!%p5771_p7), %s237_s9, 16, %s5675_s22, [#allocation9]  }
  0x1c   : > { %p5555_p3 = scmp.ne.s32.totalorder %s226_s13, %s5554_s23  ;;  %p5562_p4 = scmp.lt.s32.totalorder %s226_s13, %s226_s13 }
  0x1d   : > { %p5563_p5 = scmp.lt.s32.totalorder %s5554_s23, %s5554_s23 }
  0x1e   : > { %p5557_p6 = pnand %p5555_p3, %p5541_p9 }
  0x1f   : > { %p5564_p8 = por %p5563_p5, %p5562_p4 }
  0x20   : > { %p5558_p1 = pneg %p5557_p6 }
  0x22   : > { %p5565_p10 = pnand %p5564_p8, %p5558_p1 }
  0x24   : > { %5568 = shalt.err (!%p5565_p10)
}
  0x25   : > { %s5676_s24 = smov [#allocation7]   ;;  %s5569_s30 = scalar_lea.vmem %s5778_s17, 16 }
  0x26   : > { %5456 = dma.vmem_to_smem (!%p5771_p7), %s226_s13, 16, %s5676_s24, [#allocation6]  }
  0x27   : > { %p5570_p11 = scmp.ne.s32.totalorder %s5778_s17, %s5569_s30  ;;  %p5577_p0 = scmp.lt.s32.totalorder %s5778_s17, %s5778_s17 }
  0x28   : > { %p5578_p2 = scmp.lt.s32.totalorder %s5569_s30, %s5569_s30 }
  0x29   : > { %p5572_p12 = pnand %p5570_p11, %p5541_p9 }
  0x2a   : > { %p5579_p4 = por %p5578_p2, %p5577_p0 }
  0x2b   : > { %p5573_p13 = pneg %p5572_p12 }
  0x2d   : > { %p5580_p1 = pnand %p5579_p4, %p5573_p13 }
  0x2f   : > { %5583 = shalt.err (!%p5580_p1)
}
  0x30   : > { %s5677_s8 = smov [#allocation10]   ;;  %s5584_s12 = scalar_lea.vmem %s259_s20, 16 }
  0x31   : > { %5462 = dma.vmem_to_smem (!%p5771_p7), %s5778_s17, 16, %s5677_s8, [#allocation9]  }
  0x32   : > { %p5585_p5 = scmp.ne.s32.totalorder %s259_s20, %s5584_s12  ;;  %p5592_p8 = scmp.lt.s32.totalorder %s259_s20, %s259_s20 }
  0x33   : > { %p5593_p10 = scmp.lt.s32.totalorder %s5584_s12, %s5584_s12 }
  0x34   : > { %p5587_p3 = pnand %p5585_p5, %p5541_p9 }
  0x35   : > { %p5594_p11 = por %p5593_p10, %p5592_p8 }
  0x36   : > { %p5588_p6 = pneg %p5587_p3 }
  0x38   : > { %p5595_p12 = pnand %p5594_p11, %p5588_p6 }
  0x3a   : > { %5598 = shalt.err (!%p5595_p12)
}
  0x3b   : > { %s5678_s13 = smov [#allocation11]   ;;  %s5815_s15 = sadd.s32 1, %s5673_s27  }
  0x3c   : > { %5465 = dma.vmem_to_smem (!%p5771_p7), %s259_s20, 16, %s5678_s13, [#allocation12]  }
  0x3d   : > { %s27_s16 = ssub.s32 %s5673_s27, %s5815_s15  ;;  %s30_s17 = sadd.s32 1, %s5669_s26 }
  0x3e   : > { %p28_p9 = scmp.eq.s32.totalorder %s27_s16, 0  ;;  %p37_p13 = scmp.ne.s32.totalorder %s5669_s26, %s5665_s25 }
  0x3f   : > { %p38_p0 = scmp.eq.s32.totalorder %s5673_s27, 0  ;;  %p5474_p4 = scmp.lt.s32.totalorder %s5673_s27, 2 }
  0x40   : > { %s5824_s14 = scalar_select %p28_p9, %s5669_s26, %s30_s17  }
  0x41   : > { %p39_p2 = por %p38_p0, %p37_p13  ;;  %s269_s18 = sand.u32 1, %s5669_s26  }
  0x42   : > { %s5073_s19 = sshll.u32 %s5673_s27, 8  ;;  %s4839_s21 = sshll.u32 %s269_s18, 4 }
  0x43   : > { %s5832_s24 = scalar_lea.hbm %s6796_s0, %s5073_s19  ;;  %s273_s20 = scalar_lea.vmem [#allocation4], %s4839_s21 }
  0x44   : > { %s280_s30 = sshll.u32 %s273_s20, 4  ;;  %p5834_p7 = pnand %p5474_p4, %p39_p2  ;;  %s5838_s30 = int_to_ptr.vmem [resolvable:$true] %s280_s30 }
  0x45   : > { %s5840_s9 = scalar_lea.sflag [#allocation5], %s269_s18  ;;  %s5599_s27 = scalar_lea.hbm %s5832_s24, 256 }
  0x46   : > { %p5600_p1 = scmp.ne.s32.totalorder %s5832_s24, %s5599_s27  ;;  %p5601_p5 = pneg %p5834_p7 }
  0x47   : > { %s5604_s13 = scalar_lea.hbm %s6796_s0, 512  ;;  %p5605_p8 = scmp.lt.s32.totalorder %s5832_s24, %s6796_s0 }
  0x48   : > { %p5602_p3 = pnand %p5601_p5, %p5600_p1  ;;  %p5606_p10 = scmp.lt.s32.totalorder %s5604_s13, %s5599_s27 }
  0x4a   : > { %p5603_p6 = pneg %p5602_p3  ;;  %p5607_p11 = por %p5606_p10, %p5605_p8 }
  0x4c   : > { %p5608_p12 = pnand %p5607_p11, %p5603_p6 }
  0x4e   : > { %5611 = shalt.err (!%p5608_p12)
}
  0x4f   : > { %s5612_s18 = scalar_lea.vmem %s5838_s30, 256  ;;  %s5679_s19 = smov [#allocation4]  }
  0x50   : > { %p5613_p9 = scmp.ne.s32.totalorder %s5838_s30, %s5612_s18  ;;  %s5617_s21 = sshll.u32 %s5679_s19, 4  ;;  %s5618_s21 = int_to_ptr.vmem [resolvable:$false] %s5617_s21 }
  0x51   : > { %s5619_s22 = scalar_lea.vmem %s5618_s21, 512  ;;  %p5620_p2 = scmp.lt.s32.totalorder %s5838_s30, %s5618_s21 }
  0x52   : > { %p5615_p13 = pnand %p5613_p9, %p5601_p5  ;;  %p5621_p4 = scmp.lt.s32.totalorder %s5619_s22, %s5612_s18 }
  0x54   : > { %p5616_p0 = pneg %p5615_p13  ;;  %p5622_p1 = por %p5621_p4, %p5620_p2 }
  0x56   : > { %p5623_p3 = pnand %p5622_p1, %p5616_p0 }
  0x58   : > { %5626 = shalt.err (!%p5623_p3)
}
  0x59   : > { %s5680_s23 = smov 128   ;;  %s5681_s20 = smov 8  }
  0x5a   : > { %5469 = dma.hbm_to_vmem [thread:$0]  (!%p5834_p7), %s5832_s24, 256, %s5838_s30, %s5840_s9, %s5680_s23, %s5680_s23, %s5681_s20  }
  0x5b   : > { %p6811_p5 = scmp.ne.s32.totalorder %s6808_s10, 0 }
  0x5c   : > { %s294_s27 = sand.u32 (!%p6811_p5), 1, %s5665_s25   ;;  %p6812_p6 = scmp.ne.s32.totalorder (!%p6811_p5), %s6807_s29, 0 }
  0x5d   : > { %292 = sbr.rel (%p6811_p5) target bundleno = 1486 (0x5ce), region = 48  ;;  %s4843_s11 = sshll.u32 (!%p6811_p5), %s294_s27, 4 }
  0x5e   : > { %s295_s12 = scalar_lea.sflag (!%p6811_p5), [#allocation5], %s294_s27  ;;  %s5864_s13 = scalar_lea.vmem (!%p6811_p5), [#allocation4], %s4843_s11 }
  0x62   : > { %5644 = dma.done.wait (%p6812_p6), %s295_s12, 256  }
  0x63   : > { %5646 = vsyncadd (%p6812_p6), %s295_s12, 4294967040  ;;  %p6813_p8 = scmp.eq.s32.totalorder %s5745_s28, 0 }
  0x65   : > { %5648 = dma.done.wait (%p6813_p8), [#allocation6], 16   ;;  %p6814_p7 = pmov %p6813_p8 }
  0x67   : > { %5650 = vsyncadd (%p6814_p7), [#allocation6], 4294967280  ;;  %p6815_p10 = pmov %p6814_p7 }
  0x68   : > { %p6816_p11 = pmov %p6814_p7 }
  0x69   : > { %5652 = dma.done.wait (%p6815_p10), [#allocation9], 32  }
  0x6a   : > { %5654 = vsyncadd (%p6816_p11), [#allocation9], 4294967264  ;;  %p6817_p12 = pmov %p6814_p7 }
  0x6b   : > { %p6818_p9 = pmov %p6814_p7 }
  0x6c   : > { %5656 = dma.done.wait (%p6817_p12), [#allocation12], 16  }
  0x6d   : > { %5658 = vsyncadd (%p6818_p9), [#allocation12], 4294967280 }
  0x6e   : > { %319 = sfence }
  0x6f   : > { %s4884_s29 = sld [smem:[#allocation7 + $0x2]]  ;;  %v5883_v0 = vld [vmem:[%s5864_s13 + $0x8] sm:$0x3f]  ;;  %v5886_v2 = vld [vmem:[%s5864_s13] sm:$0xff]  ;;  %s5682_s8 = smov 126   ;;  %vm541_vm0 = vcmask 113664  }
  0x70   : > { %s4881_s10 = sld [smem:[#allocation7 + $0x1]]  ;;  %s5683_s9 = smov 127   ;;  %v5895_v8 = vld [vmem:[%s5864_s13 + $0x1] sm:$0xff]  ;;  %v5898_v10 = vld [vmem:[%s5864_s13 + $0x9] sm:$0x3f]  ;;  %vm739_vm1 = vcmask 111616  }
  0x71   : > { %s4862_s24 = sld [smem:[#allocation7 + $0x4]]  ;;  %v5909_v16 = vld [vmem:[%s5864_s13 + $0x2] sm:$0xff]  ;;  %v5912_v18 = vld [vmem:[%s5864_s13 + $0xa] sm:$0x3f]  ;;  %vm1301_vm2 = vcmask 97280   ;;  %vm1865_vm3 = vcmask 93184  }
  0x72   : > { %s4865_s30 = sld [smem:[#allocation7 + $0x5]]  ;;  %vm5685_vm4 = vmmov 0   ;;  %vm1896_vm5 = vcmask 89088   ;;  %vm1888_vm6 = vcmask 1046528   ;;  %vm1900_vm7 = vcmask 1042432   ;;  %p346_p13 = scmp.lt.s32.totalorder %s5745_s28, 1 }
  0x73   : > { %s4871_s16 = sld [smem:[#allocation7 + $0x7]]  ;;  %vm2828_vm8 = vcmask 46080  }
  0x74   : > { %s4874_s17 = sld [smem:[#allocation7 + $0x8]]  ;;  %s6824_s28 = smov (!%p346_p13, %s5745_s28), 1 }
  0x75   : > { %v593_v1 = vstv %s4884_s29  ;;  %s4854_s18 = sld [smem:[#allocation7 + $0xa]] }
  0x76   : > { %v594_v3 = vmul.f32 %v593_v1, %v5883_v0  ;;  %v569_v4 = vstv %s4881_s10  ;;  %v396_v6 = vmul.f32 %v593_v1, %v5886_v2  ;;  %s4857_s19 = sld [smem:[#allocation7 + $0xb]] }
  0x77   : > { %v570_v5 = vmul.f32 %v569_v4, %v5883_v0  ;;  %v372_v7 = vmul.f32 %v569_v4, %v5886_v2  ;;  %v432_v9 = vstv %s4862_s24  ;;  %s4863_s21 = sld [smem:[#allocation7 + $0xd]] }
  0x78   : > { %596 = vrot.lane.b32.xlu1 %v594_v3, %s5682_s8  ;;  %v433_v11 = vmul.f32 %v432_v9, %v5895_v8  ;;  %v631_v12 = vmul.f32 %v5898_v10, %v432_v9  ;;  %v456_v13 = vstv %s4865_s30  ;;  %s4866_s22 = sld [smem:[#allocation7 + $0xe]] }
  0x79   : > { %572 = vrot.lane.b32.xlu0 %v570_v5, %s5683_s9  ;;  %v457_v14 = vmul.f32 %v456_v13, %v5895_v8  ;;  %v655_v15 = vmul.f32 %v5898_v10, %v456_v13  ;;  %v493_v17 = vstv %s4871_s16  ;;  %s4872_s23 = sld [smem:[#allocation7 + $0x10]] }
  0x7a   : > { %v494_v19 = vmul.f32 %v493_v17, %v5909_v16  ;;  %v692_v20 = vmul.f32 %v5912_v18, %v493_v17  ;;  %v517_v21 = vstv %s4874_s17  ;;  %s4875_s20 = sld [smem:[#allocation7 + $0x11]] }
  0x7b   : > { %v518_v22 = vmul.f32 %v517_v21, %v5909_v16  ;;  %v716_v23 = vmul.f32 %v5912_v18, %v517_v21  ;;  %v379_v24 = vstv %s4854_s18  ;;  %s4855_s27 = sld [smem:[#allocation7 + $0x13]] }
  0x7c   : > { %398 = vrot.lane.b32.xlu1 %v396_v6, %s5682_s8  ;;  %v380_v25 = vmul.f32 %v379_v24, %v5886_v2  ;;  %v578_v26 = vmul.f32 %v5883_v0, %v379_v24  ;;  %v403_v27 = vstv %s4857_s19  ;;  %s4858_s11 = sld [smem:[#allocation7 + $0x14]] }
  0x7d   : > { %374 = vrot.lane.b32.xlu0 %v372_v7, %s5683_s9  ;;  %v404_v28 = vmul.f32 %v403_v27, %v5886_v2  ;;  %v602_v29 = vmul.f32 %v5883_v0, %v403_v27  ;;  %v440_v30 = vstv %s4863_s21  ;;  %s4864_s12 = sld [smem:[#allocation7 + $0x16]] }
  0x7e   : > { %v441_v31 = vmul.f32 %v440_v30, %v5895_v8  ;;  %v639_v32 = vmul.f32 %v5898_v10, %v440_v30  ;;  %v464_v33 = vstv %s4866_s22  ;;  %s4867_s13 = sld [smem:[#allocation7 + $0x17]] }
  0x7f   : > { %v465_v34 = vmul.f32 %v464_v33, %v5895_v8  ;;  %v663_v35 = vmul.f32 %v5898_v10, %v464_v33  ;;  %v501_v36 = vstv %s4872_s23  ;;  %s4873_s29 = sld [smem:[#allocation7 + $0x19]] }
  0x80   : > { %435 = vrot.lane.b32.xlu1 %v433_v11, %s5683_s9  ;;  %v502_v37 = vmul.f32 %v501_v36, %v5909_v16  ;;  %v700_v38 = vmul.f32 %v5912_v18, %v501_v36  ;;  %v525_v39 = vstv %s4875_s20  ;;  %s4876_s10 = sld [smem:[#allocation7 + $0x1a]] }
  0x81   : > { %633 = vrot.lane.b32.xlu0 %v631_v12, %s5683_s9  ;;  %v526_v40 = vmul.f32 %v525_v39, %v5909_v16  ;;  %v724_v41 = vmul.f32 %v5912_v18, %v525_v39  ;;  %v387_v42 = vstv %s4855_s27  ;;  %s550_s24 = sld [smem:[#allocation7]] }
  0x82   : > { %v388_v43 = vmul.f32 %v387_v42, %v5886_v2  ;;  %v586_v44 = vmul.f32 %v5883_v0, %v387_v42  ;;  %v411_v45 = vstv %s4858_s11  ;;  %s553_s30 = sld [smem:[#allocation8]] }
  0x83   : > { %v412_v46 = vmul.f32 %v411_v45, %v5886_v2  ;;  %v610_v47 = vmul.f32 %v5883_v0, %v411_v45  ;;  %v448_v48 = vstv %s4864_s12  ;;  %s4859_s16 = sld [smem:[#allocation7 + $0x3]] }
  0x84   : > { %459 = vrot.lane.b32.xlu1 %v457_v14, %s5682_s8  ;;  %v449_v49 = vmul.f32 %v448_v48, %v5895_v8  ;;  %v647_v50 = vmul.f32 %v5898_v10, %v448_v48  ;;  %v472_v51 = vstv %s4867_s13  ;;  %s4868_s17 = sld [smem:[#allocation7 + $0x6]] }
  0x85   : > { %657 = vrot.lane.b32.xlu0 %v655_v15, %s5682_s8  ;;  %v473_v52 = vmul.f32 %v472_v51, %v5895_v8  ;;  %v671_v53 = vmul.f32 %v5898_v10, %v472_v51  ;;  %v509_v54 = vstv %s4873_s29  ;;  %s4849_s18 = sld [smem:[#allocation7 + $0x9]] }
  0x86   : > { %v510_v55 = vmul.f32 %v509_v54, %v5909_v16  ;;  %v708_v56 = vmul.f32 %v5912_v18, %v509_v54  ;;  %v533_v57 = vstv %s4876_s10  ;;  %s4850_s19 = sld [smem:[#allocation8 + $0x1]] }
  0x87   : > { %v534_v58 = vmul.f32 %v533_v57, %v5909_v16  ;;  %v732_v59 = vmul.f32 %v5912_v18, %v533_v57  ;;  %v551_v60 = vstv %s550_s24  ;;  %s4860_s21 = sld [smem:[#allocation7 + $0xc]] }
  0x88   : > { %496 = vrot.lane.b32.xlu1 %v494_v19, %s5683_s9  ;;  %v552_v61 = vmul.f32 %v551_v60, %v5883_v0  ;;  %v554_v62 = vstv %s553_s30  ;;  %v354_v1 = vmul.f32 %v551_v60, %v5886_v2  ;;  %s5980_s22 = sld [smem:[#allocation10 + $0x1]] }
  0x89   : > { %694 = vrot.lane.b32.xlu0 %v692_v20, %s5683_s9  ;;  %v420_v3 = vstv %s4859_s16  ;;  %s5982_s23 = sld [smem:[#allocation7 + $0xf]] }
  0x8a   : > { %v555_v63 = vadd.f32 %v554_v62, %v552_v61  ;;  %v357_v7 = vadd.f32 %v554_v62, %v354_v1  ;;  %v619_v9 = vmul.f32 %v5898_v10, %v420_v3  ;;  %v421_v15 = vmul.f32 %v420_v3, %v5895_v8  ;;  %s5986_s20 = sld [smem:[#allocation10 + $0x2]] }
  0x8b   : > { %s5991_s27 = sld [smem:[#allocation10 + $0x4]] }
  0x8c   : > { %520 = vrot.lane.b32.xlu1 %v518_v22, %s5682_s8  ;;  %v481_v22 = vstv %s4868_s17  ;;  %s5996_s11 = sld [smem:[#allocation7 + $0x12]] }
  0x8d   : > { %718 = vrot.lane.b32.xlu0 %v716_v23, %s5682_s8  ;;  %v482_v27 = vmul.f32 %v481_v22, %v5909_v16  ;;  %v424_v51 = vstv %s4860_s21  ;;  %s6003_s12 = sld [smem:[#allocation10 + $0x5]] }
  0x8e   : > { %v425_v54 = vmul.f32 %v424_v51, %v5895_v8  ;;  %v623_v57 = vmul.f32 %v5898_v10, %v424_v51  ;;  %v1329_v61 = vstv %s5980_s22  ;;  %s6009_s13 = sld [smem:[#allocation8 + $0x2]] }
  0x8f   : > { %s6016_s29 = sld [smem:[#allocation10 + $0x7]] }
  0x90   : > { %382 = vrot.lane.b32.xlu1 %v380_v25, %s5683_s9  ;;  %s6023_s10 = sld [smem:[#allocation7 + $0x15]] }
  0x91   : > { %580 = vrot.lane.b32.xlu0 %v578_v26, %s5683_s9  ;;  %s6029_s24 = sld [smem:[#allocation10 + $0x8]] }
  0x92   : > { %s6040_s30 = sld [smem:[#allocation10 + $0xa]] }
  0x93   : > { %s6047_s16 = sld [smem:[#allocation7 + $0x18]] }
  0x94   : > { %406 = vrot.lane.b32.xlu1 %v404_v28, %s5682_s8  ;;  %v680_v28 = vmul.f32 %v5912_v18, %v481_v22  ;;  %s6054_s17 = sld [smem:[#allocation10 + $0xb]] }
  0x95   : > { %604 = vrot.lane.b32.xlu0 %v602_v29, %s5682_s8  ;;  %s6086_s21 = sld [smem:[#allocation10 + $0x10]] }
  0x96   : > { %s5039_s22 = sld [smem:[#allocation10 + $0x11]] }
  0x98   : > { %443 = vrot.lane.b32.xlu1 %v441_v31, %s5683_s9 }
  0x99   : > { %641 = vrot.lane.b32.xlu0 %v639_v32, %s5683_s9 }
  0x9c   : > { %467 = vrot.lane.b32.xlu1 %v465_v34, %s5682_s8 }
  0x9d   : > { %665 = vrot.lane.b32.xlu0 %v663_v35, %s5682_s8  ;;  %v359_v35 = vstv %s4849_s18  ;;  %s6063_s18 = sld [smem:[#allocation10 + $0xd]] }
  0x9e   : > { %v558_v42 = vmul.f32 %v5883_v0, %v359_v35 }
  0xa0   : > { %504 = vrot.lane.b32.xlu1 %v502_v37, %s5683_s9  ;;  %v360_v37 = vmul.f32 %v359_v35, %v5886_v2  ;;  %v1414_v35 = vstv %s6003_s12  ;;  %s5063_s12 = sld [smem:[#allocation10 + $0x19]] }
  0xa1   : > { %702 = vrot.lane.b32.xlu0 %v700_v38, %s5683_s9 }
  0xa4   : > { %528 = vrot.lane.b32.xlu1 %v526_v40, %s5682_s8 }
  0xa5   : > { %726 = vrot.lane.b32.xlu0 %v724_v41, %s5682_s8  ;;  %v362_v41 = vstv %s4850_s19  ;;  %s6075_s19 = sld [smem:[#allocation10 + $0xe]] }
  0xa6   : > { %v363_v45 = vadd.f32 %v362_v41, %v360_v37 }
  0xa8   : > { %390 = vrot.lane.b32.xlu1 %v388_v43, %s5683_s9 }
  0xa9   : > { %588 = vrot.lane.b32.xlu0 %v586_v44, %s5683_s9 }
  0xac   : > { %414 = vrot.lane.b32.xlu1 %v412_v46, %s5682_s8 }
  0xad   : > { %612 = vrot.lane.b32.xlu0 %v610_v47, %s5682_s8 }
  0xb0   : > { %451 = vrot.lane.b32.xlu1 %v449_v49, %s5683_s9 }
  0xb1   : > { %649 = vrot.lane.b32.xlu0 %v647_v50, %s5683_s9  ;;  %v561_v50 = vadd.f32 %v558_v42, %v362_v41 }
  0xb4   : > { %475 = vrot.lane.b32.xlu1 %v473_v52, %s5682_s8 }
  0xb5   : > { %673 = vrot.lane.b32.xlu0 %v671_v53, %s5682_s8 }
  0xb8   : > { %512 = vrot.lane.b32.xlu1 %v510_v55, %s5683_s9 }
  0xb9   : > { %710 = vrot.lane.b32.xlu0 %v708_v56, %s5683_s9 }
  0xbc   : > { %536 = vrot.lane.b32.xlu1 %v534_v58, %s5682_s8 }
  0xbd   : > { %734 = vrot.lane.b32.xlu0 %v732_v59, %s5682_s8 }
  0xea   : > { %v597_v4 = vpop.permute.xlu1 %596 }
  0xeb   : > { %v573_v5 = vpop.permute.xlu0 %572 }
  0xec   : > { %v575_v6 = vadd.f32 %v573_v5, %v555_v63 }
  0xee   : > { %v599_v11 = vadd.f32 %v597_v4, %v575_v6  ;;  %v399_v12 = vpop.permute.xlu1 %398  ;;  %v485_v4 = vstv %s5982_s23  ;;  %s5045_s23 = sld [smem:[#allocation10 + $0x13]] }
  0xef   : > { %v375_v13 = vpop.permute.xlu0 %374 }
  0xf0   : > { %v377_v14 = vadd.f32 %v375_v13, %v357_v7  ;;  %v620_v17 = vadd.f32 %v619_v9, %v599_v11  ;;  %v1353_v11 = vstv %s5986_s20  ;;  %v486_v13 = vmul.f32 %v485_v4, %v5909_v16  ;;  %s5048_s20 = sld [smem:[#allocation10 + $0x14]] }
  0xf2   : > { %v401_v19 = vadd.f32 %v399_v12, %v377_v14  ;;  %v436_v20 = vpop.permute.xlu1 %435 }
  0xf3   : > { %v634_v21 = vpop.permute.xlu0 %633 }
  0xf4   : > { %v422_v23 = vadd.f32 %v421_v15, %v401_v19  ;;  %v636_v25 = vadd.f32 %v634_v21, %v620_v17  ;;  %v684_v17 = vmul.f32 %v5912_v18, %v485_v4 }
  0xf6   : > { %v438_v24 = vadd.f32 %v436_v20, %v422_v23  ;;  %v460_v26 = vpop.permute.xlu1 %459 }
  0xf7   : > { %v658_v29 = vpop.permute.xlu0 %657 }
  0xf8   : > { %v462_v30 = vadd.f32 %v460_v26, %v438_v24  ;;  %v660_v31 = vadd.f32 %v658_v29, %v636_v25  ;;  %v1390_v24 = vstv %s5991_s27  ;;  %s5054_s27 = sld [smem:[#allocation10 + $0x16]] }
  0xfa   : > { %v497_v32 = vpop.permute.xlu1 %496  ;;  %v483_v33 = vadd.f32 %v482_v27, %v462_v30  ;;  %v681_v34 = vadd.f32 %v680_v28, %v660_v31  ;;  %v365_v30 = vstv %s5996_s11  ;;  %s5057_s11 = sld [smem:[#allocation10 + $0x17]] }
  0xfb   : > { %v695_v36 = vpop.permute.xlu0 %694 }
  0xfc   : > { %v499_v38 = vadd.f32 %v497_v32, %v483_v33  ;;  %v697_v39 = vadd.f32 %v695_v36, %v681_v34  ;;  %v366_v33 = vmul.f32 %v365_v30, %v5886_v2 }
  0xfe   : > { %v521_v40 = vpop.permute.xlu1 %520 }
  0xff   : > { %v523_v43 = vadd.f32 %v521_v40, %v499_v38  ;;  %v719_v44 = vpop.permute.xlu0 %718  ;;  %v564_v40 = vmul.f32 %v5883_v0, %v365_v30 }
 0x100   : > { %v721_v46 = vadd.f32 %v719_v44, %v697_v39  ;;  %v368_v39 = vstv %s6009_s13  ;;  %s5066_s13 = sld [smem:[#allocation10 + $0x1a]] }
 0x101   : > { %v540_v47 = vmax.f32 %v523_v43, 0.0  ;;  %v369_v43 = vadd.f32 %v368_v39, %v366_v33  ;;  %v567_v51 = vadd.f32 %v564_v40, %v368_v39  ;;  %v1597_v39 = vstv %s6075_s19  ;;  %s5042_s19 = sld [smem:[#allocation10 + $0x12]] }
 0x102   : > { %v738_v48 = vmax.f32 %v721_v46, 0.0  ;;  %v383_v49 = vpop.permute.xlu1 %382  ;;  %v1451_v46 = vstv %s6016_s29  ;;  %s1310_s29 = sld [smem:[#allocation10]] }
 0x103   : > { %542 = vst.msk [vmem:[#allocation2] sm:$0xff] %vm541_vm0, %v540_v47  ;;  %v385_v52 = vadd.f32 %v383_v49, %v363_v45  ;;  %v581_v53 = vpop.permute.xlu0 %580 }
 0x104   : > { %740 = vst.msk [vmem:[#allocation2 + $0x8] sm:$0x3f] %vm739_vm1, %v738_v48  ;;  %v583_v55 = vadd.f32 %v581_v53, %v561_v50 }
 0x106   : > { %v407_v56 = vpop.permute.xlu1 %406 }
 0x107   : > { %v409_v58 = vadd.f32 %v407_v56, %v385_v52  ;;  %v605_v59 = vpop.permute.xlu0 %604  ;;  %v428_v52 = vstv %s6023_s10  ;;  %s1313_s10 = sld [smem:[#allocation11]] }
 0x108   : > { %v607_v60 = vadd.f32 %v605_v59, %v583_v55 }
 0x109   : > { %v426_v62 = vadd.f32 %v425_v54, %v409_v58  ;;  %v429_v58 = vmul.f32 %v428_v52, %v5895_v8 }
 0x10a   : > { %v444_v63 = vpop.permute.xlu1 %443  ;;  %v624_v1 = vadd.f32 %v623_v57, %v607_v60  ;;  %v5993_v3 = vld [vmem:[#allocation2] sm:$0xff]  ;;  %v1475_v57 = vstv %s6029_s24  ;;  %s4997_s24 = sld [smem:[#allocation10 + $0x3]] }
 0x10b   : > { %v642_v5 = vpop.permute.xlu0 %641  ;;  %v5998_v6 = vld [vmem:[#allocation2 + $0x8] sm:$0xf]  ;;  %v766_v7 = vmul.f32 %v1329_v61, %v5993_v3  ;;  %v446_v12 = vadd.f32 %v444_v63, %v426_v62  ;;  %v790_v21 = vmul.f32 %v1353_v11, %v5993_v3 }
 0x10c   : > { %v1330_v9 = vmul.f32 %v1329_v61, %v5998_v6  ;;  %v644_v14 = vadd.f32 %v642_v5, %v624_v1  ;;  %v1354_v23 = vmul.f32 %v1353_v11, %v5998_v6  ;;  %v6014_v25 = vld [vmem:[#allocation2 + $0x1] sm:$0xff]  ;;  %v6019_v27 = vld [vmem:[#allocation2 + $0x9] sm:$0xf]  ;;  %v627_v61 = vmul.f32 %v5898_v10, %v428_v52 }
 0x10d   : > { %768 = vrot.lane.b32.xlu1 %v766_v7, %s5683_s9  ;;  %v827_v32 = vmul.f32 %v1390_v24, %v6014_v25  ;;  %v1391_v34 = vmul.f32 %v1390_v24, %v6019_v27  ;;  %v851_v2 = vmul.f32 %v1414_v35, %v6014_v25  ;;  %v1415_v45 = vmul.f32 %v1414_v35, %v6019_v27  ;;  %v6038_v47 = vld [vmem:[#allocation2 + $0x2] sm:$0xff]  ;;  %v6043_v49 = vld [vmem:[#allocation2 + $0xa] sm:$0xf] }
 0x10e   : > { %1332 = vrot.lane.b32.xlu0 %v1330_v9, %s5683_s9  ;;  %v468_v15 = vpop.permute.xlu1 %467  ;;  %v888_v55 = vmul.f32 %v1451_v46, %v6038_v47  ;;  %v1452_v56 = vmul.f32 %v1451_v46, %v6043_v49  ;;  %v912_v1 = vmul.f32 %v1475_v57, %v6038_v47  ;;  %v1476_v5 = vmul.f32 %v1475_v57, %v6043_v49 }
 0x10f   : > { %v470_v19 = vadd.f32 %v468_v15, %v446_v12  ;;  %v666_v20 = vpop.permute.xlu0 %665  ;;  %v1512_v7 = vstv %s6040_s30  ;;  %v489_v10 = vstv %s6047_s16  ;;  %s5006_s30 = sld [smem:[#allocation10 + $0x6]] }
 0x110   : > { %v668_v22 = vadd.f32 %v666_v20, %v644_v14  ;;  %v688_v24 = vmul.f32 %v5912_v18, %v489_v10  ;;  %s5015_s16 = sld [smem:[#allocation10 + $0x9]] }
 0x111   : > { %792 = vrot.lane.b32.xlu1 %v790_v21, %s5682_s8  ;;  %v487_v26 = vadd.f32 %v486_v13, %v470_v19  ;;  %v1536_v19 = vstv %s6054_s17  ;;  %v490_v21 = vmul.f32 %v489_v10, %v5909_v16  ;;  %v1780_v10 = vstv %s5057_s11  ;;  %s5024_s17 = sld [smem:[#allocation10 + $0xc]] }
 0x112   : > { %1356 = vrot.lane.b32.xlu0 %v1354_v23, %s5682_s8  ;;  %v505_v28 = vpop.permute.xlu1 %504  ;;  %v685_v29 = vadd.f32 %v684_v17, %v668_v22  ;;  %s5004_s11 = sld [smem:[#allocation10 + $0x20]] }
 0x113   : > { %v703_v31 = vpop.permute.xlu0 %702  ;;  %v507_v36 = vadd.f32 %v505_v28, %v487_v26 }
 0x114   : > { %v705_v37 = vadd.f32 %v703_v31, %v685_v29 }
 0x115   : > { %829 = vrot.lane.b32.xlu1 %v827_v32, %s5683_s9  ;;  %v1573_v32 = vstv %s6063_s18  ;;  %s5033_s18 = sld [smem:[#allocation10 + $0xf]] }
 0x116   : > { %1393 = vrot.lane.b32.xlu0 %v1391_v34, %s5683_s9  ;;  %v529_v38 = vpop.permute.xlu1 %528 }
 0x117   : > { %v531_v41 = vadd.f32 %v529_v38, %v507_v36  ;;  %v727_v42 = vpop.permute.xlu0 %726 }
 0x118   : > { %v729_v44 = vadd.f32 %v727_v42, %v705_v37 }
 0x119   : > { %v543_v48 = vmax.f32 %v531_v41, 0.0  ;;  %853 = vrot.lane.b32.xlu1 %v851_v2, %s5682_s8 }
 0x11a   : > { %v741_v0 = vmax.f32 %v729_v44, 0.0  ;;  %1417 = vrot.lane.b32.xlu0 %v1415_v45, %s5682_s8  ;;  %v391_v50 = vpop.permute.xlu1 %390 }
 0x11b   : > { %545 = vst.msk [vmem:[#allocation2 + $0x10] sm:$0xff] %vm541_vm0, %v543_v48  ;;  %v393_v53 = vadd.f32 %v391_v50, %v369_v43  ;;  %v589_v54 = vpop.permute.xlu0 %588  ;;  %v1634_v48 = vstv %s6086_s21  ;;  %s5051_s21 = sld [smem:[#allocation10 + $0x15]] }
 0x11c   : > { %742 = vst.msk [vmem:[#allocation2 + $0x18] sm:$0x3f] %vm739_vm1, %v741_v0  ;;  %v591_v59 = vadd.f32 %v589_v54, %v567_v51 }
 0x11d   : > { %890 = vrot.lane.b32.xlu1 %v888_v55, %s5683_s9  ;;  %v1658_v55 = vstv %s5039_s22  ;;  %s5060_s22 = sld [smem:[#allocation10 + $0x18]] }
 0x11e   : > { %1454 = vrot.lane.b32.xlu0 %v1452_v56, %s5683_s9  ;;  %v415_v60 = vpop.permute.xlu1 %414 }
 0x11f   : > { %v417_v62 = vadd.f32 %v415_v60, %v393_v53  ;;  %v613_v63 = vpop.permute.xlu0 %612 }
 0x120   : > { %v615_v4 = vadd.f32 %v613_v63, %v591_v59  ;;  %v1719_v63 = vstv %s5048_s20  ;;  %s4995_s20 = sld [smem:[#allocation10 + $0x1d]] }
 0x121   : > { %914 = vrot.lane.b32.xlu1 %v912_v1, %s5682_s8  ;;  %v430_v8 = vadd.f32 %v429_v58, %v417_v62  ;;  %v1695_v58 = vstv %s5045_s23  ;;  %s4992_s23 = sld [smem:[#allocation10 + $0x1c]] }
 0x122   : > { %1478 = vrot.lane.b32.xlu0 %v1476_v5, %s5682_s8  ;;  %v452_v9 = vpop.permute.xlu1 %451  ;;  %v628_v11 = vadd.f32 %v627_v61, %v615_v4  ;;  %v6067_v12 = vld [vmem:[#allocation2 + $0x10] sm:$0xff]  ;;  %v1756_v5 = vstv %s5054_s27  ;;  %s5001_s27 = sld [smem:[#allocation10 + $0x1f]] }
 0x123   : > { %v650_v13 = vpop.permute.xlu0 %649  ;;  %v6070_v14 = vld [vmem:[#allocation2 + $0x18] sm:$0xf]  ;;  %v949_v15 = vmul.f32 %v1512_v7, %v6067_v12  ;;  %v454_v20 = vadd.f32 %v452_v9, %v430_v8  ;;  %v973_v29 = vmul.f32 %v1536_v19, %v6067_v12 }
 0x124   : > { %v1513_v17 = vmul.f32 %v1512_v7, %v6070_v14  ;;  %v652_v22 = vadd.f32 %v650_v13, %v628_v11  ;;  %v1537_v31 = vmul.f32 %v1536_v19, %v6070_v14  ;;  %v6084_v33 = vld [vmem:[#allocation2 + $0x11] sm:$0xff]  ;;  %v6089_v34 = vld [vmem:[#allocation2 + $0x19] sm:$0xf] }
 0x125   : > { %951 = vrot.lane.b32.xlu1 %v949_v15, %s5683_s9  ;;  %v1010_v37 = vmul.f32 %v1573_v32, %v6084_v33  ;;  %v1574_v38 = vmul.f32 %v1573_v32, %v6089_v34  ;;  %v1034_v44 = vmul.f32 %v1597_v39, %v6084_v33  ;;  %v1598_v46 = vmul.f32 %v1597_v39, %v6089_v34  ;;  %v6100_v0 = vld [vmem:[#allocation2 + $0x12] sm:$0xff]  ;;  %v6103_v51 = vld [vmem:[#allocation2 + $0x1a] sm:$0xf] }
 0x126   : > { %1515 = vrot.lane.b32.xlu0 %v1513_v17, %s5683_s9  ;;  %v476_v23 = vpop.permute.xlu1 %475  ;;  %v1071_v53 = vmul.f32 %v1634_v48, %v6100_v0  ;;  %v1635_v54 = vmul.f32 %v1634_v48, %v6103_v51  ;;  %v1095_v56 = vmul.f32 %v1658_v55, %v6100_v0  ;;  %v1659_v57 = vmul.f32 %v1658_v55, %v6103_v51 }
 0x127   : > { %v478_v26 = vadd.f32 %v476_v23, %v454_v20  ;;  %v674_v28 = vpop.permute.xlu0 %673  ;;  %v1817_v17 = vstv %s5063_s12  ;;  %v1841_v23 = vstv %s5066_s13  ;;  %s5010_s12 = sld [smem:[#allocation10 + $0x22]] }
 0x128   : > { %v676_v30 = vadd.f32 %v674_v28, %v652_v22  ;;  %v1311_v28 = vstv %s1310_s29  ;;  %s5013_s13 = sld [smem:[#allocation10 + $0x23]] }
 0x129   : > { %975 = vrot.lane.b32.xlu1 %v973_v29, %s5682_s8  ;;  %v491_v16 = vadd.f32 %v490_v21, %v478_v26  ;;  %v748_v29 = vmul.f32 %v1311_v28, %v5993_v3  ;;  %s5019_s29 = sld [smem:[#allocation10 + $0x25]] }
 0x12a   : > { %1539 = vrot.lane.b32.xlu0 %v1537_v31, %s5682_s8  ;;  %v513_v18 = vpop.permute.xlu1 %512  ;;  %v689_v35 = vadd.f32 %v688_v24, %v676_v30  ;;  %v1312_v30 = vmul.f32 %v1311_v28, %v5998_v6  ;;  %v1314_v31 = vstv %s1313_s10  ;;  %s5022_s10 = sld [smem:[#allocation10 + $0x26]] }
 0x12b   : > { %v711_v36 = vpop.permute.xlu0 %710  ;;  %v515_v40 = vadd.f32 %v513_v18, %v491_v16  ;;  %v751_v18 = vadd.f32 %v1314_v31, %v748_v29  ;;  %v1561_v29 = vstv %s5024_s17  ;;  %s5040_s17 = sld [smem:[#allocation10 + $0x2c]] }
 0x12c   : > { %v713_v41 = vadd.f32 %v711_v36, %v689_v35  ;;  %v1315_v35 = vadd.f32 %v1314_v31, %v1312_v30  ;;  %v1378_v36 = vstv %s4997_s24  ;;  %s5028_s24 = sld [smem:[#allocation10 + $0x28]] }
 0x12d   : > { %1012 = vrot.lane.b32.xlu1 %v1010_v37, %s5683_s9 }
 0x12e   : > { %1576 = vrot.lane.b32.xlu0 %v1574_v38, %s5683_s9  ;;  %v537_v42 = vpop.permute.xlu1 %536 }
 0x12f   : > { %v539_v2 = vadd.f32 %v537_v42, %v515_v40  ;;  %v735_v43 = vpop.permute.xlu0 %734  ;;  %v815_v42 = vmul.f32 %v1378_v36, %v6014_v25 }
 0x130   : > { %v737_v45 = vadd.f32 %v735_v43, %v713_v41  ;;  %v1379_v43 = vmul.f32 %v1378_v36, %v6019_v27 }
 0x131   : > { %v546_v50 = vmax.f32 %v539_v2, 0.0  ;;  %1036 = vrot.lane.b32.xlu1 %v1034_v44, %s5682_s8 }
 0x132   : > { %v743_v52 = vmax.f32 %v737_v45, 0.0  ;;  %1600 = vrot.lane.b32.xlu0 %v1598_v46, %s5682_s8 }
 0x133   : > { %548 = vst.msk [vmem:[#allocation2 + $0x20] sm:$0xff] %vm541_vm0, %v546_v50  ;;  %v1439_v50 = vstv %s5006_s30  ;;  %s5031_s30 = sld [smem:[#allocation10 + $0x29]] }
 0x134   : > { %744 = vst.msk [vmem:[#allocation2 + $0x28] sm:$0x3f] %vm739_vm1, %v743_v52 }
 0x135   : > { %1073 = vrot.lane.b32.xlu1 %v1071_v53, %s5683_s9 }
 0x136   : > { %1637 = vrot.lane.b32.xlu0 %v1635_v54, %s5683_s9 }
 0x139   : > { %1097 = vrot.lane.b32.xlu1 %v1095_v56, %s5682_s8 }
 0x13a   : > { %1661 = vrot.lane.b32.xlu0 %v1659_v57, %s5682_s8  ;;  %v6116_v59 = vld [vmem:[#allocation2 + $0x20] sm:$0xff]  ;;  %v876_v57 = vmul.f32 %v1439_v50, %v6038_v47 }
 0x13b   : > { %v6118_v60 = vld [vmem:[#allocation2 + $0x28] sm:$0xf]  ;;  %v1132_v61 = vmul.f32 %v1695_v58, %v6116_v59  ;;  %v1156_v1 = vmul.f32 %v1719_v63, %v6116_v59 }
 0x13c   : > { %v1696_v62 = vmul.f32 %v1695_v58, %v6118_v60  ;;  %v1720_v4 = vmul.f32 %v1719_v63, %v6118_v60  ;;  %v6126_v7 = vld [vmem:[#allocation2 + $0x21] sm:$0xff]  ;;  %v6129_v8 = vld [vmem:[#allocation2 + $0x29] sm:$0xf] }
 0x13d   : > { %1134 = vrot.lane.b32.xlu1 %v1132_v61, %s5683_s9  ;;  %v1193_v9 = vmul.f32 %v1756_v5, %v6126_v7  ;;  %v1757_v11 = vmul.f32 %v1756_v5, %v6129_v8  ;;  %v1217_v13 = vmul.f32 %v1780_v10, %v6126_v7  ;;  %v1781_v15 = vmul.f32 %v1780_v10, %v6129_v8  ;;  %v6138_v19 = vld [vmem:[#allocation2 + $0x22] sm:$0xff]  ;;  %v6141_v20 = vld [vmem:[#allocation2 + $0x2a] sm:$0xf] }
 0x13e   : > { %1698 = vrot.lane.b32.xlu0 %v1696_v62, %s5683_s9  ;;  %v1254_v21 = vmul.f32 %v1817_v17, %v6138_v19  ;;  %v1818_v22 = vmul.f32 %v1817_v17, %v6141_v20  ;;  %v1278_v24 = vmul.f32 %v1841_v23, %v6138_v19  ;;  %v1842_v26 = vmul.f32 %v1841_v23, %v6141_v20 }
 0x13f   : > { %v1440_v61 = vmul.f32 %v1439_v50, %v6043_v49  ;;  %v1500_v5 = vstv %s5015_s16  ;;  %s5037_s16 = sld [smem:[#allocation10 + $0x2b]] }
 0x140   : > { %v937_v17 = vmul.f32 %v1500_v5, %v6067_v12 }
 0x141   : > { %1158 = vrot.lane.b32.xlu1 %v1156_v1, %s5682_s8 }
 0x142   : > { %1722 = vrot.lane.b32.xlu0 %v1720_v4, %s5682_s8 }
 0x145   : > { %1195 = vrot.lane.b32.xlu1 %v1193_v9, %s5683_s9 }
 0x146   : > { %1759 = vrot.lane.b32.xlu0 %v1757_v11, %s5683_s9 }
 0x149   : > { %1219 = vrot.lane.b32.xlu1 %v1217_v13, %s5682_s8 }
 0x14a   : > { %1783 = vrot.lane.b32.xlu0 %v1781_v15, %s5682_s8 }
 0x14d   : > { %1256 = vrot.lane.b32.xlu1 %v1254_v21, %s5683_s9 }
 0x14e   : > { %1820 = vrot.lane.b32.xlu0 %v1818_v22, %s5683_s9  ;;  %v1501_v22 = vmul.f32 %v1500_v5, %v6070_v14 }
 0x151   : > { %1280 = vrot.lane.b32.xlu1 %v1278_v24, %s5682_s8 }
 0x152   : > { %1844 = vrot.lane.b32.xlu0 %v1842_v26, %s5682_s8 }
 0x17f   : > { %v769_v32 = vpop.permute.xlu1 %768 }
 0x180   : > { %v1333_v16 = vpop.permute.xlu0 %1332  ;;  %v771_v37 = vadd.f32 %v769_v32, %v751_v18 }
 0x181   : > { %v1335_v38 = vadd.f32 %v1333_v16, %v1315_v35  ;;  %v998_v35 = vmul.f32 %v1561_v29, %v6084_v33 }
 0x183   : > { %v793_v39 = vpop.permute.xlu1 %792 }
 0x184   : > { %v1357_v40 = vpop.permute.xlu0 %1356  ;;  %v795_v41 = vadd.f32 %v793_v39, %v771_v37  ;;  %v1562_v37 = vmul.f32 %v1561_v29, %v6089_v34 }
 0x185   : > { %v1359_v2 = vadd.f32 %v1357_v40, %v1335_v38 }
 0x186   : > { %v816_v44 = vadd.f32 %v815_v42, %v795_v41  ;;  %v1622_v42 = vstv %s5033_s18  ;;  %s5046_s18 = sld [smem:[#allocation10 + $0x2e]] }
 0x187   : > { %v1380_v45 = vadd.f32 %v1379_v43, %v1359_v2  ;;  %v830_v46 = vpop.permute.xlu1 %829 }
 0x188   : > { %v1394_v48 = vpop.permute.xlu0 %1393  ;;  %v832_v52 = vadd.f32 %v830_v46, %v816_v44 }
 0x189   : > { %v1396_v53 = vadd.f32 %v1394_v48, %v1380_v45  ;;  %v1059_v48 = vmul.f32 %v1622_v42, %v6100_v0 }
 0x18b   : > { %v854_v54 = vpop.permute.xlu1 %853 }
 0x18c   : > { %v1418_v55 = vpop.permute.xlu0 %1417  ;;  %v856_v56 = vadd.f32 %v854_v54, %v832_v52  ;;  %v1623_v52 = vmul.f32 %v1622_v42, %v6103_v51 }
 0x18d   : > { %v1420_v58 = vadd.f32 %v1418_v55, %v1396_v53 }
 0x18e   : > { %v877_v62 = vadd.f32 %v876_v57, %v856_v56  ;;  %v1683_v57 = vstv %s5042_s19  ;;  %s5049_s19 = sld [smem:[#allocation10 + $0x2f]] }
 0x18f   : > { %v1441_v63 = vadd.f32 %v1440_v61, %v1420_v58  ;;  %v891_v1 = vpop.permute.xlu1 %890 }
 0x190   : > { %v1455_v4 = vpop.permute.xlu0 %1454  ;;  %v893_v9 = vadd.f32 %v891_v1, %v877_v62 }
 0x191   : > { %v1457_v11 = vadd.f32 %v1455_v4, %v1441_v63  ;;  %v1120_v4 = vmul.f32 %v1683_v57, %v6116_v59 }
 0x193   : > { %v915_v10 = vpop.permute.xlu1 %914 }
 0x194   : > { %v1479_v13 = vpop.permute.xlu0 %1478  ;;  %v917_v15 = vadd.f32 %v915_v10, %v893_v9  ;;  %v1684_v9 = vmul.f32 %v1683_v57, %v6118_v60 }
 0x195   : > { %v1481_v21 = vadd.f32 %v1479_v13, %v1457_v11 }
 0x196   : > { %v938_v23 = vadd.f32 %v937_v17, %v917_v15  ;;  %v1744_v17 = vstv %s5051_s21  ;;  %s5055_s21 = sld [smem:[#allocation10 + $0x31]] }
 0x197   : > { %v1502_v24 = vadd.f32 %v1501_v22, %v1481_v21  ;;  %v952_v26 = vpop.permute.xlu1 %951 }
 0x198   : > { %v1516_v28 = vpop.permute.xlu0 %1515  ;;  %v954_v30 = vadd.f32 %v952_v26, %v938_v23 }
 0x199   : > { %v1518_v31 = vadd.f32 %v1516_v28, %v1502_v24  ;;  %v1181_v28 = vmul.f32 %v1744_v17, %v6126_v7 }
 0x19b   : > { %v976_v32 = vpop.permute.xlu1 %975 }
 0x19c   : > { %v1540_v16 = vpop.permute.xlu0 %1539  ;;  %v978_v18 = vadd.f32 %v976_v32, %v954_v30  ;;  %v1745_v30 = vmul.f32 %v1744_v17, %v6129_v8  ;;  %v1422_v17 = vstv %s5004_s11  ;;  %s5005_s11 = sld [smem:[#allocation10 + $0x3b]] }
 0x19d   : > { %v1542_v36 = vadd.f32 %v1540_v16, %v1518_v31 }
 0x19e   : > { %v999_v38 = vadd.f32 %v998_v35, %v978_v18  ;;  %v1805_v35 = vstv %s5060_s22  ;;  %s5058_s22 = sld [smem:[#allocation10 + $0x32]] }
 0x19f   : > { %v1563_v39 = vadd.f32 %v1562_v37, %v1542_v36  ;;  %v1013_v40 = vpop.permute.xlu1 %1012 }
 0x1a0   : > { %v1577_v41 = vpop.permute.xlu0 %1576  ;;  %v1015_v2 = vadd.f32 %v1013_v40, %v999_v38 }
 0x1a1   : > { %v1579_v43 = vadd.f32 %v1577_v41, %v1563_v39  ;;  %v1242_v41 = vmul.f32 %v1805_v35, %v6138_v19 }
 0x1a3   : > { %v1037_v44 = vpop.permute.xlu1 %1036 }
 0x1a4   : > { %v1601_v45 = vpop.permute.xlu0 %1600  ;;  %v1039_v46 = vadd.f32 %v1037_v44, %v1015_v2  ;;  %v1806_v2 = vmul.f32 %v1805_v35, %v6141_v20 }
 0x1a5   : > { %v1603_v50 = vadd.f32 %v1601_v45, %v1579_v43 }
 0x1a6   : > { %v1060_v53 = vadd.f32 %v1059_v48, %v1039_v46 }
 0x1a7   : > { %v1624_v54 = vadd.f32 %v1623_v52, %v1603_v50  ;;  %v1074_v55 = vpop.permute.xlu1 %1073 }
 0x1a8   : > { %v1638_v56 = vpop.permute.xlu0 %1637  ;;  %v1076_v58 = vadd.f32 %v1074_v55, %v1060_v53 }
 0x1a9   : > { %v1640_v61 = vadd.f32 %v1638_v56, %v1624_v54 }
 0x1ab   : > { %v1098_v62 = vpop.permute.xlu1 %1097 }
 0x1ac   : > { %v1662_v63 = vpop.permute.xlu0 %1661  ;;  %v1100_v1 = vadd.f32 %v1098_v62, %v1076_v58  ;;  %v5684_v58 = vmov 0.0   ;;  %v1337_v62 = vstv %s4992_s23  ;;  %s5064_s23 = sld [smem:[#allocation10 + $0x34]] }
 0x1ad   : > { %v1664_v5 = vadd.f32 %v1662_v63, %v1640_v61  ;;  %5182 = vmatprep.subr.mxu0 %v5684_v58  ;;  %5189 = vmatprep.subr.mxu1 %v5684_v58 }
 0x1ae   : > { %v1121_v11 = vadd.f32 %v1120_v4, %v1100_v1  ;;  %5186 = vmatprep.mubr.msk.f32.mxu0 %vm5685_vm4, %v5684_v58  ;;  %v774_v1 = vmul.f32 %v1337_v62, %v5993_v3  ;;  %5193 = vmatprep.mubr.msk.f32.mxu1 %vm5685_vm4, %v5684_v58  ;;  %v1338_v4 = vmul.f32 %v1337_v62, %v5998_v6 }
 0x1af   : > { %v1685_v10 = vadd.f32 %v1684_v9, %v1664_v5  ;;  %v1135_v13 = vpop.permute.xlu1 %1134  ;;  %v1361_v5 = vstv %s4995_s20  ;;  %s5067_s20 = sld [smem:[#allocation10 + $0x35]] }
 0x1b0   : > { %v1699_v15 = vpop.permute.xlu0 %1698  ;;  %v1137_v21 = vadd.f32 %v1135_v13, %v1121_v11  ;;  %v798_v9 = vmul.f32 %v1361_v5, %v5993_v3  ;;  %v1362_v11 = vmul.f32 %v1361_v5, %v5998_v6 }
 0x1b1   : > { %v1701_v22 = vadd.f32 %v1699_v15, %v1685_v10  ;;  %v1398_v10 = vstv %s5001_s27  ;;  %s5002_s27 = sld [smem:[#allocation10 + $0x3a]] }
 0x1b2   : > { %v835_v13 = vmul.f32 %v1398_v10, %v6014_v25  ;;  %v1399_v15 = vmul.f32 %v1398_v10, %v6019_v27 }
 0x1b3   : > { %v1159_v23 = vpop.permute.xlu1 %1158 }
 0x1b4   : > { %v1723_v24 = vpop.permute.xlu0 %1722  ;;  %v1161_v26 = vadd.f32 %v1159_v23, %v1137_v21  ;;  %v859_v21 = vmul.f32 %v1422_v17, %v6014_v25  ;;  %v1459_v23 = vstv %s5010_s12  ;;  %s4987_s12 = sld [smem:[#allocation10 + $0x1b]] }
 0x1b5   : > { %v1725_v29 = vadd.f32 %v1723_v24, %v1701_v22  ;;  %v1423_v22 = vmul.f32 %v1422_v17, %v6019_v27  ;;  %v896_v24 = vmul.f32 %v1459_v23, %v6038_v47 }
 0x1b6   : > { %v1182_v31 = vadd.f32 %v1181_v28, %v1161_v26  ;;  %v1460_v26 = vmul.f32 %v1459_v23, %v6043_v49  ;;  %v1483_v28 = vstv %s5013_s13  ;;  %s4988_s13 = sld [smem:[#allocation11 + $0x1]] }
 0x1b7   : > { %v1746_v32 = vadd.f32 %v1745_v30, %v1725_v29  ;;  %v1196_v16 = vpop.permute.xlu1 %1195  ;;  %v920_v29 = vmul.f32 %v1483_v28, %v6038_v47  ;;  %v1484_v30 = vmul.f32 %v1483_v28, %v6043_v49 }
 0x1b8   : > { %v1760_v18 = vpop.permute.xlu0 %1759  ;;  %v1198_v36 = vadd.f32 %v1196_v16, %v1182_v31  ;;  %v1520_v31 = vstv %s5019_s29  ;;  %s6264_s29 = sld [smem:[#allocation10 + $0x1e]] }
 0x1b9   : > { %v1762_v37 = vadd.f32 %v1760_v18, %v1746_v32  ;;  %v957_v32 = vmul.f32 %v1520_v31, %v6067_v12  ;;  %v1521_v16 = vmul.f32 %v1520_v31, %v6070_v14  ;;  %v1544_v18 = vstv %s5022_s10  ;;  %s6280_s10 = sld [smem:[#allocation10 + $0x21]] }
 0x1ba   : > { %v981_v35 = vmul.f32 %v1544_v18, %v6067_v12 }
 0x1bb   : > { %v1220_v38 = vpop.permute.xlu1 %1219 }
 0x1bc   : > { %v1784_v39 = vpop.permute.xlu0 %1783  ;;  %v1222_v40 = vadd.f32 %v1220_v38, %v1198_v36  ;;  %v1545_v36 = vmul.f32 %v1544_v18, %v6070_v14 }
 0x1bd   : > { %v1786_v42 = vadd.f32 %v1784_v39, %v1762_v37  ;;  %v1581_v37 = vstv %s5028_s24  ;;  %s6299_s24 = sld [smem:[#allocation10 + $0x24]] }
 0x1be   : > { %v1243_v43 = vadd.f32 %v1242_v41, %v1222_v40  ;;  %v1018_v38 = vmul.f32 %v1581_v37, %v6084_v33  ;;  %v1582_v39 = vmul.f32 %v1581_v37, %v6089_v34  ;;  %v1605_v40 = vstv %s5031_s30  ;;  %s5023_s30 = sld [smem:[#allocation10 + $0x41]] }
 0x1bf   : > { %v1807_v44 = vadd.f32 %v1806_v2, %v1786_v42  ;;  %v1257_v45 = vpop.permute.xlu1 %1256  ;;  %v1042_v41 = vmul.f32 %v1605_v40, %v6084_v33  ;;  %v1606_v42 = vmul.f32 %v1605_v40, %v6089_v34  ;;  %v1642_v2 = vstv %s5037_s16  ;;  %s5029_s16 = sld [smem:[#allocation10 + $0x43]] }
 0x1c0   : > { %v1821_v46 = vpop.permute.xlu0 %1820  ;;  %v1259_v48 = vadd.f32 %v1257_v45, %v1243_v43  ;;  %v1079_v43 = vmul.f32 %v1642_v2, %v6100_v0  ;;  %v1666_v45 = vstv %s5040_s17  ;;  %s6316_s17 = sld [smem:[#allocation10 + $0x27]] }
 0x1c1   : > { %v1823_v50 = vadd.f32 %v1821_v46, %v1807_v44  ;;  %v1643_v44 = vmul.f32 %v1642_v2, %v6103_v51  ;;  %v1103_v46 = vmul.f32 %v1666_v45, %v6100_v0 }
 0x1c3   : > { %v1281_v52 = vpop.permute.xlu1 %1280 }
 0x1c4   : > { %v1845_v53 = vpop.permute.xlu0 %1844  ;;  %v1283_v54 = vadd.f32 %v1281_v52, %v1259_v48  ;;  %v1667_v48 = vmul.f32 %v1666_v45, %v6103_v51 }
 0x1c5   : > { %v1847_v55 = vadd.f32 %v1845_v53, %v1823_v50  ;;  %v1703_v50 = vstv %s5046_s18  ;;  %s5034_s18 = sld [smem:[#allocation10 + $0x2a]] }
 0x1c6   : > { %v1300_v56 = vmax.f32 %v1283_v54, 0.0  ;;  %v1140_v52 = vmul.f32 %v1703_v50, %v6116_v59  ;;  %v1704_v53 = vmul.f32 %v1703_v50, %v6118_v60  ;;  %v1727_v54 = vstv %s5049_s19  ;;  %s5043_s19 = sld [smem:[#allocation10 + $0x2d]] }
 0x1c7   : > { %v1864_v57 = vmax.f32 %v1847_v55, 0.0  ;;  %v1164_v55 = vmul.f32 %v1727_v54, %v6116_v59 }
 0x1c8   : > { %1302 = vst.msk [vmem:[#allocation3] sm:$0xff] %vm1301_vm2, %v1300_v56  ;;  %v1728_v56 = vmul.f32 %v1727_v54, %v6118_v60 }
 0x1c9   : > { %1866 = vst.msk [vmem:[#allocation3 + $0x8] sm:$0xf] %vm1865_vm3, %v1864_v57  ;;  %v1764_v57 = vstv %s5055_s21  ;;  %s5052_s21 = sld [smem:[#allocation10 + $0x30]] }
 0x1ca   : > { %v1201_v62 = vmul.f32 %v1764_v57, %v6126_v7 }
 0x1cf   : > { %v6174_v61 = vld [vmem:[#allocation3] sm:$0xff] }
 0x1d0   : > { %v6176_v63 = vld [vmem:[#allocation3 + $0x8] sm:$0xf]  ;;  %1878 = vrot.lane.b32.xlu1 %v6174_v61, %s5683_s9 }
 0x1d1   : > { %1880 = vrot.lane.b32.xlu0 %v6176_v63, %s5683_s9 }
 0x1d4   : > { %776 = vrot.lane.b32.xlu1 %v774_v1, %s5683_s9  ;;  %v1765_v1 = vmul.f32 %v1764_v57, %v6129_v8 }
 0x1d5   : > { %1340 = vrot.lane.b32.xlu0 %v1338_v4, %s5683_s9  ;;  %v1788_v4 = vstv %s5058_s22  ;;  %s5061_s22 = sld [smem:[#allocation10 + $0x33]] }
 0x1d6   : > { %v1225_v5 = vmul.f32 %v1788_v4, %v6126_v7 }
 0x1d8   : > { %800 = vrot.lane.b32.xlu1 %v798_v9, %s5682_s8  ;;  %v1789_v9 = vmul.f32 %v1788_v4, %v6129_v8 }
 0x1d9   : > { %1364 = vrot.lane.b32.xlu0 %v1362_v11, %s5682_s8  ;;  %v1825_v11 = vstv %s5064_s23  ;;  %s4993_s23 = sld [smem:[#allocation10 + $0x37]] }
 0x1da   : > { %v1262_v10 = vmul.f32 %v1825_v11, %v6138_v19 }
 0x1dc   : > { %837 = vrot.lane.b32.xlu1 %v835_v13, %s5683_s9  ;;  %v1826_v13 = vmul.f32 %v1825_v11, %v6141_v20 }
 0x1dd   : > { %1401 = vrot.lane.b32.xlu0 %v1399_v15, %s5683_s9  ;;  %v1849_v15 = vstv %s5067_s20  ;;  %s4996_s20 = sld [smem:[#allocation10 + $0x38]] }
 0x1de   : > { %v1286_v17 = vmul.f32 %v1849_v15, %v6138_v19 }
 0x1e0   : > { %861 = vrot.lane.b32.xlu1 %v859_v21, %s5682_s8  ;;  %v1850_v21 = vmul.f32 %v1849_v15, %v6141_v20 }
 0x1e1   : > { %1425 = vrot.lane.b32.xlu0 %v1423_v22, %s5682_s8  ;;  %v1871_v22 = vld [vmem:[%s6797_s1] sm:$0x3f] }
 0x1e2   : > { %v1898_v23 = vsel %vm1896_vm5, %v1871_v22, 0 }
 0x1e4   : > { %898 = vrot.lane.b32.xlu1 %v896_v24, %s5683_s9  ;;  %v6262_v24 = vand.u32 4294901760, %v1898_v23 }
 0x1e5   : > { %1462 = vrot.lane.b32.xlu0 %v1460_v26, %s5683_s9  ;;  %v1317_v26 = vstv %s4987_s12  ;;  %s5011_s12 = sld [smem:[#allocation10 + $0x3d]] }
 0x1e6   : > { %v6267_v28 = vsub.f32 %v1898_v23, %v6262_v24  ;;  %v1318_v18 = vmul.f32 %v1317_v26, %v5998_v6 }
 0x1e8   : > { %922 = vrot.lane.b32.xlu1 %v920_v29, %s5682_s8 }
 0x1e9   : > { %1486 = vrot.lane.b32.xlu0 %v1484_v30, %s5682_s8 }
 0x1ec   : > { %959 = vrot.lane.b32.xlu1 %v957_v32, %s5683_s9  ;;  %v754_v32 = vmul.f32 %v1317_v26, %v5993_v3 }
 0x1ed   : > { %1523 = vrot.lane.b32.xlu0 %v1521_v16, %s5683_s9 }
 0x1f0   : > { %983 = vrot.lane.b32.xlu1 %v981_v35, %s5682_s8  ;;  %v1320_v35 = vstv %s4988_s13  ;;  %s5014_s13 = sld [smem:[#allocation10 + $0x3e]] }
 0x1f1   : > { %1547 = vrot.lane.b32.xlu0 %v1545_v36, %s5682_s8  ;;  %v6274_v36 = vand.u32 4294901760, %v6267_v28  ;;  %v1321_v3 = vadd.f32 %v1320_v35, %v1318_v18 }
 0x1f4   : > { %1020 = vrot.lane.b32.xlu1 %v1018_v38, %s5683_s9 }
 0x1f5   : > { %1584 = vrot.lane.b32.xlu0 %v1582_v39, %s5683_s9 }
 0x1f8   : > { %1044 = vrot.lane.b32.xlu1 %v1042_v41, %s5682_s8  ;;  %v757_v41 = vadd.f32 %v1320_v35, %v754_v32 }
 0x1f9   : > { %1608 = vrot.lane.b32.xlu0 %v1606_v42, %s5682_s8  ;;  %v1382_v42 = vstv %s6264_s29  ;;  %s6397_s29 = sld [smem:[#allocation10 + $0x40]] }
 0x1fa   : > { %v819_v54 = vmul.f32 %v1382_v42, %v6014_v25 }
 0x1fc   : > { %1081 = vrot.lane.b32.xlu1 %v1079_v43, %s5683_s9 }
 0x1fd   : > { %1645 = vrot.lane.b32.xlu0 %v1643_v44, %s5683_s9 }
 0x200   : > { %1105 = vrot.lane.b32.xlu1 %v1103_v46, %s5682_s8 }
 0x201   : > { %1669 = vrot.lane.b32.xlu0 %v1667_v48, %s5682_s8 }
 0x204   : > { %1142 = vrot.lane.b32.xlu1 %v1140_v52, %s5683_s9 }
 0x205   : > { %1706 = vrot.lane.b32.xlu0 %v1704_v53, %s5683_s9 }
 0x208   : > { %1166 = vrot.lane.b32.xlu1 %v1164_v55, %s5682_s8 }
 0x209   : > { %1730 = vrot.lane.b32.xlu0 %v1728_v56, %s5682_s8  ;;  %v1383_v56 = vmul.f32 %v1382_v42, %v6019_v27  ;;  %v1443_v27 = vstv %s6280_s10  ;;  %s6517_s10 = sld [smem:[#allocation10 + $0x3c]] }
 0x20a   : > { %v1444_v32 = vmul.f32 %v1443_v27, %v6043_v49  ;;  %v1504_v49 = vstv %s6299_s24  ;;  %s6531_s24 = sld [smem:[#allocation10 + $0x42]] }
 0x20c   : > { %1203 = vrot.lane.b32.xlu1 %v1201_v62, %s5683_s9 }
 0x20d   : > { %1767 = vrot.lane.b32.xlu0 %v1765_v1, %s5683_s9 }
 0x210   : > { %1227 = vrot.lane.b32.xlu1 %v1225_v5, %s5682_s8 }
 0x211   : > { %1791 = vrot.lane.b32.xlu0 %v1789_v9, %s5682_s8 }
 0x214   : > { %1264 = vrot.lane.b32.xlu1 %v1262_v10, %s5683_s9 }
 0x215   : > { %1828 = vrot.lane.b32.xlu0 %v1826_v13, %s5683_s9 }
 0x218   : > { %1288 = vrot.lane.b32.xlu1 %v1286_v17, %s5682_s8 }
 0x219   : > { %1852 = vrot.lane.b32.xlu0 %v1850_v21, %s5682_s8 }
 0x242   : > { %v1879_v29 = vpop.permute.xlu1 %1878 }
 0x243   : > { %v1881_v30 = vpop.permute.xlu0 %1880  ;;  %v1884_v31 = vmax.f32 %v6174_v61, %v1879_v29 }
 0x244   : > { %v1885_v16 = vmax.f32 %v6176_v63, %v1881_v30  ;;  %v1974_v63 = vsub.f32 %v6267_v28, %v6274_v36  ;;  %v880_v30 = vmul.f32 %v1443_v27, %v6038_v47  ;;  %v1873_v47 = vld [vmem:[%s6798_s2 + $0x8] sm:$0x7] }
 0x245   : > { %v1889_v37 = vrot.slane %v1884_v31, 1 }
 0x246   : > { %v1890_v38 = vrot.slane %v1885_v16, 1  ;;  %v777_v39 = vpop.permute.xlu1 %776  ;;  %v6289_v57 = vand.u32 4294901760, %v1974_v63 }
 0x247   : > { %v1341_v40 = vpop.permute.xlu0 %1340  ;;  %v779_v43 = vadd.f32 %v777_v39, %v757_v41 }
 0x248   : > { %v1895_v2 = vmax.f32 %v1885_v16, %v1890_v38  ;;  %v1891_v61 = vsel %vm1888_vm6, %v1889_v37, %v1890_v38  ;;  %v1343_v45 = vadd.f32 %v1341_v40, %v1321_v3  ;;  %v6322_v40 = vsel %vm1900_vm7, %v1873_v47, 0 }
 0x249   : > { %v1894_v6 = vmax.f32 %v1884_v31, %v1891_v61  ;;  %v941_v3 = vmul.f32 %v1504_v49, %v6067_v12 }
 0x24a   : > { %v1902_v44 = vsel %vm1900_vm7, %v1895_v2, 0  ;;  %v801_v46 = vpop.permute.xlu1 %800 }
 0x24b   : > { %v6283_v48 = vand.u32 4294901760, %v1902_v44  ;;  %v6285_v50 = vand.u32 4294901760, %v1894_v6  ;;  %v1365_v52 = vpop.permute.xlu0 %1364  ;;  %v803_v53 = vadd.f32 %v801_v46, %v779_v43  ;;  %v6334_v43 = vand.u32 4294901760, %v6322_v40 }
 0x24c   : > { %v1367_v55 = vadd.f32 %v1365_v52, %v1343_v45 }
 0x24d   : > { %v2011_v62 = vsub.f32 %v1902_v44, %v6283_v48  ;;  %v2018_v1 = vsub.f32 %v1894_v6, %v6285_v50  ;;  %5183 = vmatpush3.msra.mxu0 %v6283_v48  ;;  %v820_v4 = vadd.f32 %v819_v54, %v803_v53  ;;  %v1505_v6 = vmul.f32 %v1504_v49, %v6070_v14 }
 0x24e   : > { %5184 = vmatprep.subr.mxu0 %v5684_v58  ;;  %v1384_v5 = vadd.f32 %v1383_v56, %v1367_v55  ;;  %v838_v9 = vpop.permute.xlu1 %837  ;;  %v1565_v14 = vstv %s6316_s17  ;;  %s5032_s17 = sld [smem:[#allocation10 + $0x44]] }
 0x24f   : > { %v1402_v11 = vpop.permute.xlu0 %1401  ;;  %5185 = vmatpush3.msra.mxu0 %v6285_v50  ;;  %v2012_v25 = vand.u32 4294901760, %v2011_v62  ;;  %v2019_v10 = vand.u32 4294901760, %v2018_v1  ;;  %v840_v13 = vadd.f32 %v838_v9, %v820_v4  ;;  %v1002_v55 = vmul.f32 %v1565_v14, %v6084_v33 }
 0x250   : > { %5196 = vmatprep.subr.mxu0 %v5684_v58  ;;  %5187 = vmatmul.mubr.f32.vlgmr.msra.gmra.mxu0 %v6289_v57  ;;  %v1404_v21 = vadd.f32 %v1402_v11, %v1384_v5  ;;  %v1626_v11 = vstv %s5034_s18  ;;  %s5038_s18 = sld [smem:[#allocation10 + $0x46]] }
 0x251   : > { %5197 = vmatpush3.msra.mxu0 %v2011_v62  ;;  %5200 = vmatprep.mubr.msk.f32.mxu0 %vm5685_vm4, %v5684_v58  ;;  %v2013_v15 = vsub.f32 %v2011_v62, %v2012_v25  ;;  %v2020_v17 = vsub.f32 %v2018_v1, %v2019_v10  ;;  %v1566_v62 = vmul.f32 %v1565_v14, %v6089_v34 }
 0x252   : > { %5198 = vmatprep.subr.mxu0 %v5684_v58  ;;  %v862_v22 = vpop.permute.xlu1 %861 }
 0x253   : > { %v1426_v23 = vpop.permute.xlu0 %1425  ;;  %5199 = vmatpush3.msra.mxu0 %v2018_v1  ;;  %v864_v26 = vadd.f32 %v862_v22, %v840_v13  ;;  %v2014_v29 = vand.u32 4294901760, %v2013_v15  ;;  %v2021_v16 = vand.u32 4294901760, %v2020_v17  ;;  %v1063_v17 = vmul.f32 %v1626_v11, %v6100_v0 }
 0x254   : > { %v1428_v31 = vadd.f32 %v1426_v23, %v1404_v21  ;;  %5210 = vmatprep.subr.mxu0 %v5684_v58  ;;  %5201 = vmatmul.mubr.f32.vlgmr.msra.gmra.mxu0 %v6267_v28  ;;  %v1627_v22 = vmul.f32 %v1626_v11, %v6103_v51 }
 0x255   : > { %5190 = vmatpush3.msra.mxu1 %v2014_v29  ;;  %5211 = vmatpush3.msra.mxu0 %v2012_v25  ;;  %v881_v18 = vadd.f32 %v880_v30, %v864_v26  ;;  %v1687_v29 = vstv %s5043_s19  ;;  %s5041_s19 = sld [smem:[#allocation10 + $0x47]] }
 0x256   : > { %5191 = vmatprep.subr.mxu1 %v5684_v58  ;;  %5212 = vmatprep.subr.mxu0 %v5684_v58  ;;  %v1445_v35 = vadd.f32 %v1444_v32, %v1428_v31  ;;  %v899_v37 = vpop.permute.xlu1 %898  ;;  %v1688_v47 = vmul.f32 %v1687_v29, %v6118_v60 }
 0x257   : > { %v1463_v38 = vpop.permute.xlu0 %1462  ;;  %5192 = vmatpush3.msra.mxu1 %v2021_v16  ;;  %5213 = vmatpush3.msra.mxu0 %v2019_v10  ;;  %v901_v39 = vadd.f32 %v899_v37, %v881_v18 }
 0x258   : > { %5194 = vmatmul.mubr.f32.vlgmr.msra.gmra.mxu1 %v6262_v24  ;;  %5203 = vmatprep.subr.mxu1 %v5684_v58  ;;  %v1465_v41 = vadd.f32 %v1463_v38, %v1445_v35  ;;  %v1124_v35 = vmul.f32 %v1687_v29, %v6116_v59  ;;  %v1406_v29 = vstv %s5002_s27  ;;  %s5065_s27 = sld [smem:[#allocation10 + $0x4f]] }
 0x259   : > { %5204 = vmatpush3.msra.mxu1 %v6283_v48  ;;  %5207 = vmatprep.mubr.msk.f32.mxu1 %vm5685_vm4, %v5684_v58 }
 0x25a   : > { %5205 = vmatprep.subr.mxu1 %v5684_v58  ;;  %v923_v42 = vpop.permute.xlu1 %922  ;;  %5214 = vmatprep.mubr.msk.f32.mxu0 %vm5685_vm4, %v5684_v58 }
 0x25b   : > { %v1487_v2 = vpop.permute.xlu0 %1486  ;;  %5206 = vmatpush3.msra.mxu1 %v6285_v50  ;;  %v925_v61 = vadd.f32 %v923_v42, %v901_v39  ;;  %5215 = vmatmul.mubr.f32.vlgmr.msra.gmra.mxu0 %v6262_v24  ;;  %v1748_v39 = vstv %s5052_s21  ;;  %s5047_s21 = sld [smem:[#allocation10 + $0x49]] }
 0x25c   : > { %v1489_v63 = vadd.f32 %v1487_v2, %v1465_v41  ;;  %5208 = vmatmul.mubr.f32.vlgmr.msra.gmra.mxu1 %v6274_v36  ;;  %5217 = vmatprep.subr.mxu1 %v5684_v58 }
 0x25d   : > { %5218 = vmatpush3.msra.mxu1 %v6283_v48  ;;  %5221 = vmatprep.mubr.msk.f32.mxu1 %vm5685_vm4, %v5684_v58  ;;  %v942_v44 = vadd.f32 %v941_v3, %v925_v61 }
 0x25e   : > { %5219 = vmatprep.subr.mxu1 %v5684_v58  ;;  %v1506_v12 = vadd.f32 %v1505_v6, %v1489_v63  ;;  %v960_v45 = vpop.permute.xlu1 %959  ;;  %5224 = vmatprep.subr.mxu0 %v5684_v58  ;;  %v1185_v63 = vmul.f32 %v1748_v39, %v6126_v7 }
 0x25f   : > { %v1524_v46 = vpop.permute.xlu0 %1523  ;;  %5220 = vmatpush3.msra.mxu1 %v6285_v50  ;;  %5225 = vmatpush3.msra.mxu0 %v6334_v43  ;;  %v962_v48 = vadd.f32 %v960_v45, %v942_v44  ;;  %v1749_v44 = vmul.f32 %v1748_v39, %v6129_v8  ;;  %v6411_v39 = vld [vmem:[#allocation2 + $0x2] sm:$0xff] }
 0x260   : > { %5222 = vmatmul.mubr.f32.vlgmr.msra.gmra.mxu1 %v6262_v24  ;;  %5231 = vmatprep.subr.mxu1 %v5684_v58  ;;  %v1526_v52 = vadd.f32 %v1524_v46, %v1506_v12  ;;  %v1809_v46 = vstv %s5061_s22  ;;  %s5050_s22 = sld [smem:[#allocation10 + $0x4a]] }
 0x261   : > { %5235 = vmatprep.mubr.msk.f32.mxu1 %vm5685_vm4, %v5684_v58  ;;  %5226 = vmatprep.subr.mxu0 %v5684_v58 }
 0x262   : > { %v984_v53 = vpop.permute.xlu1 %983  ;;  %5228 = vmatprep.mubr.msk.f32.mxu0 %vm5685_vm4, %v5684_v58 }
 0x263   : > { %v1548_v50 = vpop.permute.xlu0 %1547  ;;  %v986_v54 = vadd.f32 %v984_v53, %v962_v48 }
 0x264   : > { %v1550_v56 = vadd.f32 %v1548_v50, %v1526_v52 }
 0x265   : > { %v1003_v1 = vadd.f32 %v1002_v55, %v986_v54  ;;  %v1246_v54 = vmul.f32 %v1809_v46, %v6138_v19 }
 0x266   : > { %v1567_v4 = vadd.f32 %v1566_v62, %v1550_v56  ;;  %v1021_v5 = vpop.permute.xlu1 %1020  ;;  %v1810_v56 = vmul.f32 %v1809_v46, %v6141_v20  ;;  %v1345_v20 = vstv %s4993_s23  ;;  %v6440_v46 = vld [vmem:[#allocation2 + $0x10] sm:$0xff]  ;;  %s5056_s23 = sld [smem:[#allocation10 + $0x4c]] }
 0x267   : > { %v1585_v9 = vpop.permute.xlu0 %1584  ;;  %v1023_v25 = vadd.f32 %v1021_v5, %v1003_v1 }
 0x268   : > { %v1587_v10 = vadd.f32 %v1585_v9, %v1567_v4 }
 0x26a   : > { %v1045_v27 = vpop.permute.xlu1 %1044 }
 0x26b   : > { %v1609_v13 = vpop.permute.xlu0 %1608  ;;  %v1047_v15 = vadd.f32 %v1045_v27, %v1023_v25 }
 0x26c   : > { %v1611_v21 = vadd.f32 %v1609_v13, %v1587_v10 }
 0x26d   : > { %v1064_v33 = vadd.f32 %v1063_v17, %v1047_v15  ;;  %v6371_v17 = vld [vmem:[#allocation2] sm:$0xff] }
 0x26e   : > { %v1628_v23 = vadd.f32 %v1627_v22, %v1611_v21  ;;  %v1082_v26 = vpop.permute.xlu1 %1081  ;;  %v782_v21 = vmul.f32 %v6371_v17, %v1345_v20  ;;  %v6374_v22 = vld [vmem:[#allocation2 + $0x8] sm:$0xf] }
 0x26f   : > { %v1646_v34 = vpop.permute.xlu0 %1645  ;;  %v1084_v30 = vadd.f32 %v1082_v26, %v1064_v33  ;;  %v1346_v33 = vmul.f32 %v6374_v22, %v1345_v20 }
 0x270   : > { %v1648_v31 = vadd.f32 %v1646_v34, %v1628_v23  ;;  %v1369_v23 = vstv %s4996_s20  ;;  %s5059_s20 = sld [smem:[#allocation10 + $0x4d]] }
 0x271   : > { %v806_v26 = vmul.f32 %v6371_v17, %v1369_v23  ;;  %v1370_v34 = vmul.f32 %v6374_v22, %v1369_v23  ;;  %v6478_v23 = vld [vmem:[#allocation2 + $0x20] sm:$0xff] }
 0x272   : > { %v1106_v32 = vpop.permute.xlu1 %1105 }
 0x273   : > { %v1670_v16 = vpop.permute.xlu0 %1669  ;;  %v1108_v18 = vadd.f32 %v1106_v32, %v1084_v30  ;;  %v6383_v30 = vld [vmem:[#allocation2 + $0x1] sm:$0xff]  ;;  %v6388_v32 = vsub.f32 %v6322_v40, %v6334_v43 }
 0x274   : > { %v1672_v37 = vadd.f32 %v1670_v16, %v1648_v31  ;;  %v843_v31 = vmul.f32 %v6383_v30, %v1406_v29  ;;  %v6390_v16 = vld [vmem:[#allocation2 + $0x9] sm:$0xf] }
 0x275   : > { %v1125_v0 = vadd.f32 %v1124_v35, %v1108_v18  ;;  %v1407_v18 = vmul.f32 %v6390_v16, %v1406_v29  ;;  %v1430_v35 = vstv %s5005_s11  ;;  %v6400_v40 = vand.u32 4294901760, %v6388_v32  ;;  %s5068_s11 = sld [smem:[#allocation10 + $0x50]] }
 0x276   : > { %v1689_v38 = vadd.f32 %v1688_v47, %v1672_v37  ;;  %v1143_v49 = vpop.permute.xlu1 %1142  ;;  %v867_v37 = vmul.f32 %v6383_v30, %v1430_v35  ;;  %v1431_v47 = vmul.f32 %v6390_v16, %v1430_v35 }
 0x277   : > { %v1707_v51 = vpop.permute.xlu0 %1706  ;;  %v1145_v41 = vadd.f32 %v1143_v49, %v1125_v0  ;;  %v1467_v0 = vstv %s5011_s12  ;;  %s4989_s12 = sld [smem:[#allocation10 + $0x36]] }
 0x278   : > { %v1709_v42 = vadd.f32 %v1707_v51, %v1689_v38  ;;  %v1872_v38 = vld [vmem:[%s6798_s2] sm:$0xff]  ;;  %v2478_v51 = vsub.f32 %v6388_v32, %v6400_v40 }
 0x279   : > { %v6406_v49 = vand.u32 4294901760, %v1872_v38 }
 0x27a   : > { %v1167_v2 = vpop.permute.xlu1 %1166 }
 0x27b   : > { %v1731_v61 = vpop.permute.xlu0 %1730  ;;  %v1169_v3 = vadd.f32 %v1167_v2, %v1145_v41  ;;  %v904_v41 = vmul.f32 %v6411_v39, %v1467_v0  ;;  %5227 = vmatpush3.msra.mxu0 %v6406_v49  ;;  %v6418_v2 = vld [vmem:[#allocation2 + $0xa] sm:$0xf] }
 0x27c   : > { %v1733_v6 = vadd.f32 %v1731_v61, %v1709_v42  ;;  %v6415_v42 = vsub.f32 %v1872_v38, %v6406_v49  ;;  %v1468_v61 = vmul.f32 %v6418_v2, %v1467_v0  ;;  %5238 = vmatprep.subr.mxu0 %v5684_v58  ;;  %v6493_v38 = vld [vmem:[#allocation2 + $0x29] sm:$0xf] }
 0x27d   : > { %v1186_v59 = vadd.f32 %v1185_v63, %v1169_v3  ;;  %v1491_v3 = vstv %s5014_s13  ;;  %v6421_v63 = vand.u32 4294901760, %v2478_v51  ;;  %s4990_s13 = sld [smem:[#allocation11 + $0x2]] }
 0x27e   : > { %v1750_v12 = vadd.f32 %v1749_v44, %v1733_v6  ;;  %v1204_v45 = vpop.permute.xlu1 %1203  ;;  %v6426_v6 = vand.u32 4294901760, %v6415_v42  ;;  %v928_v44 = vmul.f32 %v6411_v39, %v1491_v3 }
 0x27f   : > { %v1768_v60 = vpop.permute.xlu0 %1767  ;;  %v1206_v14 = vadd.f32 %v1204_v45, %v1186_v59  ;;  %5232 = vmatpush3.msra.mxu1 %v6421_v63  ;;  %v1528_v45 = vstv %s6397_s29  ;;  %s4999_s29 = sld [smem:[#allocation10 + $0x39]] }
 0x280   : > { %v1770_v48 = vadd.f32 %v1768_v60, %v1750_v12  ;;  %5233 = vmatprep.subr.mxu1 %v5684_v58  ;;  %v2485_v59 = vsub.f32 %v6415_v42, %v6426_v6  ;;  %v1492_v12 = vmul.f32 %v6418_v2, %v1491_v3 }
 0x282   : > { %v1228_v52 = vpop.permute.xlu1 %1227  ;;  %v6437_v60 = vand.u32 4294901760, %v2485_v59  ;;  %v6502_v59 = vld [vmem:[#allocation2 + $0x22] sm:$0xff] }
 0x283   : > { %v1792_v53 = vpop.permute.xlu0 %1791  ;;  %v1230_v50 = vadd.f32 %v1228_v52, %v1206_v14  ;;  %v965_v14 = vmul.f32 %v6440_v46, %v1528_v45 }
 0x284   : > { %v1794_v55 = vadd.f32 %v1792_v53, %v1770_v48  ;;  %5234 = vmatpush3.msra.mxu1 %v6437_v60  ;;  %v6444_v48 = vld [vmem:[#allocation2 + $0x18] sm:$0xf]  ;;  %v1552_v53 = vstv %s5023_s30  ;;  %s6554_s30 = sld [smem:[#allocation10 + $0x45]] }
 0x285   : > { %v1247_v62 = vadd.f32 %v1246_v54, %v1230_v50  ;;  %v1529_v52 = vmul.f32 %v6444_v48, %v1528_v45  ;;  %5245 = vmatprep.subr.mxu1 %v5684_v58  ;;  %v989_v50 = vmul.f32 %v6440_v46, %v1552_v53  ;;  %v1553_v54 = vmul.f32 %v6444_v48, %v1552_v53  ;;  %v6505_v45 = vld [vmem:[#allocation2 + $0x2a] sm:$0xf] }
 0x286   : > { %v1811_v7 = vadd.f32 %v1810_v56, %v1794_v55  ;;  %v1265_v1 = vpop.permute.xlu1 %1264  ;;  %v1589_v55 = vstv %s5029_s16  ;;  %v6454_v56 = vld [vmem:[#allocation2 + $0x11] sm:$0xff]  ;;  %s6577_s16 = sld [smem:[#allocation10 + $0x48]] }
 0x287   : > { %v1829_v4 = vpop.permute.xlu0 %1828  ;;  %v1267_v8 = vadd.f32 %v1265_v1, %v1247_v62  ;;  %v1026_v62 = vmul.f32 %v6454_v56, %v1589_v55 }
 0x288   : > { %v1831_v5 = vadd.f32 %v1829_v4, %v1811_v7  ;;  %v6457_v7 = vld [vmem:[#allocation2 + $0x19] sm:$0xf]  ;;  %v1613_v4 = vstv %s5032_s17  ;;  %s6597_s17 = sld [smem:[#allocation10 + $0x4b]] }
 0x289   : > { %v1590_v1 = vmul.f32 %v6457_v7, %v1589_v55 }
 0x28a   : > { %v1289_v9 = vpop.permute.xlu1 %1288 }
 0x28b   : > { %v1853_v11 = vpop.permute.xlu0 %1852  ;;  %v1291_v25 = vadd.f32 %v1289_v9, %v1267_v8  ;;  %v1050_v8 = vmul.f32 %v6454_v56, %v1613_v4  ;;  %v1650_v9 = vstv %s5038_s18  ;;  %s6621_s18 = sld [smem:[#allocation10 + $0x4e]] }
 0x28c   : > { %v1855_v10 = vadd.f32 %v1853_v11, %v1831_v5  ;;  %v1614_v5 = vmul.f32 %v6457_v7, %v1613_v4  ;;  %v6466_v11 = vld [vmem:[#allocation2 + $0x12] sm:$0xff] }
 0x28d   : > { %v1303_v27 = vmax.f32 %v1291_v25, 0.0  ;;  %v1087_v25 = vmul.f32 %v6466_v11, %v1650_v9 }
 0x28e   : > { %v1867_v13 = vmax.f32 %v1855_v10, 0.0  ;;  %v6469_v10 = vld [vmem:[#allocation2 + $0x1a] sm:$0xf] }
 0x28f   : > { %1305 = vst.msk [vmem:[#allocation3 + $0x10] sm:$0xff] %vm1301_vm2, %v1303_v27  ;;  %v1651_v27 = vmul.f32 %v6469_v10, %v1650_v9 }
 0x290   : > { %1868 = vst.msk [vmem:[#allocation3 + $0x18] sm:$0xf] %vm1865_vm3, %v1867_v13  ;;  %v1674_v13 = vstv %s5041_s19 }
 0x291   : > { %v1111_v20 = vmul.f32 %v6466_v11, %v1674_v13 }
 0x296   : > { %v6363_v19 = vld [vmem:[#allocation3 + $0x10] sm:$0xff] }
 0x297   : > { %v6365_v15 = vld [vmem:[#allocation3 + $0x18] sm:$0xf]  ;;  %2834 = vrot.lane.b32.xlu1 %v6363_v19, %s5683_s9 }
 0x298   : > { %2836 = vrot.lane.b32.xlu0 %v6365_v15, %s5683_s9 }
 0x29b   : > { %784 = vrot.lane.b32.xlu1 %v782_v21, %s5683_s9  ;;  %v1675_v21 = vmul.f32 %v6469_v10, %v1674_v13 }
 0x29c   : > { %1348 = vrot.lane.b32.xlu0 %v1346_v33, %s5683_s9  ;;  %v1711_v33 = vstv %s5047_s21 }
 0x29f   : > { %808 = vrot.lane.b32.xlu1 %v806_v26, %s5682_s8  ;;  %v1148_v26 = vmul.f32 %v6478_v23, %v1711_v33 }
 0x2a0   : > { %1372 = vrot.lane.b32.xlu0 %v1370_v34, %s5682_s8  ;;  %v6481_v34 = vld [vmem:[#allocation2 + $0x28] sm:$0xf] }
 0x2a1   : > { %v1712_v29 = vmul.f32 %v6481_v34, %v1711_v33 }
 0x2a3   : > { %845 = vrot.lane.b32.xlu1 %v843_v31, %s5683_s9  ;;  %v1735_v31 = vstv %s5050_s22 }
 0x2a4   : > { %1409 = vrot.lane.b32.xlu0 %v1407_v18, %s5683_s9  ;;  %v1172_v18 = vmul.f32 %v6478_v23, %v1735_v31  ;;  %v1736_v35 = vmul.f32 %v6481_v34, %v1735_v31 }
 0x2a7   : > { %869 = vrot.lane.b32.xlu1 %v867_v37, %s5682_s8  ;;  %v1772_v37 = vstv %s5056_s23 }
 0x2a8   : > { %1433 = vrot.lane.b32.xlu0 %v1431_v47, %s5682_s8  ;;  %v6490_v47 = vld [vmem:[#allocation2 + $0x21] sm:$0xff]  ;;  %v1773_v51 = vmul.f32 %v6493_v38, %v1772_v37 }
 0x2a9   : > { %v1209_v0 = vmul.f32 %v6490_v47, %v1772_v37 }
 0x2ab   : > { %906 = vrot.lane.b32.xlu1 %v904_v41, %s5683_s9  ;;  %v1796_v41 = vstv %s5059_s20 }
 0x2ac   : > { %1470 = vrot.lane.b32.xlu0 %v1468_v61, %s5683_s9  ;;  %v1233_v61 = vmul.f32 %v6490_v47, %v1796_v41  ;;  %v1797_v3 = vmul.f32 %v6493_v38, %v1796_v41 }
 0x2af   : > { %930 = vrot.lane.b32.xlu1 %v928_v44, %s5682_s8  ;;  %v1833_v44 = vstv %s5065_s27 }
 0x2b0   : > { %1494 = vrot.lane.b32.xlu0 %v1492_v12, %s5682_s8  ;;  %v1270_v12 = vmul.f32 %v6502_v59, %v1833_v44 }
 0x2b3   : > { %967 = vrot.lane.b32.xlu1 %v965_v14, %s5683_s9  ;;  %v1834_v14 = vmul.f32 %v6505_v45, %v1833_v44 }
 0x2b4   : > { %1531 = vrot.lane.b32.xlu0 %v1529_v52, %s5683_s9  ;;  %v1857_v52 = vstv %s5068_s11 }
 0x2b5   : > { %v1294_v53 = vmul.f32 %v6502_v59, %v1857_v52 }
 0x2b7   : > { %991 = vrot.lane.b32.xlu1 %v989_v50, %s5682_s8  ;;  %v1858_v50 = vmul.f32 %v6505_v45, %v1857_v52  ;;  %v1447_v52 = vstv %s6517_s10 }
 0x2b8   : > { %1555 = vrot.lane.b32.xlu0 %v1553_v54, %s5682_s8  ;;  %v1323_v54 = vstv %s4989_s12 }
 0x2b9   : > { %v1324_v4 = vmul.f32 %v6374_v22, %v1323_v54 }
 0x2bb   : > { %1028 = vrot.lane.b32.xlu1 %v1026_v62, %s5683_s9 }
 0x2bc   : > { %1592 = vrot.lane.b32.xlu0 %v1590_v1, %s5683_s9  ;;  %v760_v1 = vmul.f32 %v6371_v17, %v1323_v54 }
 0x2bf   : > { %1052 = vrot.lane.b32.xlu1 %v1050_v8, %s5682_s8  ;;  %v1326_v8 = vstv %s4990_s13 }
 0x2c0   : > { %1616 = vrot.lane.b32.xlu0 %v1614_v5, %s5682_s8  ;;  %v1327_v13 = vadd.f32 %v1326_v8, %v1324_v4 }
 0x2c3   : > { %1089 = vrot.lane.b32.xlu1 %v1087_v25, %s5683_s9  ;;  %v763_v25 = vadd.f32 %v1326_v8, %v760_v1  ;;  %v884_v8 = vmul.f32 %v6411_v39, %v1447_v52 }
 0x2c4   : > { %1653 = vrot.lane.b32.xlu0 %v1651_v27, %s5683_s9 }
 0x2c7   : > { %1113 = vrot.lane.b32.xlu1 %v1111_v20, %s5682_s8  ;;  %v1386_v20 = vstv %s4999_s29 }
 0x2c8   : > { %1677 = vrot.lane.b32.xlu0 %v1675_v21, %s5682_s8  ;;  %v823_v22 = vmul.f32 %v6383_v30, %v1386_v20 }
 0x2cb   : > { %1150 = vrot.lane.b32.xlu1 %v1148_v26, %s5683_s9 }
 0x2cc   : > { %1714 = vrot.lane.b32.xlu0 %v1712_v29, %s5683_s9 }
 0x2cf   : > { %1174 = vrot.lane.b32.xlu1 %v1172_v18, %s5682_s8 }
 0x2d0   : > { %1738 = vrot.lane.b32.xlu0 %v1736_v35, %s5682_s8 }
 0x2d3   : > { %1211 = vrot.lane.b32.xlu1 %v1209_v0, %s5683_s9 }
 0x2d4   : > { %1775 = vrot.lane.b32.xlu0 %v1773_v51, %s5683_s9 }
 0x2d7   : > { %1235 = vrot.lane.b32.xlu1 %v1233_v61, %s5682_s8 }
 0x2d8   : > { %1799 = vrot.lane.b32.xlu0 %v1797_v3, %s5682_s8 }
 0x2db   : > { %1272 = vrot.lane.b32.xlu1 %v1270_v12, %s5683_s9 }
 0x2dc   : > { %1836 = vrot.lane.b32.xlu0 %v1834_v14, %s5683_s9 }
 0x2df   : > { %1296 = vrot.lane.b32.xlu1 %v1294_v53, %s5682_s8 }
 0x2e0   : > { %1860 = vrot.lane.b32.xlu0 %v1858_v50, %s5682_s8  ;;  %s6523_s8 = sld [smem:[#allocation10 + $0x3f]] }
 0x309   : > { %v2835_v55 = vpop.permute.xlu1 %2834 }
 0x30a   : > { %v2837_v62 = vpop.permute.xlu0 %2836  ;;  %v2840_v26 = vmax.f32 %v6363_v19, %v2835_v55 }
 0x30b   : > { %v2841_v27 = vmax.f32 %v6365_v15, %v2837_v62  ;;  %v1387_v15 = vmul.f32 %v6390_v16, %v1386_v20 }
 0x30c   : > { %v2844_v61 = vrot.slane %v2840_v26, 1 }
 0x30d   : > { %v785_v5 = vpop.permute.xlu1 %784  ;;  %v2845_v37 = vrot.slane %v2841_v27, 1 }
 0x30e   : > { %v1349_v9 = vpop.permute.xlu0 %1348  ;;  %v787_v21 = vadd.f32 %v785_v5, %v763_v25 }
 0x30f   : > { %v1351_v29 = vadd.f32 %v1349_v9, %v1327_v13  ;;  %v2850_v19 = vmax.f32 %v2841_v27, %v2845_v37  ;;  %v2846_v30 = vsel %vm1888_vm6, %v2844_v61, %v2845_v37  ;;  %v1448_v13 = vmul.f32 %v6418_v2, %v1447_v52 }
 0x310   : > { %v1977_v33 = vpop.f32.mrf.mxu0  ;;  %v2849_v20 = vmax.f32 %v2840_v26, %v2846_v30 }
 0x311   : > { %v809_v31 = vpop.permute.xlu1 %808  ;;  %v2852_v5 = vsel %vm1900_vm7, %v2850_v19, 0 }
 0x312   : > { %v1373_v17 = vpop.permute.xlu0 %1372  ;;  %v811_v18 = vadd.f32 %v809_v31, %v787_v21  ;;  %v5188_v35 = vpop.f32.mrf.mxu0 }
 0x313   : > { %v1375_v0 = vadd.f32 %v1373_v17, %v1351_v29 }
 0x314   : > { %v824_v51 = vadd.f32 %v823_v22, %v811_v18  ;;  %v2134_v41 = vpop.f32.mrf.mxu0  ;;  %v6529_v22 = vand.u32 4294901760, %v2852_v5 }
 0x315   : > { %v1388_v3 = vadd.f32 %v1387_v15, %v1375_v0  ;;  %v846_v44 = vpop.permute.xlu1 %845  ;;  %v1508_v0 = vstv %s6523_s8  ;;  %v6534_v15 = vand.u32 4294901760, %v2849_v20 }
 0x316   : > { %v1410_v12 = vpop.permute.xlu0 %1409  ;;  %v5202_v14 = vpop.f32.mrf.mxu0  ;;  %v848_v53 = vadd.f32 %v846_v44, %v824_v51  ;;  %v945_v19 = vmul.f32 %v6440_v46, %v1508_v0 }
 0x317   : > { %v1412_v54 = vadd.f32 %v1410_v12, %v1388_v3  ;;  %v6537_v3 = vsub.f32 %v2852_v5, %v6529_v22  ;;  %v6543_v30 = vsub.f32 %v2849_v20, %v6534_v15 }
 0x318   : > { %v2058_v50 = vpop.f32.mrf.mxu1 }
 0x319   : > { %v2059_v55 = vadd.f32 %v2058_v50, %v1977_v33  ;;  %v870_v62 = vpop.permute.xlu1 %869  ;;  %v1509_v50 = vmul.f32 %v6444_v48, %v1508_v0  ;;  %v2962_v46 = vand.u32 4294901760, %v6537_v3  ;;  %v2969_v48 = vand.u32 4294901760, %v6543_v30 }
 0x31a   : > { %v1434_v1 = vpop.permute.xlu0 %1433  ;;  %v5195_v16 = vpop.f32.mrf.mxu1  ;;  %v872_v4 = vadd.f32 %v870_v62, %v848_v53 }
 0x31b   : > { %v2135_v9 = vadd.f32 %v2134_v41, %v2059_v55  ;;  %v1436_v25 = vadd.f32 %v1434_v1, %v1412_v54  ;;  %v2286_v27 = vpop.f32.mrf.mxu0 }
 0x31c   : > { %v2209_v21 = vpop.f32.mrf.mxu1  ;;  %v885_v29 = vadd.f32 %v884_v8, %v872_v4  ;;  %v1569_v8 = vstv %s6531_s24 }
 0x31d   : > { %v2210_v31 = vadd.f32 %v2209_v21, %v2135_v9  ;;  %v1449_v17 = vadd.f32 %v1448_v13, %v1436_v25  ;;  %v907_v33 = vpop.permute.xlu1 %906  ;;  %v5216_v18 = vpop.f32.mrf.mxu0  ;;  %v1006_v13 = vmul.f32 %v6454_v56, %v1569_v8 }
 0x31e   : > { %v1471_v35 = vpop.permute.xlu0 %1470  ;;  %v5209_v37 = vpop.f32.mrf.mxu1  ;;  %v909_v51 = vadd.f32 %v907_v33, %v885_v29  ;;  %v1570_v33 = vmul.f32 %v6457_v7, %v1569_v8  ;;  %v1630_v7 = vstv %s6554_s30 }
 0x31f   : > { %v2287_v39 = vadd.f32 %v2286_v27, %v2210_v31  ;;  %v1473_v2 = vadd.f32 %v1471_v35, %v1449_v17  ;;  %v2963_v31 = vsub.f32 %v6537_v3, %v2962_v46  ;;  %v2970_v35 = vsub.f32 %v6543_v30, %v2969_v48 }
 0x320   : > { %v2359_v41 = vpop.f32.mrf.mxu1 }
 0x321   : > { %v2360_v26 = vadd.f32 %v2359_v41, %v2287_v39  ;;  %v931_v61 = vpop.permute.xlu1 %930 }
 0x322   : > { %v1495_v44 = vpop.permute.xlu0 %1494  ;;  %v5223_v12 = vpop.f32.mrf.mxu1  ;;  %v933_v14 = vadd.f32 %v931_v61, %v909_v51  ;;  %v2964_v51 = vand.u32 4294901760, %v2963_v31 }
 0x323   : > { %v2364_v52 = vsel %vm1896_vm5, %v2360_v26, 0  ;;  %v1497_v53 = vadd.f32 %v1495_v44, %v1473_v2  ;;  %v2971_v2 = vand.u32 4294901760, %v2970_v35 }
 0x324   : > { %v6545_v54 = vand.u32 4294901760, %v2364_v52  ;;  %v946_v55 = vadd.f32 %v945_v19, %v933_v14  ;;  %v1067_v14 = vmul.f32 %v6466_v11, %v1630_v7 }
 0x325   : > { %v1510_v62 = vadd.f32 %v1509_v50, %v1497_v53  ;;  %v968_v1 = vpop.permute.xlu1 %967 }
 0x326   : > { %v2437_v16 = vsub.f32 %v2364_v52, %v6545_v54  ;;  %v1532_v4 = vpop.permute.xlu0 %1531  ;;  %5236 = vmatmul.mubr.f32.vlgmr.msra.gmra.mxu1 %v6545_v54  ;;  %v970_v5 = vadd.f32 %v968_v1, %v946_v55  ;;  %v1631_v52 = vmul.f32 %v6469_v10, %v1630_v7  ;;  %v1691_v10 = vstv %s6577_s16 }
 0x327   : > { %5246 = vmatpush3.msra.mxu1 %v6334_v43  ;;  %5249 = vmatprep.mubr.msk.f32.mxu1 %vm5685_vm4, %v5684_v58  ;;  %v1534_v25 = vadd.f32 %v1532_v4, %v1510_v62 }
 0x328   : > { %5247 = vmatprep.subr.mxu1 %v5684_v58  ;;  %v2438_v9 = vand.u32 4294901760, %v2437_v16 }
 0x329   : > { %5248 = vmatpush3.msra.mxu1 %v6406_v49  ;;  %v992_v27 = vpop.permute.xlu1 %991 }
 0x32a   : > { %5259 = vmatprep.subr.mxu1 %v5684_v58  ;;  %v1556_v20 = vpop.permute.xlu0 %1555  ;;  %5250 = vmatmul.mubr.f32.vlgmr.msra.gmra.mxu1 %v2438_v9  ;;  %v994_v21 = vadd.f32 %v992_v27, %v970_v5  ;;  %v2439_v29 = vsub.f32 %v2437_v16, %v2438_v9  ;;  %v1128_v5 = vmul.f32 %v6478_v23, %v1691_v10 }
 0x32b   : > { %v1558_v17 = vadd.f32 %v1556_v20, %v1534_v25  ;;  %5260 = vmatpush3.msra.mxu1 %v6334_v43  ;;  %5263 = vmatprep.mubr.msk.f32.mxu1 %vm5685_vm4, %v5684_v58  ;;  %v1692_v25 = vmul.f32 %v6481_v34, %v1691_v10  ;;  %v1752_v34 = vstv %s6597_s17 }
 0x32c   : > { %5261 = vmatprep.subr.mxu1 %v5684_v58  ;;  %v2440_v56 = vand.u32 4294901760, %v2439_v29  ;;  %v1007_v18 = vadd.f32 %v1006_v13, %v994_v21  ;;  %v1189_v31 = vmul.f32 %v6490_v47, %v1752_v34 }
 0x32d   : > { %5262 = vmatpush3.msra.mxu1 %v6406_v49  ;;  %v1571_v37 = vadd.f32 %v1570_v33, %v1558_v17  ;;  %v1029_v39 = vpop.permute.xlu1 %1028  ;;  %v1753_v33 = vmul.f32 %v6493_v38, %v1752_v34  ;;  %v1813_v38 = vstv %s6621_s18 }
 0x32e   : > { %5273 = vmatprep.subr.mxu1 %v5684_v58  ;;  %v1593_v0 = vpop.permute.xlu0 %1592  ;;  %5229 = vmatmul.mubr.f32.vlgmr.msra.gmra.mxu0 %v2440_v56  ;;  %v1031_v41 = vadd.f32 %v1029_v39, %v1007_v18  ;;  %v1250_v39 = vmul.f32 %v6502_v59, %v1813_v38 }
 0x32f   : > { %5239 = vmatpush3.msra.mxu0 %v6388_v32  ;;  %5264 = vmatmul.mubr.f32.vlgmr.msra.gmra.mxu1 %v6545_v54  ;;  %v1595_v26 = vadd.f32 %v1593_v0, %v1571_v37 }
 0x330   : > { %5274 = vmatpush3.msra.mxu1 %v2964_v51  ;;  %5240 = vmatprep.subr.mxu0 %v5684_v58  ;;  %v1814_v51 = vmul.f32 %v6505_v45, %v1813_v38 }
 0x331   : > { %5275 = vmatprep.subr.mxu1 %v5684_v58  ;;  %5241 = vmatpush3.msra.mxu0 %v6415_v42  ;;  %v1053_v61 = vpop.permute.xlu1 %1052 }
 0x332   : > { %5276 = vmatpush3.msra.mxu1 %v2971_v2  ;;  %5242 = vmatprep.mubr.msk.f32.mxu0 %vm5685_vm4, %v5684_v58  ;;  %v1617_v44 = vpop.permute.xlu0 %1616  ;;  %v1055_v12 = vadd.f32 %v1053_v61, %v1031_v41 }
 0x333   : > { %5252 = vmatprep.subr.mxu0 %v5684_v58  ;;  %5277 = vmatprep.mubr.msk.f32.mxu1 %vm5685_vm4, %v5684_v58  ;;  %v1619_v19 = vadd.f32 %v1617_v44, %v1595_v26 }
 0x334   : > { %5287 = vmatprep.subr.mxu1 %v5684_v58  ;;  %5243 = vmatmul.mubr.f32.vlgmr.msra.gmra.mxu0 %v2437_v16  ;;  %v1068_v53 = vadd.f32 %v1067_v14, %v1055_v12 }
 0x335   : > { %5253 = vmatpush3.msra.mxu0 %v6400_v40  ;;  %5278 = vmatmul.mubr.f32.vlgmr.msra.gmra.mxu1 %v6262_v24  ;;  %v1632_v50 = vadd.f32 %v1631_v52, %v1619_v19  ;;  %v1090_v55 = vpop.permute.xlu1 %1089 }
 0x336   : > { %5288 = vmatpush3.msra.mxu1 %v6529_v22  ;;  %5254 = vmatprep.subr.mxu0 %v5684_v58  ;;  %v1654_v11 = vpop.permute.xlu0 %1653  ;;  %v1092_v62 = vadd.f32 %v1090_v55, %v1068_v53 }
 0x337   : > { %5289 = vmatprep.subr.mxu1 %v5684_v58  ;;  %5255 = vmatpush3.msra.mxu0 %v6426_v6  ;;  %v1656_v1 = vadd.f32 %v1654_v11, %v1632_v50 }
 0x338   : > { %5290 = vmatpush3.msra.mxu1 %v6534_v15  ;;  %5256 = vmatprep.mubr.msk.f32.mxu0 %vm5685_vm4, %v5684_v58 }
 0x339   : > { %5266 = vmatprep.subr.mxu0 %v5684_v58  ;;  %5291 = vmatprep.mubr.msk.f32.mxu1 %vm5685_vm4, %v5684_v58  ;;  %v1114_v16 = vpop.permute.xlu1 %1113 }
 0x33a   : > { %5301 = vmatprep.subr.mxu1 %v5684_v58  ;;  %5257 = vmatmul.mubr.f32.vlgmr.msra.gmra.mxu0 %v6545_v54  ;;  %v1678_v4 = vpop.permute.xlu0 %1677  ;;  %v1116_v8 = vadd.f32 %v1114_v16, %v1092_v62 }
 0x33b   : > { %5267 = vmatpush3.msra.mxu0 %v6529_v22  ;;  %5292 = vmatmul.mubr.f32.vlgmr.msra.gmra.mxu1 %v6274_v36  ;;  %v1680_v9 = vadd.f32 %v1678_v4, %v1656_v1 }
 0x33c   : > { %5302 = vmatpush3.msra.mxu1 %v6529_v22  ;;  %5268 = vmatprep.subr.mxu0 %v5684_v58  ;;  %v1129_v27 = vadd.f32 %v1128_v5, %v1116_v8 }
 0x33d   : > { %5303 = vmatprep.subr.mxu1 %v5684_v58  ;;  %5269 = vmatpush3.msra.mxu0 %v6534_v15  ;;  %v1693_v54 = vadd.f32 %v1692_v25, %v1680_v9  ;;  %v1151_v13 = vpop.permute.xlu1 %1150 }
 0x33e   : > { %5304 = vmatpush3.msra.mxu1 %v6534_v15  ;;  %5270 = vmatprep.mubr.msk.f32.mxu0 %vm5685_vm4, %v5684_v58  ;;  %v1715_v23 = vpop.permute.xlu0 %1714  ;;  %v1153_v22 = vadd.f32 %v1151_v13, %v1129_v27 }
 0x33f   : > { %5280 = vmatprep.subr.mxu0 %v5684_v58  ;;  %5271 = vmatmul.mubr.f32.vlgmr.msra.gmra.mxu0 %v6289_v57  ;;  %v1717_v15 = vadd.f32 %v1715_v23, %v1693_v54 }
 0x340   : > { %5281 = vmatpush3.msra.mxu0 %v6537_v3  ;;  %5284 = vmatprep.mubr.msk.f32.mxu0 %vm5685_vm4, %v5684_v58 }
 0x341   : > { %5282 = vmatprep.subr.mxu0 %v5684_v58  ;;  %5305 = vmatprep.mubr.msk.f32.mxu1 %vm5685_vm4, %v5684_v58  ;;  %v1175_v20 = vpop.permute.xlu1 %1174 }
 0x342   : > { %5283 = vmatpush3.msra.mxu0 %v6543_v30  ;;  %v1739_v21 = vpop.permute.xlu0 %1738  ;;  %v1177_v29 = vadd.f32 %v1175_v20, %v1153_v22  ;;  %5306 = vmatmul.mubr.f32.vlgmr.msra.gmra.mxu1 %v6262_v24 }
 0x343   : > { %5294 = vmatprep.subr.mxu0 %v5684_v58  ;;  %5285 = vmatmul.mubr.f32.vlgmr.msra.gmra.mxu0 %v6267_v28  ;;  %v1741_v17 = vadd.f32 %v1739_v21, %v1717_v15 }
 0x344   : > { %5295 = vmatpush3.msra.mxu0 %v2962_v46  ;;  %5298 = vmatprep.mubr.msk.f32.mxu0 %vm5685_vm4, %v5684_v58  ;;  %v1190_v56 = vadd.f32 %v1189_v31, %v1177_v29 }
 0x345   : > { %5296 = vmatprep.subr.mxu0 %v5684_v58  ;;  %v1754_v18 = vadd.f32 %v1753_v33, %v1741_v17  ;;  %v1212_v35 = vpop.permute.xlu1 %1211  ;;  %5315 = vmatprep.subr.mxu1 %v5684_v58 }
 0x346   : > { %5297 = vmatpush3.msra.mxu0 %v2969_v48  ;;  %v1776_v47 = vpop.permute.xlu0 %1775  ;;  %5316 = vmatpush3.msra.mxu1 %v6421_v63  ;;  %v1214_v3 = vadd.f32 %v1212_v35, %v1190_v56 }
 0x347   : > { %5299 = vmatmul.mubr.f32.vlgmr.msra.gmra.mxu0 %v6262_v24  ;;  %5317 = vmatprep.subr.mxu1 %v5684_v58  ;;  %v1778_v46 = vadd.f32 %v1776_v47, %v1754_v18 }
 0x348   : > { %5318 = vmatpush3.msra.mxu1 %v6437_v60  ;;  %5319 = vmatprep.mubr.msk.f32.mxu1 %vm5685_vm4, %v5684_v58 }
 0x349   : > { %v1236_v37 = vpop.permute.xlu1 %1235  ;;  %5329 = vmatprep.subr.mxu1 %v5684_v58  ;;  %5308 = vmatprep.subr.mxu0 %v5684_v58 }
 0x34a   : > { %v1800_v30 = vpop.permute.xlu0 %1799  ;;  %v1238_v48 = vadd.f32 %v1236_v37, %v1214_v3  ;;  %5309 = vmatpush3.msra.mxu0 %v6334_v43  ;;  %5312 = vmatprep.mubr.msk.f32.mxu0 %vm5685_vm4, %v5684_v58 }
 0x34b   : > { %v1802_v0 = vadd.f32 %v1800_v30, %v1778_v46  ;;  %5310 = vmatprep.subr.mxu0 %v5684_v58 }
 0x34c   : > { %v1251_v7 = vadd.f32 %v1250_v39, %v1238_v48  ;;  %5311 = vmatpush3.msra.mxu0 %v6406_v49 }
 0x34d   : > { %v1815_v41 = vadd.f32 %v1814_v51, %v1802_v0  ;;  %v1273_v2 = vpop.permute.xlu1 %1272  ;;  %5322 = vmatprep.subr.mxu0 %v5684_v58 }
 0x34e   : > { %v1837_v26 = vpop.permute.xlu0 %1836  ;;  %v1275_v61 = vadd.f32 %v1273_v2, %v1251_v7 }
 0x34f   : > { %v1839_v59 = vadd.f32 %v1837_v26, %v1815_v41 }
 0x351   : > { %v1297_v44 = vpop.permute.xlu1 %1296 }
 0x352   : > { %v1861_v12 = vpop.permute.xlu0 %1860  ;;  %v1299_v14 = vadd.f32 %v1297_v44, %v1275_v61 }
 0x353   : > { %v1863_v19 = vadd.f32 %v1861_v12, %v1839_v59 }
 0x354   : > { %v1306_v52 = vmax.f32 %v1299_v14, 0.0 }
 0x355   : > { %v1869_v53 = vmax.f32 %v1863_v19, 0.0 }
 0x356   : > { %1308 = vst.msk [vmem:[#allocation3 + $0x20] sm:$0xff] %vm1301_vm2, %v1306_v52 }
 0x357   : > { %1870 = vst.msk [vmem:[#allocation3 + $0x28] sm:$0xf] %vm1865_vm3, %v1869_v53 }
 0x35d   : > { %v3777_v45 = vld [vmem:[#allocation3 + $0x20] sm:$0xff] }
 0x35e   : > { %v3778_v50 = vld [vmem:[#allocation3 + $0x28] sm:$0xf]  ;;  %3781 = vrot.lane.b32.xlu1 %v3777_v45, %s5683_s9 }
 0x35f   : > { %3783 = vrot.lane.b32.xlu0 %v3778_v50, %s5683_s9  ;;  %s5434_s9 = smul.u32 24, %s6824_s28 }
 0x361   : > { %s6669_s22 = scalar_lea.vmem %s6803_s7, %s5434_s9 }
 0x3d0   : > { %v3782_v23 = vpop.permute.xlu1 %3781 }
 0x3d1   : > { %v3784_v25 = vpop.permute.xlu0 %3783  ;;  %v3787_v20 = vmax.f32 %v3777_v45, %v3782_v23 }
 0x3d2   : > { %v3788_v15 = vmax.f32 %v3778_v50, %v3784_v25 }
 0x3d3   : > { %v3791_v35 = vrot.slane %v3787_v20, 1 }
 0x3d4   : > { %v3792_v17 = vrot.slane %v3788_v15, 1 }
 0x3d6   : > { %v3797_v38 = vmax.f32 %v3788_v15, %v3792_v17  ;;  %v3793_v46 = vsel %vm1888_vm6, %v3791_v35, %v3792_v17 }
 0x3d7   : > { %v3796_v7 = vmax.f32 %v3787_v20, %v3793_v46 }
 0x3d8   : > { %v3799_v39 = vsel %vm1900_vm7, %v3797_v38, 0 }
 0x3d9   : > { %v3830_v26 = vand.u32 4294901760, %v3799_v39  ;;  %v3833_v44 = vand.u32 4294901760, %v3796_v7 }
 0x3db   : > { %v6675_v19 = vsub.f32 %v3799_v39, %v3830_v26  ;;  %v6678_v53 = vsub.f32 %v3796_v7, %v3833_v44 }
 0x3e6   : > { %v2523_v55 = vpop.f32.mrf.mxu1 }
 0x3e8   : > { %v5237_v11 = vpop.f32.mrf.mxu1 }
 0x3e9   : > { %v3916_v11 = vand.u32 4294901760, %v6678_v53 }
 0x3ea   : > { %v2674_v10 = vpop.f32.mrf.mxu1 }
 0x3ec   : > { %v5251_v62 = vpop.f32.mrf.mxu1 }
 0x3ee   : > { %v2442_v1 = vpop.f32.mrf.mxu0 }
 0x3ef   : > { %v2824_v16 = vpop.f32.mrf.mxu1  ;;  %v2524_v5 = vadd.f32 %v2523_v55, %v2442_v1  ;;  %v3909_v55 = vand.u32 4294901760, %v6675_v19 }
 0x3f0   : > { %v5230_v4 = vpop.f32.mrf.mxu0 }
 0x3f1   : > { %v5265_v8 = vpop.f32.mrf.mxu1  ;;  %v3910_v1 = vsub.f32 %v6675_v19, %v3909_v55  ;;  %v3917_v4 = vsub.f32 %v6678_v53, %v3916_v11 }
 0x3f3   : > { %v3911_v8 = vand.u32 4294901760, %v3910_v1 }
 0x3f4   : > { %v2599_v9 = vpop.f32.mrf.mxu0 }
 0x3f5   : > { %v2600_v27 = vadd.f32 %v2599_v9, %v2524_v5  ;;  %v3008_v54 = vpop.f32.mrf.mxu1  ;;  %v3918_v5 = vand.u32 4294901760, %v3917_v4 }
 0x3f6   : > { %v5244_v13 = vpop.f32.mrf.mxu0 }
 0x3f7   : > { %v2675_v34 = vadd.f32 %v2674_v10, %v2600_v27  ;;  %v5279_v22 = vpop.f32.mrf.mxu1 }
 0x3fa   : > { %v2751_v21 = vpop.f32.mrf.mxu0 }
 0x3fb   : > { %v2752_v29 = vadd.f32 %v2751_v21, %v2675_v34  ;;  %v3159_v31 = vpop.f32.mrf.mxu1 }
 0x3fc   : > { %v5258_v33 = vpop.f32.mrf.mxu0 }
 0x3fd   : > { %v2825_v56 = vadd.f32 %v2824_v16, %v2752_v29  ;;  %v5293_v18 = vpop.f32.mrf.mxu1 }
 0x3ff   : > { %2829 = vst.msk [vmem:[%s6669_s22] sm:$0x3f] %vm2828_vm8, %v2825_v56  ;;  %v2927_v47 = vpop.f32.mrf.mxu0 }
 0x400   : > { %v3009_v37 = vadd.f32 %v3008_v54, %v2927_v47 }
 0x401   : > { %v5272_v3 = vpop.f32.mrf.mxu0 }
 0x402   : > { %v3309_v30 = vpop.f32.mrf.mxu1 }
 0x403   : > { %v3084_v48 = vpop.f32.mrf.mxu0 }
 0x404   : > { %v3085_v0 = vadd.f32 %v3084_v48, %v3009_v37  ;;  %v5307_v51 = vpop.f32.mrf.mxu1 }
 0x405   : > { %v5286_v41 = vpop.f32.mrf.mxu0 }
 0x406   : > { %v3160_v2 = vadd.f32 %v3159_v31, %v3085_v0 }
 0x407   : > { %v3236_v61 = vpop.f32.mrf.mxu0 }
 0x408   : > { %v3237_v59 = vadd.f32 %v3236_v61, %v3160_v2 }
 0x409   : > { %v5300_v12 = vpop.f32.mrf.mxu0 }
 0x40a   : > { %v3310_v14 = vadd.f32 %v3309_v30, %v3237_v59 }
 0x40c   : > { %v3314_v52 = vsel %vm1896_vm5, %v3310_v14, 0 }
 0x40d   : > { %v3383_v45 = vand.u32 4294901760, %v3314_v52 }
 0x40f   : > { %v3384_v50 = vsub.f32 %v3314_v52, %v3383_v45  ;;  %5320 = vmatmul.mubr.f32.vlgmr.msra.gmra.mxu1 %v3383_v45 }
 0x410   : > { %5330 = vmatpush3.msra.mxu1 %v6334_v43  ;;  %5333 = vmatprep.mubr.msk.f32.mxu1 %vm5685_vm4, %v5684_v58 }
 0x411   : > { %5331 = vmatprep.subr.mxu1 %v5684_v58  ;;  %v3385_v10 = vand.u32 4294901760, %v3384_v50 }
 0x412   : > { %5332 = vmatpush3.msra.mxu1 %v6406_v49 }
 0x413   : > { %5343 = vmatprep.subr.mxu1 %v5684_v58  ;;  %5334 = vmatmul.mubr.f32.vlgmr.msra.gmra.mxu1 %v3385_v10  ;;  %v3386_v62 = vsub.f32 %v3384_v50, %v3385_v10 }
 0x414   : > { %5344 = vmatpush3.msra.mxu1 %v6334_v43  ;;  %5347 = vmatprep.mubr.msk.f32.mxu1 %vm5685_vm4, %v5684_v58 }
 0x415   : > { %5345 = vmatprep.subr.mxu1 %v5684_v58  ;;  %v3387_v16 = vand.u32 4294901760, %v3386_v62 }
 0x416   : > { %5346 = vmatpush3.msra.mxu1 %v6406_v49 }
 0x417   : > { %5357 = vmatprep.subr.mxu1 %v5684_v58  ;;  %5313 = vmatmul.mubr.f32.vlgmr.msra.gmra.mxu0 %v3387_v16 }
 0x418   : > { %5323 = vmatpush3.msra.mxu0 %v6388_v32  ;;  %5348 = vmatmul.mubr.f32.vlgmr.msra.gmra.mxu1 %v3383_v45 }
 0x419   : > { %5358 = vmatpush3.msra.mxu1 %v3911_v8  ;;  %5324 = vmatprep.subr.mxu0 %v5684_v58 }
 0x41a   : > { %5359 = vmatprep.subr.mxu1 %v5684_v58  ;;  %5325 = vmatpush3.msra.mxu0 %v6415_v42 }
 0x41b   : > { %5360 = vmatpush3.msra.mxu1 %v3918_v5  ;;  %5326 = vmatprep.mubr.msk.f32.mxu0 %vm5685_vm4, %v5684_v58 }
 0x41c   : > { %5336 = vmatprep.subr.mxu0 %v5684_v58  ;;  %5361 = vmatprep.mubr.msk.f32.mxu1 %vm5685_vm4, %v5684_v58 }
 0x41d   : > { %5371 = vmatprep.subr.mxu1 %v5684_v58  ;;  %5327 = vmatmul.mubr.f32.vlgmr.msra.gmra.mxu0 %v3384_v50 }
 0x41e   : > { %5337 = vmatpush3.msra.mxu0 %v6400_v40  ;;  %5362 = vmatmul.mubr.f32.vlgmr.msra.gmra.mxu1 %v6262_v24 }
 0x41f   : > { %5372 = vmatpush3.msra.mxu1 %v3830_v26  ;;  %5338 = vmatprep.subr.mxu0 %v5684_v58 }
 0x420   : > { %5373 = vmatprep.subr.mxu1 %v5684_v58  ;;  %5339 = vmatpush3.msra.mxu0 %v6426_v6 }
 0x421   : > { %5374 = vmatpush3.msra.mxu1 %v3833_v44  ;;  %5340 = vmatprep.mubr.msk.f32.mxu0 %vm5685_vm4, %v5684_v58 }
 0x422   : > { %5350 = vmatprep.subr.mxu0 %v5684_v58  ;;  %5375 = vmatprep.mubr.msk.f32.mxu1 %vm5685_vm4, %v5684_v58 }
 0x423   : > { %5385 = vmatprep.subr.mxu1 %v5684_v58  ;;  %5341 = vmatmul.mubr.f32.vlgmr.msra.gmra.mxu0 %v3383_v45 }
 0x424   : > { %5351 = vmatpush3.msra.mxu0 %v3830_v26  ;;  %5376 = vmatmul.mubr.f32.vlgmr.msra.gmra.mxu1 %v6274_v36 }
 0x425   : > { %5386 = vmatpush3.msra.mxu1 %v3830_v26  ;;  %5352 = vmatprep.subr.mxu0 %v5684_v58 }
 0x426   : > { %5387 = vmatprep.subr.mxu1 %v5684_v58  ;;  %5353 = vmatpush3.msra.mxu0 %v3833_v44 }
 0x427   : > { %5388 = vmatpush3.msra.mxu1 %v3833_v44  ;;  %5354 = vmatprep.mubr.msk.f32.mxu0 %vm5685_vm4, %v5684_v58 }
 0x428   : > { %5364 = vmatprep.subr.mxu0 %v5684_v58  ;;  %5355 = vmatmul.mubr.f32.vlgmr.msra.gmra.mxu0 %v6289_v57 }
 0x429   : > { %5365 = vmatpush3.msra.mxu0 %v6675_v19  ;;  %5368 = vmatprep.mubr.msk.f32.mxu0 %vm5685_vm4, %v5684_v58 }
 0x42a   : > { %5366 = vmatprep.subr.mxu0 %v5684_v58  ;;  %5389 = vmatprep.mubr.msk.f32.mxu1 %vm5685_vm4, %v5684_v58 }
 0x42b   : > { %5367 = vmatpush3.msra.mxu0 %v6678_v53  ;;  %5390 = vmatmul.mubr.f32.vlgmr.msra.gmra.mxu1 %v6262_v24 }
 0x42c   : > { %5378 = vmatprep.subr.mxu0 %v5684_v58  ;;  %5369 = vmatmul.mubr.f32.vlgmr.msra.gmra.mxu0 %v6267_v28 }
 0x42d   : > { %5379 = vmatpush3.msra.mxu0 %v3909_v55  ;;  %5382 = vmatprep.mubr.msk.f32.mxu0 %vm5685_vm4, %v5684_v58 }
 0x42e   : > { %5380 = vmatprep.subr.mxu0 %v5684_v58  ;;  %5399 = vmatprep.subr.mxu1 %v5684_v58 }
 0x42f   : > { %5381 = vmatpush3.msra.mxu0 %v3916_v11  ;;  %5400 = vmatpush3.msra.mxu1 %v6421_v63 }
 0x430   : > { %5383 = vmatmul.mubr.f32.vlgmr.msra.gmra.mxu0 %v6262_v24  ;;  %5401 = vmatprep.subr.mxu1 %v5684_v58 }
 0x431   : > { %5402 = vmatpush3.msra.mxu1 %v6437_v60  ;;  %5403 = vmatprep.mubr.msk.f32.mxu1 %vm5685_vm4, %v5684_v58 }
 0x432   : > { %5413 = vmatprep.subr.mxu1 %v5684_v58  ;;  %5392 = vmatprep.subr.mxu0 %v5684_v58 }
 0x433   : > { %5393 = vmatpush3.msra.mxu0 %v6334_v43  ;;  %5396 = vmatprep.mubr.msk.f32.mxu0 %vm5685_vm4, %v5684_v58 }
 0x434   : > { %5394 = vmatprep.subr.mxu0 %v5684_v58 }
 0x435   : > { %5395 = vmatpush3.msra.mxu0 %v6406_v49 }
 0x436   : > { %5406 = vmatprep.subr.mxu0 %v5684_v58 }
 0x4cf   : > { %v3470_v24 = vpop.f32.mrf.mxu1 }
 0x4d1   : > { %v5321_v28 = vpop.f32.mrf.mxu1 }
 0x4d3   : > { %v3621_v36 = vpop.f32.mrf.mxu1 }
 0x4d5   : > { %v5335_v57 = vpop.f32.mrf.mxu1 }
 0x4d7   : > { %v3389_v63 = vpop.f32.mrf.mxu0 }
 0x4d8   : > { %v3771_v60 = vpop.f32.mrf.mxu1  ;;  %v3471_v27 = vadd.f32 %v3470_v24, %v3389_v63 }
 0x4d9   : > { %v5314_v9 = vpop.f32.mrf.mxu0 }
 0x4da   : > { %v5349_v25 = vpop.f32.mrf.mxu1 }
 0x4dd   : > { %v3546_v54 = vpop.f32.mrf.mxu0 }
 0x4de   : > { %v3547_v13 = vadd.f32 %v3546_v54, %v3471_v27  ;;  %v3955_v23 = vpop.f32.mrf.mxu1 }
 0x4df   : > { %v5328_v34 = vpop.f32.mrf.mxu0 }
 0x4e0   : > { %v3622_v22 = vadd.f32 %v3621_v36, %v3547_v13  ;;  %v5363_v15 = vpop.f32.mrf.mxu1 }
 0x4e3   : > { %v3698_v20 = vpop.f32.mrf.mxu0 }
 0x4e4   : > { %v3699_v21 = vadd.f32 %v3698_v20, %v3622_v22  ;;  %v4106_v29 = vpop.f32.mrf.mxu1 }
 0x4e5   : > { %v5342_v31 = vpop.f32.mrf.mxu0 }
 0x4e6   : > { %v3772_v17 = vadd.f32 %v3771_v60, %v3699_v21  ;;  %v5377_v33 = vpop.f32.mrf.mxu1 }
 0x4e8   : > { %5069 = vst.msk [vmem:[%s6669_s22 + $0x8] sm:$0x3f] %vm2828_vm8, %v3772_v17  ;;  %v3874_v56 = vpop.f32.mrf.mxu0 }
 0x4e9   : > { %v3956_v35 = vadd.f32 %v3955_v23, %v3874_v56 }
 0x4ea   : > { %v5356_v18 = vpop.f32.mrf.mxu0 }
 0x4eb   : > { %v4256_v47 = vpop.f32.mrf.mxu1 }
 0x4ec   : > { %v4031_v38 = vpop.f32.mrf.mxu0 }
 0x4ed   : > { %v4032_v3 = vadd.f32 %v4031_v38, %v3956_v35  ;;  %v5391_v46 = vpop.f32.mrf.mxu1 }
 0x4ee   : > { %v5370_v37 = vpop.f32.mrf.mxu0 }
 0x4ef   : > { %v4107_v30 = vadd.f32 %v4106_v29, %v4032_v3 }
 0x4f0   : > { %v4183_v48 = vpop.f32.mrf.mxu0 }
 0x4f1   : > { %v4184_v39 = vadd.f32 %v4183_v48, %v4107_v30 }
 0x4f2   : > { %v5384_v0 = vpop.f32.mrf.mxu0 }
 0x4f3   : > { %v4257_v51 = vadd.f32 %v4256_v47, %v4184_v39 }
 0x4f5   : > { %v4261_v7 = vsel %vm1896_vm5, %v4257_v51, 0 }
 0x4f6   : > { %v4330_v41 = vand.u32 4294901760, %v4261_v7 }
 0x4f8   : > { %v4331_v2 = vsub.f32 %v4261_v7, %v4330_v41  ;;  %5404 = vmatmul.mubr.f32.vlgmr.msra.gmra.mxu1 %v4330_v41 }
 0x4f9   : > { %5414 = vmatpush3.msra.mxu1 %v6334_v43  ;;  %5417 = vmatprep.mubr.msk.f32.mxu1 %vm5685_vm4, %v5684_v58 }
 0x4fa   : > { %5415 = vmatprep.subr.mxu1 %v5684_v58  ;;  %v4332_v26 = vand.u32 4294901760, %v4331_v2 }
 0x4fb   : > { %5416 = vmatpush3.msra.mxu1 %v6406_v49 }
 0x4fc   : > { %5418 = vmatmul.mubr.f32.vlgmr.msra.gmra.mxu1 %v4332_v26  ;;  %5427 = vmatprep.subr.mxu1 %v5684_v58  ;;  %v4333_v61 = vsub.f32 %v4331_v2, %v4332_v26 }
 0x4fd   : > { %5428 = vmatpush3.msra.mxu1 %v6334_v43  ;;  %5431 = vmatprep.mubr.msk.f32.mxu1 %vm5685_vm4, %v5684_v58 }
 0x4fe   : > { %5429 = vmatprep.subr.mxu1 %v5684_v58  ;;  %v4334_v59 = vand.u32 4294901760, %v4333_v61 }
 0x4ff   : > { %5430 = vmatpush3.msra.mxu1 %v6406_v49 }
 0x500   : > { %5397 = vmatmul.mubr.f32.vlgmr.msra.gmra.mxu0 %v4334_v59  ;;  %5432 = vmatmul.mubr.f32.vlgmr.msra.gmra.mxu1 %v4330_v41 }
 0x501   : > { %5407 = vmatpush3.msra.mxu0 %v6388_v32  ;;  %5410 = vmatprep.mubr.msk.f32.mxu0 %vm5685_vm4, %v5684_v58 }
 0x502   : > { %5408 = vmatprep.subr.mxu0 %v5684_v58 }
 0x503   : > { %5409 = vmatpush3.msra.mxu0 %v6415_v42 }
 0x504   : > { %5411 = vmatmul.mubr.f32.vlgmr.msra.gmra.mxu0 %v4331_v2  ;;  %5420 = vmatprep.subr.mxu0 %v5684_v58 }
 0x505   : > { %5421 = vmatpush3.msra.mxu0 %v6400_v40  ;;  %5424 = vmatprep.mubr.msk.f32.mxu0 %vm5685_vm4, %v5684_v58 }
 0x506   : > { %5422 = vmatprep.subr.mxu0 %v5684_v58 }
 0x507   : > { %5423 = vmatpush3.msra.mxu0 %v6426_v6 }
 0x508   : > { %5425 = vmatmul.mubr.f32.vlgmr.msra.gmra.mxu0 %v4330_v41 }
 0x5b8   : > { %v4417_v43 = vpop.f32.mrf.mxu1 }
 0x5ba   : > { %v5405_v32 = vpop.f32.mrf.mxu1 }
 0x5bc   : > { %v4568_v49 = vpop.f32.mrf.mxu1 }
 0x5be   : > { %v5419_v44 = vpop.f32.mrf.mxu1 }
 0x5c0   : > { %v4336_v12 = vpop.f32.mrf.mxu0  ;;  %v4718_v42 = vpop.f32.mrf.mxu1 }
 0x5c1   : > { %v4418_v52 = vadd.f32 %v4417_v43, %v4336_v12 }
 0x5c2   : > { %v5398_v14 = vpop.f32.mrf.mxu0  ;;  %v5433_v19 = vpop.f32.mrf.mxu1 }
 0x5c4   : > { %v4493_v53 = vpop.f32.mrf.mxu0 }
 0x5c5   : > { %v4494_v40 = vadd.f32 %v4493_v53, %v4418_v52 }
 0x5c6   : > { %v5412_v45 = vpop.f32.mrf.mxu0 }
 0x5c7   : > { %v4569_v50 = vadd.f32 %v4568_v49, %v4494_v40 }
 0x5c8   : > { %v4645_v55 = vpop.f32.mrf.mxu0 }
 0x5c9   : > { %v4646_v11 = vadd.f32 %v4645_v55, %v4569_v50 }
 0x5ca   : > { %v5426_v58 = vpop.f32.mrf.mxu0 }
 0x5cb   : > { %v4719_v10 = vadd.f32 %v4718_v42, %v4646_v11 }
 0x5cd   : > { %5070 = vst.msk [vmem:[%s6669_s22 + $0x10] sm:$0x3f] %vm2828_vm8, %v4719_v10 }
 0x5ce PF: > { %p20_p0 = scmp.ge.s32.totalorder %s5815_s15, 4   ;;  %s6819_s24 = smov %s5665_s25 }
 0x5cf   : > { %s6820_s25 = smov %s5669_s26  ;;  %s6821_s26 = smov %s5824_s14 }
 0x5d0   : > { %s6822_s27 = smov %s5815_s15  ;;  %22 = sbr.rel (!%p20_p0) target bundleno = 6 (0x6), region = 111 }
 0x5d5   :  { %4745 = vsyncpa [#allocation5], 1 }
 0x5d6   :  { %4747 = vsyncpa [#allocation5 + $0x1], 1 }
 0x5d7   :  { %4748 = vsyncpa [#allocation6], 1 }
 0x5d8   :  { %4750 = vsyncpa [#allocation6 + $0x1], 1 }
 0x5d9   :  { %4751 = vsyncpa [#allocation9], 1 }
 0x5da   :  { %4752 = vsyncpa [#allocation12], 1 }

</bundles_post_ra>
